<compile_context>
chip_gen: v7x
topology: tpu7x:2x2x1
jax: 0.10.0
libtpu: 0.0.40
codegen_flags: <defaults>
</compile_context>

<pallas_src>
import functools

import jax
import jax.numpy as jnp
import numpy as np
from jax.experimental import pallas as pl
from jax.experimental.pallas import tpu as pltpu


# Scaled-down VGG13 feature config: (spatial S, Cin, Cout, pool_after_this_conv).
# Channels double when spatial halves, so S*Cout == 128 for every conv layer.
LAYERS = (
    (16, 8, 8, False), (16, 8, 8, True),
    (8, 8, 16, False), (8, 16, 16, True),
    (4, 16, 32, False), (4, 32, 32, True),
    (2, 32, 64, False), (2, 64, 64, True),
)
FC_DIM = 128      # scaled stand-in for VGG's 4096-wide fc_features output
IN_CH = 3
IN_CH_PAD = 8     # RGB zero-padded to 8 channels so lanes stay 8-aligned
ROW = 128         # S * Cout for every conv layer


# ------------------------------------------------------------------
# Fused kernel: 8 convs + 4 pools + 2 FC + per-view max, one batch element per step
# ------------------------------------------------------------------

def _fused_kernel(x_ref, w0, w1, w2, w3, w4, w5, w6, w7,
                  cb_ref, fc1w_ref, fc1b_ref, fc2w_ref, fc2b_ref,
                  xview_ref, xmax_ref, *, V):
    # x_ref : (1, V, 16, 128) bf16   -- all views of one batch element, NHWC lane-packed
    # w{l}  : (3, S*Cin, 128) bf16   -- block-tridiagonal per-ky conv weights
    # cb_ref: (8, 1, 128) f32        -- per-layer bias tiled across width blocks
    # fc*   : FC weights (bf16) / biases (f32)
    w_refs = (w0, w1, w2, w3, w4, w5, w6, w7)
    act = x_ref[0].astype(jnp.float32)                       # (V, 16, 128)

    # ---- self.features (torch wraps features[:1] in no_grad(); forward math identical)
    for li, (S, Cin, Cout, pool) in enumerate(LAYERS):
        D = S * Cin
        # Three per-image row-shifted views (zero rows at the borders).  The kx
        # (width) shifts live inside the weight matrices, so no lane shifts here.
        zrow = jnp.zeros((V, 1, D), jnp.float32)
        up = jnp.concatenate([zrow, act[:, :S - 1, :]], axis=1)   # rows y-1
        dn = jnp.concatenate([act[:, 1:, :], zrow], axis=1)       # rows y+1

        wk = w_refs[li]
        h = None
        for ky, patch in enumerate((up, act, dn)):
            lhs = patch.reshape(V * S, D).astype(jnp.bfloat16)
            t = jnp.dot(lhs, wk[ky], preferred_element_type=jnp.float32)
            h = t if h is None else h + t
        h = jnp.maximum(h + cb_ref[li], 0.0)                 # (V*S, 128) f32

        if pool:
            # Fused 2x2/stride-2 max pool.  The conv's output columns were permuted
            # [even x | odd x] at weight-build time, so the W-pool is an aligned
            # half-lane max; the result is already in standard (w_pooled, c) order.
            half = (S // 2) * Cout                           # == 64
            wp = jnp.maximum(h[:, :half], h[:, half:])       # (V*S, 64)
            wp3 = wp.reshape(V, S, half)
            rows = [jnp.maximum(wp3[:, 2 * p:2 * p + 1, :],
                                wp3[:, 2 * p + 1:2 * p + 2, :])
                    for p in range(S // 2)]
            act = rows[0] if len(rows) == 1 else jnp.concatenate(rows, axis=1)
        else:
            act = h.reshape(V, S, S * Cout)

    # ---- x.view(N, -1): final spatial is 1x1, so NHWC / NCHW flatten orders coincide
    feat = act.reshape(V, -1)                                # (V, 64) f32

    # ---- fc_features = Linear+ReLU+Dropout+Linear+ReLU+Dropout (classifier[:-1])
    # TODO(synk): Dropout is eval-mode identity; training-mode dropout not implemented.
    h1 = jnp.dot(feat.astype(jnp.bfloat16), fc1w_ref[...],
                 preferred_element_type=jnp.float32) + fc1b_ref[...]
    h1 = jnp.maximum(h1, 0.0)
    h2 = jnp.dot(h1.astype(jnp.bfloat16), fc2w_ref[...],
                 preferred_element_type=jnp.float32) + fc2b_ref[...]
    h2 = jnp.maximum(h2, 0.0)

    # ---- x_view + per-view max (torch.max(x_view, 1)[0])
    xview_ref[0] = h2                                        # (V, 128)
    xmax_ref[0] = jnp.max(h2, axis=0, keepdims=True)         # (1, 128)


# ------------------------------------------------------------------
# BaseFeatureNet.forward
# ------------------------------------------------------------------

def base_feature_net_forward(params, x):
    """x: (B, V, C, H, W) float32 -> (x_max (B, FC_DIM), x_view (B, V, FC_DIM))."""
    b, v, c, h, w = x.shape
    n = b * v
    # x.view(B*V, C, H, W), NCHW -> NHWC, zero-pad channels to 8 lanes, bf16.
    xf = x.reshape(n, c, h, w).transpose(0, 2, 3, 1)
    xf = jnp.pad(xf, ((0, 0), (0, 0), (0, 0), (0, IN_CH_PAD - c)))
    xf = xf.reshape(b, v, h, w * IN_CH_PAD).astype(jnp.bfloat16)

    conv_w = params["conv_w"]
    in_specs = [pl.BlockSpec((1, v, h, w * IN_CH_PAD), lambda i: (i, 0, 0, 0))]
    in_specs += [pl.BlockSpec(wl.shape, lambda i: (0, 0, 0)) for wl in conv_w]
    in_specs += [
        pl.BlockSpec(params["conv_b"].shape, lambda i: (0, 0, 0)),
        pl.BlockSpec(params["fc1_w"].shape, lambda i: (0, 0)),
        pl.BlockSpec(params["fc1_b"].shape, lambda i: (0, 0)),
        pl.BlockSpec(params["fc2_w"].shape, lambda i: (0, 0)),
        pl.BlockSpec(params["fc2_b"].shape, lambda i: (0, 0)),
    ]

    x_view, x_max = pl.pallas_call(
        functools.partial(_fused_kernel, V=v),
        out_shape=(
            jax.ShapeDtypeStruct((b, v, FC_DIM), jnp.float32),
            jax.ShapeDtypeStruct((b, 1, FC_DIM), jnp.float32),
        ),
        grid_spec=pltpu.PrefetchScalarGridSpec(
            num_scalar_prefetch=0,
            grid=(b,),                       # >= 2 parallel steps -> both v7x TCs busy
            in_specs=in_specs,
            out_specs=(
                pl.BlockSpec((1, v, FC_DIM), lambda i: (i, 0, 0)),
                pl.BlockSpec((1, 1, FC_DIM), lambda i: (i, 0, 0)),
            ),
        ),
        compiler_params=pltpu.CompilerParams(dimension_semantics=("parallel",)),
    )(xf, *conv_w, params["conv_b"], params["fc1_w"], params["fc1_b"],
      params["fc2_w"], params["fc2_b"])
    return x_max.reshape(b, FC_DIM), x_view


# ------------------------------------------------------------------
# Parameter construction (synthetic, deterministic)
# ------------------------------------------------------------------

def _expand_conv_weight(wconv, S, Cin, Cout, even_odd_out):
    """(3,3,Cin,Cout) HWIO taps -> (3, S*Cin, S*Cout) block-tridiagonal matrices
    (one per ky row-shift; all kx shifts folded into off-diagonal blocks).  If
    even_odd_out, output width-blocks are reordered [even x | odd x] so the fused
    2x2 pool reduces to an aligned half-lane max inside the kernel."""
    # TODO(synk): this W-block expansion is for the scaled config only; a full-size
    # VGG13 should keep per-tap (Cin,Cout) weights and K-tile the 4096-wide FCs.
    K, N = S * Cin, S * Cout
    wk = np.zeros((3, K, N), np.float32)
    for ky in range(3):
        for x_out in range(S):
            for kx in range(3):
                x_in = x_out + kx - 1
                if 0 <= x_in < S:
                    wk[ky, x_in * Cin:(x_in + 1) * Cin,
                       x_out * Cout:(x_out + 1) * Cout] = wconv[ky, kx]
    if even_odd_out:
        perm = list(range(0, S, 2)) + list(range(1, S, 2))
        wk = wk.reshape(3, K, S, Cout)[:, :, perm, :].reshape(3, K, N)
    return jnp.asarray(wk, dtype=jnp.bfloat16)


def init_params(key):
    params = {"conv_w": [], "raw_conv": []}
    biases = []
    for li, (S, Cin, Cout, pool) in enumerate(LAYERS):
        key, k1, k2 = jax.random.split(key, 3)
        fan_in = 9 * (IN_CH if li == 0 else Cin)
        w = jax.random.normal(k1, (3, 3, Cin, Cout), jnp.float32) * (2.0 / fan_in) ** 0.5
        if li == 0:
            w = w.at[:, :, IN_CH:, :].set(0.0)   # zero weights for padded input channels
        bias = 0.05 * jax.random.normal(k2, (Cout,), jnp.float32)
        params["raw_conv"].append((w, bias))
        params["conv_w"].append(_expand_conv_weight(np.asarray(w), S, Cin, Cout, pool))
        biases.append(jnp.tile(bias, S))          # (S*Cout,) == (128,)
    params["conv_b"] = jnp.stack(biases).reshape(len(LAYERS), 1, ROW)

    flat = LAYERS[-1][2]                          # 64 (final spatial is 1x1)
    key, k1, k2, k3, k4 = jax.random.split(key, 5)
    fc1_w = jax.random.normal(k1, (flat, FC_DIM), jnp.float32) * (2.0 / flat) ** 0.5
    fc2_w = jax.random.normal(k3, (FC_DIM, FC_DIM), jnp.float32) * (2.0 / FC_DIM) ** 0.5
    params["fc1_w"] = fc1_w.astype(jnp.bfloat16)
    params["fc2_w"] = fc2_w.astype(jnp.bfloat16)
    params["fc1_b"] = (0.05 * jax.random.normal(k2, (FC_DIM,), jnp.float32)).reshape(1, FC_DIM)
    params["fc2_b"] = (0.05 * jax.random.normal(k4, (FC_DIM,), jnp.float32)).reshape(1, FC_DIM)
    return params


# ------------------------------------------------------------------
# Pure-XLA reference (same bf16 rounding points as the kernel)
# ------------------------------------------------------------------

def reference_forward(params, x):
    b, v, c, h, w = x.shape
    n = b * v
    a = x.reshape(n, c, h, w).transpose(0, 2, 3, 1)
    a = jnp.pad(a, ((0, 0), (0, 0), (0, 0), (0, IN_CH_PAD - c))).astype(jnp.float32)
    for li, (S, Cin, Cout, pool) in enumerate(LAYERS):
        wconv, bias = params["raw_conv"][li]
        ab = a.astype(jnp.bfloat16).astype(jnp.float32)
        ap = jnp.pad(ab, ((0, 0), (1, 1), (1, 1), (0, 0)))
        out = None
        for ky in range(3):
            for kx in range(3):
                patch = ap[:, ky:ky + S, kx:kx + S, :]
                wtap = wconv[ky, kx].astype(jnp.bfloat16).astype(jnp.float32)
                t = jnp.einsum("nyxc,cd->nyxd", patch, wtap)
                out = t if out is None else out + t
        a = jnp.maximum(out + bias, 0.0)
        if pool:
            a = a.reshape(n, S // 2, 2, S // 2, 2, Cout).max(axis=(2, 4))
    feat = a.reshape(n, -1)
    w1 = params["fc1_w"].astype(jnp.float32)
    w2 = params["fc2_w"].astype(jnp.float32)
    h1 = jnp.maximum(jnp.dot(feat.astype(jnp.bfloat16).astype(jnp.float32), w1)
                     + params["fc1_b"], 0.0)
    h2 = jnp.maximum(jnp.dot(h1.astype(jnp.bfloat16).astype(jnp.float32), w2)
                     + params["fc2_b"], 0.0)
    x_view = h2.reshape(b, v, FC_DIM)
    return jnp.max(x_view, axis=1), x_view


if __name__ == "__main__":
    key = jax.random.PRNGKey(0)
    kp, kx = jax.random.split(key)

    B, V, C, H, W = 2, 3, 3, 16, 16
    params = init_params(kp)
    x = jax.random.normal(kx, (B, V, C, H, W), jnp.float32)

    fwd = jax.jit(functools.partial(base_feature_net_forward, params))
    x_max, x_view = fwd(x)
    jax.block_until_ready((x_max, x_view))

    assert x_max.shape == (B, FC_DIM), x_max.shape
    assert x_view.shape == (B, V, FC_DIM), x_view.shape

    # x_max must equal the per-batch max over views.
    assert bool(jnp.allclose(x_max, jnp.max(x_view, axis=1), atol=1e-6))

    # Compare against the pure-XLA reference (same bf16 rounding points).
    ref_max, ref_view = jax.jit(functools.partial(reference_forward, params))(x)
    err = float(jnp.max(jnp.abs(x_view - ref_view)))
    assert err < 5e-3, f"max |kernel - reference| = {err}"

    print("KERNEL_OK")
</pallas_src>

<mosaic_0001>
module attributes {stable_mosaic.version = 11 : i64} {
  func.func @_fused_kernel(%arg0: i32, %arg1: memref<1x3x16x128xbf16, #tpu.memory_space<vmem>>, %arg2: memref<3x128x128xbf16, #tpu.memory_space<vmem>>, %arg3: memref<3x128x128xbf16, #tpu.memory_space<vmem>>, %arg4: memref<3x64x128xbf16, #tpu.memory_space<vmem>>, %arg5: memref<3x128x128xbf16, #tpu.memory_space<vmem>>, %arg6: memref<3x64x128xbf16, #tpu.memory_space<vmem>>, %arg7: memref<3x128x128xbf16, #tpu.memory_space<vmem>>, %arg8: memref<3x64x128xbf16, #tpu.memory_space<vmem>>, %arg9: memref<3x128x128xbf16, #tpu.memory_space<vmem>>, %arg10: memref<8x1x128xf32, #tpu.memory_space<vmem>>, %arg11: memref<64x128xbf16, #tpu.memory_space<vmem>>, %arg12: memref<1x128xf32, #tpu.memory_space<vmem>>, %arg13: memref<128x128xbf16, #tpu.memory_space<vmem>>, %arg14: memref<1x128xf32, #tpu.memory_space<vmem>>, %arg15: memref<1x3x128xf32, #tpu.memory_space<vmem>>, %arg16: memref<1x1x128xf32, #tpu.memory_space<vmem>>) attributes {dimension_semantics = [#tpu.dimension_semantics<parallel>], iteration_bounds = array<i64: 2>, scalar_prefetch = 0 : i64, scratch_operands = 0 : i64, tpu.core_type = #tpu.core_type<tc>, window_params = [{transform_indices = @transform_0, window_bounds = array<i64: 1, 3, 16, 128>}, {pipeline_mode = #tpu.pipeline_mode<synchronous>, transform_indices = @transform_1, window_bounds = array<i64: 3, 128, 128>}, {pipeline_mode = #tpu.pipeline_mode<synchronous>, transform_indices = @transform_2, window_bounds = array<i64: 3, 128, 128>}, {pipeline_mode = #tpu.pipeline_mode<synchronous>, transform_indices = @transform_3, window_bounds = array<i64: 3, 64, 128>}, {pipeline_mode = #tpu.pipeline_mode<synchronous>, transform_indices = @transform_4, window_bounds = array<i64: 3, 128, 128>}, {pipeline_mode = #tpu.pipeline_mode<synchronous>, transform_indices = @transform_5, window_bounds = array<i64: 3, 64, 128>}, {pipeline_mode = #tpu.pipeline_mode<synchronous>, transform_indices = @transform_6, window_bounds = array<i64: 3, 128, 128>}, {pipeline_mode = #tpu.pipeline_mode<synchronous>, transform_indices = @transform_7, window_bounds = array<i64: 3, 64, 128>}, {pipeline_mode = #tpu.pipeline_mode<synchronous>, transform_indices = @transform_8, window_bounds = array<i64: 3, 128, 128>}, {pipeline_mode = #tpu.pipeline_mode<synchronous>, transform_indices = @transform_9, window_bounds = array<i64: 8, 1, 128>}, {pipeline_mode = #tpu.pipeline_mode<synchronous>, transform_indices = @transform_10, window_bounds = array<i64: 64, 128>}, {pipeline_mode = #tpu.pipeline_mode<synchronous>, transform_indices = @transform_11, window_bounds = array<i64: 1, 128>}, {pipeline_mode = #tpu.pipeline_mode<synchronous>, transform_indices = @transform_12, window_bounds = array<i64: 128, 128>}, {pipeline_mode = #tpu.pipeline_mode<synchronous>, transform_indices = @transform_13, window_bounds = array<i64: 1, 128>}, {transform_indices = @transform_14, window_bounds = array<i64: 1, 3, 128>}, {transform_indices = @transform_15, window_bounds = array<i64: 1, 1, 128>}]} {
    %c0 = arith.constant 0 : index
    %c0_0 = arith.constant 0 : index
    %c0_1 = arith.constant 0 : index
    %c0_2 = arith.constant 0 : index
    %0 = vector.load %arg1[%c0, %c0_0, %c0_1, %c0_2] : memref<1x3x16x128xbf16, #tpu.memory_space<vmem>>, vector<1x3x16x128xbf16>
    %1 = vector.shape_cast %0 : vector<1x3x16x128xbf16> to vector<3x16x128xbf16>
    %2 = arith.extf %1 : vector<3x16x128xbf16> to vector<3x16x128xf32>
    %cst = arith.constant 0.000000e+00 : f32
    %3 = vector.broadcast %cst : f32 to vector<3x1x128xf32>
    %4 = vector.extract_strided_slice %2 {offsets = [0, 0, 0], sizes = [3, 15, 128], strides = [1, 1, 1]} : vector<3x16x128xf32> to vector<3x15x128xf32>
    %5 = tpu.concatenate %3, %4 in 1 : vector<3x1x128xf32>, vector<3x15x128xf32> -> vector<3x16x128xf32>
    %6 = vector.extract_strided_slice %2 {offsets = [0, 1, 0], sizes = [3, 15, 128], strides = [1, 1, 1]} : vector<3x16x128xf32> to vector<3x15x128xf32>
    %7 = tpu.concatenate %6, %3 in 1 : vector<3x15x128xf32>, vector<3x1x128xf32> -> vector<3x16x128xf32>
    %8 = vector.shape_cast %5 : vector<3x16x128xf32> to vector<48x128xf32>
    %9 = arith.truncf %8 : vector<48x128xf32> to vector<48x128xbf16>
    %c0_3 = arith.constant 0 : index
    %c0_4 = arith.constant 0 : index
    %c0_5 = arith.constant 0 : index
    %10 = vector.load %arg2[%c0_3, %c0_4, %c0_5] : memref<3x128x128xbf16, #tpu.memory_space<vmem>>, vector<1x128x128xbf16>
    %11 = vector.shape_cast %10 : vector<1x128x128xbf16> to vector<128x128xbf16>
    %cst_6 = arith.constant dense<0.000000e+00> : vector<48x128xf32>
    %12 = tpu.matmul %9, %11, %cst_6 {dimension_numbers = #tpu.dot_dimension_numbers<[1], [0], [0], [1], [0, 0, 1, 1], [], []>} : vector<48x128xbf16>, vector<128x128xbf16>, vector<48x128xf32> -> vector<48x128xf32>
    %13 = vector.shape_cast %2 : vector<3x16x128xf32> to vector<48x128xf32>
    %14 = arith.truncf %13 : vector<48x128xf32> to vector<48x128xbf16>
    %c1 = arith.constant 1 : index
    %c0_7 = arith.constant 0 : index
    %c0_8 = arith.constant 0 : index
    %15 = vector.load %arg2[%c1, %c0_7, %c0_8] : memref<3x128x128xbf16, #tpu.memory_space<vmem>>, vector<1x128x128xbf16>
    %16 = vector.shape_cast %15 : vector<1x128x128xbf16> to vector<128x128xbf16>
    %cst_9 = arith.constant dense<0.000000e+00> : vector<48x128xf32>
    %17 = tpu.matmul %14, %16, %cst_9 {dimension_numbers = #tpu.dot_dimension_numbers<[1], [0], [0], [1], [0, 0, 1, 1], [], []>} : vector<48x128xbf16>, vector<128x128xbf16>, vector<48x128xf32> -> vector<48x128xf32>
    %18 = arith.addf %12, %17 : vector<48x128xf32>
    %19 = vector.shape_cast %7 : vector<3x16x128xf32> to vector<48x128xf32>
    %20 = arith.truncf %19 : vector<48x128xf32> to vector<48x128xbf16>
    %c2 = arith.constant 2 : index
    %c0_10 = arith.constant 0 : index
    %c0_11 = arith.constant 0 : index
    %21 = vector.load %arg2[%c2, %c0_10, %c0_11] : memref<3x128x128xbf16, #tpu.memory_space<vmem>>, vector<1x128x128xbf16>
    %22 = vector.shape_cast %21 : vector<1x128x128xbf16> to vector<128x128xbf16>
    %cst_12 = arith.constant dense<0.000000e+00> : vector<48x128xf32>
    %23 = tpu.matmul %20, %22, %cst_12 {dimension_numbers = #tpu.dot_dimension_numbers<[1], [0], [0], [1], [0, 0, 1, 1], [], []>} : vector<48x128xbf16>, vector<128x128xbf16>, vector<48x128xf32> -> vector<48x128xf32>
    %24 = arith.addf %18, %23 : vector<48x128xf32>
    %c0_13 = arith.constant 0 : index
    %c0_14 = arith.constant 0 : index
    %c0_15 = arith.constant 0 : index
    %25 = vector.load %arg10[%c0_13, %c0_14, %c0_15] : memref<8x1x128xf32, #tpu.memory_space<vmem>>, vector<1x1x128xf32>
    %26 = vector.shape_cast %25 : vector<1x1x128xf32> to vector<1x128xf32>
    %27 = vector.broadcast %26 : vector<1x128xf32> to vector<48x128xf32>
    %28 = arith.addf %24, %27 : vector<48x128xf32>
    %cst_16 = arith.constant 0.000000e+00 : f32
    %29 = vector.broadcast %cst_16 : f32 to vector<48x128xf32>
    %30 = arith.maximumf %28, %29 : vector<48x128xf32>
    %31 = vector.shape_cast %30 : vector<48x128xf32> to vector<3x16x128xf32>
    %cst_17 = arith.constant 0.000000e+00 : f32
    %32 = vector.broadcast %cst_17 : f32 to vector<3x1x128xf32>
    %33 = vector.extract_strided_slice %31 {offsets = [0, 0, 0], sizes = [3, 15, 128], strides = [1, 1, 1]} : vector<3x16x128xf32> to vector<3x15x128xf32>
    %34 = tpu.concatenate %32, %33 in 1 : vector<3x1x128xf32>, vector<3x15x128xf32> -> vector<3x16x128xf32>
    %35 = vector.extract_strided_slice %31 {offsets = [0, 1, 0], sizes = [3, 15, 128], strides = [1, 1, 1]} : vector<3x16x128xf32> to vector<3x15x128xf32>
    %36 = tpu.concatenate %35, %32 in 1 : vector<3x15x128xf32>, vector<3x1x128xf32> -> vector<3x16x128xf32>
    %37 = vector.shape_cast %34 : vector<3x16x128xf32> to vector<48x128xf32>
    %38 = arith.truncf %37 : vector<48x128xf32> to vector<48x128xbf16>
    %c0_18 = arith.constant 0 : index
    %c0_19 = arith.constant 0 : index
    %c0_20 = arith.constant 0 : index
    %39 = vector.load %arg3[%c0_18, %c0_19, %c0_20] : memref<3x128x128xbf16, #tpu.memory_space<vmem>>, vector<1x128x128xbf16>
    %40 = vector.shape_cast %39 : vector<1x128x128xbf16> to vector<128x128xbf16>
    %cst_21 = arith.constant dense<0.000000e+00> : vector<48x128xf32>
    %41 = tpu.matmul %38, %40, %cst_21 {dimension_numbers = #tpu.dot_dimension_numbers<[1], [0], [0], [1], [0, 0, 1, 1], [], []>} : vector<48x128xbf16>, vector<128x128xbf16>, vector<48x128xf32> -> vector<48x128xf32>
    %42 = vector.shape_cast %31 : vector<3x16x128xf32> to vector<48x128xf32>
    %43 = arith.truncf %42 : vector<48x128xf32> to vector<48x128xbf16>
    %c1_22 = arith.constant 1 : index
    %c0_23 = arith.constant 0 : index
    %c0_24 = arith.constant 0 : index
    %44 = vector.load %arg3[%c1_22, %c0_23, %c0_24] : memref<3x128x128xbf16, #tpu.memory_space<vmem>>, vector<1x128x128xbf16>
    %45 = vector.shape_cast %44 : vector<1x128x128xbf16> to vector<128x128xbf16>
    %cst_25 = arith.constant dense<0.000000e+00> : vector<48x128xf32>
    %46 = tpu.matmul %43, %45, %cst_25 {dimension_numbers = #tpu.dot_dimension_numbers<[1], [0], [0], [1], [0, 0, 1, 1], [], []>} : vector<48x128xbf16>, vector<128x128xbf16>, vector<48x128xf32> -> vector<48x128xf32>
    %47 = arith.addf %41, %46 : vector<48x128xf32>
    %48 = vector.shape_cast %36 : vector<3x16x128xf32> to vector<48x128xf32>
    %49 = arith.truncf %48 : vector<48x128xf32> to vector<48x128xbf16>
    %c2_26 = arith.constant 2 : index
    %c0_27 = arith.constant 0 : index
    %c0_28 = arith.constant 0 : index
    %50 = vector.load %arg3[%c2_26, %c0_27, %c0_28] : memref<3x128x128xbf16, #tpu.memory_space<vmem>>, vector<1x128x128xbf16>
    %51 = vector.shape_cast %50 : vector<1x128x128xbf16> to vector<128x128xbf16>
    %cst_29 = arith.constant dense<0.000000e+00> : vector<48x128xf32>
    %52 = tpu.matmul %49, %51, %cst_29 {dimension_numbers = #tpu.dot_dimension_numbers<[1], [0], [0], [1], [0, 0, 1, 1], [], []>} : vector<48x128xbf16>, vector<128x128xbf16>, vector<48x128xf32> -> vector<48x128xf32>
    %53 = arith.addf %47, %52 : vector<48x128xf32>
    %c1_30 = arith.constant 1 : index
    %c0_31 = arith.constant 0 : index
    %c0_32 = arith.constant 0 : index
    %54 = vector.load %arg10[%c1_30, %c0_31, %c0_32] : memref<8x1x128xf32, #tpu.memory_space<vmem>>, vector<1x1x128xf32>
    %55 = vector.shape_cast %54 : vector<1x1x128xf32> to vector<1x128xf32>
    %56 = vector.broadcast %55 : vector<1x128xf32> to vector<48x128xf32>
    %57 = arith.addf %53, %56 : vector<48x128xf32>
    %cst_33 = arith.constant 0.000000e+00 : f32
    %58 = vector.broadcast %cst_33 : f32 to vector<48x128xf32>
    %59 = arith.maximumf %57, %58 : vector<48x128xf32>
    %60 = vector.extract_strided_slice %59 {offsets = [0, 0], sizes = [48, 64], strides = [1, 1]} : vector<48x128xf32> to vector<48x64xf32>
    %61 = vector.extract_strided_slice %59 {offsets = [0, 64], sizes = [48, 64], strides = [1, 1]} : vector<48x128xf32> to vector<48x64xf32>
    %62 = arith.maximumf %60, %61 : vector<48x64xf32>
    %63 = vector.shape_cast %62 : vector<48x64xf32> to vector<3x16x64xf32>
    %64 = vector.extract_strided_slice %63 {offsets = [0, 0, 0], sizes = [3, 1, 64], strides = [1, 1, 1]} : vector<3x16x64xf32> to vector<3x1x64xf32>
    %65 = vector.extract_strided_slice %63 {offsets = [0, 1, 0], sizes = [3, 1, 64], strides = [1, 1, 1]} : vector<3x16x64xf32> to vector<3x1x64xf32>
    %66 = arith.maximumf %64, %65 : vector<3x1x64xf32>
    %67 = vector.extract_strided_slice %63 {offsets = [0, 2, 0], sizes = [3, 1, 64], strides = [1, 1, 1]} : vector<3x16x64xf32> to vector<3x1x64xf32>
    %68 = vector.extract_strided_slice %63 {offsets = [0, 3, 0], sizes = [3, 1, 64], strides = [1, 1, 1]} : vector<3x16x64xf32> to vector<3x1x64xf32>
    %69 = arith.maximumf %67, %68 : vector<3x1x64xf32>
    %70 = vector.extract_strided_slice %63 {offsets = [0, 4, 0], sizes = [3, 1, 64], strides = [1, 1, 1]} : vector<3x16x64xf32> to vector<3x1x64xf32>
    %71 = vector.extract_strided_slice %63 {offsets = [0, 5, 0], sizes = [3, 1, 64], strides = [1, 1, 1]} : vector<3x16x64xf32> to vector<3x1x64xf32>
    %72 = arith.maximumf %70, %71 : vector<3x1x64xf32>
    %73 = vector.extract_strided_slice %63 {offsets = [0, 6, 0], sizes = [3, 1, 64], strides = [1, 1, 1]} : vector<3x16x64xf32> to vector<3x1x64xf32>
    %74 = vector.extract_strided_slice %63 {offsets = [0, 7, 0], sizes = [3, 1, 64], strides = [1, 1, 1]} : vector<3x16x64xf32> to vector<3x1x64xf32>
    %75 = arith.maximumf %73, %74 : vector<3x1x64xf32>
    %76 = vector.extract_strided_slice %63 {offsets = [0, 8, 0], sizes = [3, 1, 64], strides = [1, 1, 1]} : vector<3x16x64xf32> to vector<3x1x64xf32>
    %77 = vector.extract_strided_slice %63 {offsets = [0, 9, 0], sizes = [3, 1, 64], strides = [1, 1, 1]} : vector<3x16x64xf32> to vector<3x1x64xf32>
    %78 = arith.maximumf %76, %77 : vector<3x1x64xf32>
    %79 = vector.extract_strided_slice %63 {offsets = [0, 10, 0], sizes = [3, 1, 64], strides = [1, 1, 1]} : vector<3x16x64xf32> to vector<3x1x64xf32>
    %80 = vector.extract_strided_slice %63 {offsets = [0, 11, 0], sizes = [3, 1, 64], strides = [1, 1, 1]} : vector<3x16x64xf32> to vector<3x1x64xf32>
    %81 = arith.maximumf %79, %80 : vector<3x1x64xf32>
    %82 = vector.extract_strided_slice %63 {offsets = [0, 12, 0], sizes = [3, 1, 64], strides = [1, 1, 1]} : vector<3x16x64xf32> to vector<3x1x64xf32>
    %83 = vector.extract_strided_slice %63 {offsets = [0, 13, 0], sizes = [3, 1, 64], strides = [1, 1, 1]} : vector<3x16x64xf32> to vector<3x1x64xf32>
    %84 = arith.maximumf %82, %83 : vector<3x1x64xf32>
    %85 = vector.extract_strided_slice %63 {offsets = [0, 14, 0], sizes = [3, 1, 64], strides = [1, 1, 1]} : vector<3x16x64xf32> to vector<3x1x64xf32>
    %86 = vector.extract_strided_slice %63 {offsets = [0, 15, 0], sizes = [3, 1, 64], strides = [1, 1, 1]} : vector<3x16x64xf32> to vector<3x1x64xf32>
    %87 = arith.maximumf %85, %86 : vector<3x1x64xf32>
    %88 = tpu.concatenate %66, %69, %72, %75, %78, %81, %84, %87 in 1 : vector<3x1x64xf32>, vector<3x1x64xf32>, vector<3x1x64xf32>, vector<3x1x64xf32>, vector<3x1x64xf32>, vector<3x1x64xf32>, vector<3x1x64xf32>, vector<3x1x64xf32> -> vector<3x8x64xf32>
    %cst_34 = arith.constant 0.000000e+00 : f32
    %89 = vector.broadcast %cst_34 : f32 to vector<3x1x64xf32>
    %90 = vector.extract_strided_slice %88 {offsets = [0, 0, 0], sizes = [3, 7, 64], strides = [1, 1, 1]} : vector<3x8x64xf32> to vector<3x7x64xf32>
    %91 = tpu.concatenate %89, %90 in 1 : vector<3x1x64xf32>, vector<3x7x64xf32> -> vector<3x8x64xf32>
    %92 = vector.extract_strided_slice %88 {offsets = [0, 1, 0], sizes = [3, 7, 64], strides = [1, 1, 1]} : vector<3x8x64xf32> to vector<3x7x64xf32>
    %93 = tpu.concatenate %92, %89 in 1 : vector<3x7x64xf32>, vector<3x1x64xf32> -> vector<3x8x64xf32>
    %94 = vector.shape_cast %91 : vector<3x8x64xf32> to vector<24x64xf32>
    %95 = arith.truncf %94 : vector<24x64xf32> to vector<24x64xbf16>
    %c0_35 = arith.constant 0 : index
    %c0_36 = arith.constant 0 : index
    %c0_37 = arith.constant 0 : index
    %96 = vector.load %arg4[%c0_35, %c0_36, %c0_37] : memref<3x64x128xbf16, #tpu.memory_space<vmem>>, vector<1x64x128xbf16>
    %97 = vector.shape_cast %96 : vector<1x64x128xbf16> to vector<64x128xbf16>
    %cst_38 = arith.constant dense<0.000000e+00> : vector<24x128xf32>
    %98 = tpu.matmul %95, %97, %cst_38 {dimension_numbers = #tpu.dot_dimension_numbers<[1], [0], [0], [1], [0, 0, 1, 1], [], []>} : vector<24x64xbf16>, vector<64x128xbf16>, vector<24x128xf32> -> vector<24x128xf32>
    %99 = vector.shape_cast %88 : vector<3x8x64xf32> to vector<24x64xf32>
    %100 = arith.truncf %99 : vector<24x64xf32> to vector<24x64xbf16>
    %c1_39 = arith.constant 1 : index
    %c0_40 = arith.constant 0 : index
    %c0_41 = arith.constant 0 : index
    %101 = vector.load %arg4[%c1_39, %c0_40, %c0_41] : memref<3x64x128xbf16, #tpu.memory_space<vmem>>, vector<1x64x128xbf16>
    %102 = vector.shape_cast %101 : vector<1x64x128xbf16> to vector<64x128xbf16>
    %cst_42 = arith.constant dense<0.000000e+00> : vector<24x128xf32>
    %103 = tpu.matmul %100, %102, %cst_42 {dimension_numbers = #tpu.dot_dimension_numbers<[1], [0], [0], [1], [0, 0, 1, 1], [], []>} : vector<24x64xbf16>, vector<64x128xbf16>, vector<24x128xf32> -> vector<24x128xf32>
    %104 = arith.addf %98, %103 : vector<24x128xf32>
    %105 = vector.shape_cast %93 : vector<3x8x64xf32> to vector<24x64xf32>
    %106 = arith.truncf %105 : vector<24x64xf32> to vector<24x64xbf16>
    %c2_43 = arith.constant 2 : index
    %c0_44 = arith.constant 0 : index
    %c0_45 = arith.constant 0 : index
    %107 = vector.load %arg4[%c2_43, %c0_44, %c0_45] : memref<3x64x128xbf16, #tpu.memory_space<vmem>>, vector<1x64x128xbf16>
    %108 = vector.shape_cast %107 : vector<1x64x128xbf16> to vector<64x128xbf16>
    %cst_46 = arith.constant dense<0.000000e+00> : vector<24x128xf32>
    %109 = tpu.matmul %106, %108, %cst_46 {dimension_numbers = #tpu.dot_dimension_numbers<[1], [0], [0], [1], [0, 0, 1, 1], [], []>} : vector<24x64xbf16>, vector<64x128xbf16>, vector<24x128xf32> -> vector<24x128xf32>
    %110 = arith.addf %104, %109 : vector<24x128xf32>
    %c2_47 = arith.constant 2 : index
    %c0_48 = arith.constant 0 : index
    %c0_49 = arith.constant 0 : index
    %111 = vector.load %arg10[%c2_47, %c0_48, %c0_49] : memref<8x1x128xf32, #tpu.memory_space<vmem>>, vector<1x1x128xf32>
    %112 = vector.shape_cast %111 : vector<1x1x128xf32> to vector<1x128xf32>
    %113 = vector.broadcast %112 : vector<1x128xf32> to vector<24x128xf32>
    %114 = arith.addf %110, %113 : vector<24x128xf32>
    %cst_50 = arith.constant 0.000000e+00 : f32
    %115 = vector.broadcast %cst_50 : f32 to vector<24x128xf32>
    %116 = arith.maximumf %114, %115 : vector<24x128xf32>
    %117 = vector.shape_cast %116 : vector<24x128xf32> to vector<3x8x128xf32>
    %cst_51 = arith.constant 0.000000e+00 : f32
    %118 = vector.broadcast %cst_51 : f32 to vector<3x1x128xf32>
    %119 = vector.extract_strided_slice %117 {offsets = [0, 0, 0], sizes = [3, 7, 128], strides = [1, 1, 1]} : vector<3x8x128xf32> to vector<3x7x128xf32>
    %120 = tpu.concatenate %118, %119 in 1 : vector<3x1x128xf32>, vector<3x7x128xf32> -> vector<3x8x128xf32>
    %121 = vector.extract_strided_slice %117 {offsets = [0, 1, 0], sizes = [3, 7, 128], strides = [1, 1, 1]} : vector<3x8x128xf32> to vector<3x7x128xf32>
    %122 = tpu.concatenate %121, %118 in 1 : vector<3x7x128xf32>, vector<3x1x128xf32> -> vector<3x8x128xf32>
    %123 = vector.shape_cast %120 : vector<3x8x128xf32> to vector<24x128xf32>
    %124 = arith.truncf %123 : vector<24x128xf32> to vector<24x128xbf16>
    %c0_52 = arith.constant 0 : index
    %c0_53 = arith.constant 0 : index
    %c0_54 = arith.constant 0 : index
    %125 = vector.load %arg5[%c0_52, %c0_53, %c0_54] : memref<3x128x128xbf16, #tpu.memory_space<vmem>>, vector<1x128x128xbf16>
    %126 = vector.shape_cast %125 : vector<1x128x128xbf16> to vector<128x128xbf16>
    %cst_55 = arith.constant dense<0.000000e+00> : vector<24x128xf32>
    %127 = tpu.matmul %124, %126, %cst_55 {dimension_numbers = #tpu.dot_dimension_numbers<[1], [0], [0], [1], [0, 0, 1, 1], [], []>} : vector<24x128xbf16>, vector<128x128xbf16>, vector<24x128xf32> -> vector<24x128xf32>
    %128 = vector.shape_cast %117 : vector<3x8x128xf32> to vector<24x128xf32>
    %129 = arith.truncf %128 : vector<24x128xf32> to vector<24x128xbf16>
    %c1_56 = arith.constant 1 : index
    %c0_57 = arith.constant 0 : index
    %c0_58 = arith.constant 0 : index
    %130 = vector.load %arg5[%c1_56, %c0_57, %c0_58] : memref<3x128x128xbf16, #tpu.memory_space<vmem>>, vector<1x128x128xbf16>
    %131 = vector.shape_cast %130 : vector<1x128x128xbf16> to vector<128x128xbf16>
    %cst_59 = arith.constant dense<0.000000e+00> : vector<24x128xf32>
    %132 = tpu.matmul %129, %131, %cst_59 {dimension_numbers = #tpu.dot_dimension_numbers<[1], [0], [0], [1], [0, 0, 1, 1], [], []>} : vector<24x128xbf16>, vector<128x128xbf16>, vector<24x128xf32> -> vector<24x128xf32>
    %133 = arith.addf %127, %132 : vector<24x128xf32>
    %134 = vector.shape_cast %122 : vector<3x8x128xf32> to vector<24x128xf32>
    %135 = arith.truncf %134 : vector<24x128xf32> to vector<24x128xbf16>
    %c2_60 = arith.constant 2 : index
    %c0_61 = arith.constant 0 : index
    %c0_62 = arith.constant 0 : index
    %136 = vector.load %arg5[%c2_60, %c0_61, %c0_62] : memref<3x128x128xbf16, #tpu.memory_space<vmem>>, vector<1x128x128xbf16>
    %137 = vector.shape_cast %136 : vector<1x128x128xbf16> to vector<128x128xbf16>
    %cst_63 = arith.constant dense<0.000000e+00> : vector<24x128xf32>
    %138 = tpu.matmul %135, %137, %cst_63 {dimension_numbers = #tpu.dot_dimension_numbers<[1], [0], [0], [1], [0, 0, 1, 1], [], []>} : vector<24x128xbf16>, vector<128x128xbf16>, vector<24x128xf32> -> vector<24x128xf32>
    %139 = arith.addf %133, %138 : vector<24x128xf32>
    %c3 = arith.constant 3 : index
    %c0_64 = arith.constant 0 : index
    %c0_65 = arith.constant 0 : index
    %140 = vector.load %arg10[%c3, %c0_64, %c0_65] : memref<8x1x128xf32, #tpu.memory_space<vmem>>, vector<1x1x128xf32>
    %141 = vector.shape_cast %140 : vector<1x1x128xf32> to vector<1x128xf32>
    %142 = vector.broadcast %141 : vector<1x128xf32> to vector<24x128xf32>
    %143 = arith.addf %139, %142 : vector<24x128xf32>
    %cst_66 = arith.constant 0.000000e+00 : f32
    %144 = vector.broadcast %cst_66 : f32 to vector<24x128xf32>
    %145 = arith.maximumf %143, %144 : vector<24x128xf32>
    %146 = vector.extract_strided_slice %145 {offsets = [0, 0], sizes = [24, 64], strides = [1, 1]} : vector<24x128xf32> to vector<24x64xf32>
    %147 = vector.extract_strided_slice %145 {offsets = [0, 64], sizes = [24, 64], strides = [1, 1]} : vector<24x128xf32> to vector<24x64xf32>
    %148 = arith.maximumf %146, %147 : vector<24x64xf32>
    %149 = vector.shape_cast %148 : vector<24x64xf32> to vector<3x8x64xf32>
    %150 = vector.extract_strided_slice %149 {offsets = [0, 0, 0], sizes = [3, 1, 64], strides = [1, 1, 1]} : vector<3x8x64xf32> to vector<3x1x64xf32>
    %151 = vector.extract_strided_slice %149 {offsets = [0, 1, 0], sizes = [3, 1, 64], strides = [1, 1, 1]} : vector<3x8x64xf32> to vector<3x1x64xf32>
    %152 = arith.maximumf %150, %151 : vector<3x1x64xf32>
    %153 = vector.extract_strided_slice %149 {offsets = [0, 2, 0], sizes = [3, 1, 64], strides = [1, 1, 1]} : vector<3x8x64xf32> to vector<3x1x64xf32>
    %154 = vector.extract_strided_slice %149 {offsets = [0, 3, 0], sizes = [3, 1, 64], strides = [1, 1, 1]} : vector<3x8x64xf32> to vector<3x1x64xf32>
    %155 = arith.maximumf %153, %154 : vector<3x1x64xf32>
    %156 = vector.extract_strided_slice %149 {offsets = [0, 4, 0], sizes = [3, 1, 64], strides = [1, 1, 1]} : vector<3x8x64xf32> to vector<3x1x64xf32>
    %157 = vector.extract_strided_slice %149 {offsets = [0, 5, 0], sizes = [3, 1, 64], strides = [1, 1, 1]} : vector<3x8x64xf32> to vector<3x1x64xf32>
    %158 = arith.maximumf %156, %157 : vector<3x1x64xf32>
    %159 = vector.extract_strided_slice %149 {offsets = [0, 6, 0], sizes = [3, 1, 64], strides = [1, 1, 1]} : vector<3x8x64xf32> to vector<3x1x64xf32>
    %160 = vector.extract_strided_slice %149 {offsets = [0, 7, 0], sizes = [3, 1, 64], strides = [1, 1, 1]} : vector<3x8x64xf32> to vector<3x1x64xf32>
    %161 = arith.maximumf %159, %160 : vector<3x1x64xf32>
    %162 = tpu.concatenate %152, %155, %158, %161 in 1 : vector<3x1x64xf32>, vector<3x1x64xf32>, vector<3x1x64xf32>, vector<3x1x64xf32> -> vector<3x4x64xf32>
    %cst_67 = arith.constant 0.000000e+00 : f32
    %163 = vector.broadcast %cst_67 : f32 to vector<3x1x64xf32>
    %164 = vector.extract_strided_slice %162 {offsets = [0, 0, 0], sizes = [3, 3, 64], strides = [1, 1, 1]} : vector<3x4x64xf32> to vector<3x3x64xf32>
    %165 = tpu.concatenate %163, %164 in 1 : vector<3x1x64xf32>, vector<3x3x64xf32> -> vector<3x4x64xf32>
    %166 = vector.extract_strided_slice %162 {offsets = [0, 1, 0], sizes = [3, 3, 64], strides = [1, 1, 1]} : vector<3x4x64xf32> to vector<3x3x64xf32>
    %167 = tpu.concatenate %166, %163 in 1 : vector<3x3x64xf32>, vector<3x1x64xf32> -> vector<3x4x64xf32>
    %168 = vector.shape_cast %165 : vector<3x4x64xf32> to vector<12x64xf32>
    %169 = arith.truncf %168 : vector<12x64xf32> to vector<12x64xbf16>
    %c0_68 = arith.constant 0 : index
    %c0_69 = arith.constant 0 : index
    %c0_70 = arith.constant 0 : index
    %170 = vector.load %arg6[%c0_68, %c0_69, %c0_70] : memref<3x64x128xbf16, #tpu.memory_space<vmem>>, vector<1x64x128xbf16>
    %171 = vector.shape_cast %170 : vector<1x64x128xbf16> to vector<64x128xbf16>
    %cst_71 = arith.constant dense<0.000000e+00> : vector<12x128xf32>
    %172 = tpu.matmul %169, %171, %cst_71 {dimension_numbers = #tpu.dot_dimension_numbers<[1], [0], [0], [1], [0, 0, 1, 1], [], []>} : vector<12x64xbf16>, vector<64x128xbf16>, vector<12x128xf32> -> vector<12x128xf32>
    %173 = vector.shape_cast %162 : vector<3x4x64xf32> to vector<12x64xf32>
    %174 = arith.truncf %173 : vector<12x64xf32> to vector<12x64xbf16>
    %c1_72 = arith.constant 1 : index
    %c0_73 = arith.constant 0 : index
    %c0_74 = arith.constant 0 : index
    %175 = vector.load %arg6[%c1_72, %c0_73, %c0_74] : memref<3x64x128xbf16, #tpu.memory_space<vmem>>, vector<1x64x128xbf16>
    %176 = vector.shape_cast %175 : vector<1x64x128xbf16> to vector<64x128xbf16>
    %cst_75 = arith.constant dense<0.000000e+00> : vector<12x128xf32>
    %177 = tpu.matmul %174, %176, %cst_75 {dimension_numbers = #tpu.dot_dimension_numbers<[1], [0], [0], [1], [0, 0, 1, 1], [], []>} : vector<12x64xbf16>, vector<64x128xbf16>, vector<12x128xf32> -> vector<12x128xf32>
    %178 = arith.addf %172, %177 : vector<12x128xf32>
    %179 = vector.shape_cast %167 : vector<3x4x64xf32> to vector<12x64xf32>
    %180 = arith.truncf %179 : vector<12x64xf32> to vector<12x64xbf16>
    %c2_76 = arith.constant 2 : index
    %c0_77 = arith.constant 0 : index
    %c0_78 = arith.constant 0 : index
    %181 = vector.load %arg6[%c2_76, %c0_77, %c0_78] : memref<3x64x128xbf16, #tpu.memory_space<vmem>>, vector<1x64x128xbf16>
    %182 = vector.shape_cast %181 : vector<1x64x128xbf16> to vector<64x128xbf16>
    %cst_79 = arith.constant dense<0.000000e+00> : vector<12x128xf32>
    %183 = tpu.matmul %180, %182, %cst_79 {dimension_numbers = #tpu.dot_dimension_numbers<[1], [0], [0], [1], [0, 0, 1, 1], [], []>} : vector<12x64xbf16>, vector<64x128xbf16>, vector<12x128xf32> -> vector<12x128xf32>
    %184 = arith.addf %178, %183 : vector<12x128xf32>
    %c4 = arith.constant 4 : index
    %c0_80 = arith.constant 0 : index
    %c0_81 = arith.constant 0 : index
    %185 = vector.load %arg10[%c4, %c0_80, %c0_81] : memref<8x1x128xf32, #tpu.memory_space<vmem>>, vector<1x1x128xf32>
    %186 = vector.shape_cast %185 : vector<1x1x128xf32> to vector<1x128xf32>
    %187 = vector.broadcast %186 : vector<1x128xf32> to vector<12x128xf32>
    %188 = arith.addf %184, %187 : vector<12x128xf32>
    %cst_82 = arith.constant 0.000000e+00 : f32
    %189 = vector.broadcast %cst_82 : f32 to vector<12x128xf32>
    %190 = arith.maximumf %188, %189 : vector<12x128xf32>
    %191 = vector.shape_cast %190 : vector<12x128xf32> to vector<3x4x128xf32>
    %cst_83 = arith.constant 0.000000e+00 : f32
    %192 = vector.broadcast %cst_83 : f32 to vector<3x1x128xf32>
    %193 = vector.extract_strided_slice %191 {offsets = [0, 0, 0], sizes = [3, 3, 128], strides = [1, 1, 1]} : vector<3x4x128xf32> to vector<3x3x128xf32>
    %194 = tpu.concatenate %192, %193 in 1 : vector<3x1x128xf32>, vector<3x3x128xf32> -> vector<3x4x128xf32>
    %195 = vector.extract_strided_slice %191 {offsets = [0, 1, 0], sizes = [3, 3, 128], strides = [1, 1, 1]} : vector<3x4x128xf32> to vector<3x3x128xf32>
    %196 = tpu.concatenate %195, %192 in 1 : vector<3x3x128xf32>, vector<3x1x128xf32> -> vector<3x4x128xf32>
    %197 = vector.shape_cast %194 : vector<3x4x128xf32> to vector<12x128xf32>
    %198 = arith.truncf %197 : vector<12x128xf32> to vector<12x128xbf16>
    %c0_84 = arith.constant 0 : index
    %c0_85 = arith.constant 0 : index
    %c0_86 = arith.constant 0 : index
    %199 = vector.load %arg7[%c0_84, %c0_85, %c0_86] : memref<3x128x128xbf16, #tpu.memory_space<vmem>>, vector<1x128x128xbf16>
    %200 = vector.shape_cast %199 : vector<1x128x128xbf16> to vector<128x128xbf16>
    %cst_87 = arith.constant dense<0.000000e+00> : vector<12x128xf32>
    %201 = tpu.matmul %198, %200, %cst_87 {dimension_numbers = #tpu.dot_dimension_numbers<[1], [0], [0], [1], [0, 0, 1, 1], [], []>} : vector<12x128xbf16>, vector<128x128xbf16>, vector<12x128xf32> -> vector<12x128xf32>
    %202 = vector.shape_cast %191 : vector<3x4x128xf32> to vector<12x128xf32>
    %203 = arith.truncf %202 : vector<12x128xf32> to vector<12x128xbf16>
    %c1_88 = arith.constant 1 : index
    %c0_89 = arith.constant 0 : index
    %c0_90 = arith.constant 0 : index
    %204 = vector.load %arg7[%c1_88, %c0_89, %c0_90] : memref<3x128x128xbf16, #tpu.memory_space<vmem>>, vector<1x128x128xbf16>
    %205 = vector.shape_cast %204 : vector<1x128x128xbf16> to vector<128x128xbf16>
    %cst_91 = arith.constant dense<0.000000e+00> : vector<12x128xf32>
    %206 = tpu.matmul %203, %205, %cst_91 {dimension_numbers = #tpu.dot_dimension_numbers<[1], [0], [0], [1], [0, 0, 1, 1], [], []>} : vector<12x128xbf16>, vector<128x128xbf16>, vector<12x128xf32> -> vector<12x128xf32>
    %207 = arith.addf %201, %206 : vector<12x128xf32>
    %208 = vector.shape_cast %196 : vector<3x4x128xf32> to vector<12x128xf32>
    %209 = arith.truncf %208 : vector<12x128xf32> to vector<12x128xbf16>
    %c2_92 = arith.constant 2 : index
    %c0_93 = arith.constant 0 : index
    %c0_94 = arith.constant 0 : index
    %210 = vector.load %arg7[%c2_92, %c0_93, %c0_94] : memref<3x128x128xbf16, #tpu.memory_space<vmem>>, vector<1x128x128xbf16>
    %211 = vector.shape_cast %210 : vector<1x128x128xbf16> to vector<128x128xbf16>
    %cst_95 = arith.constant dense<0.000000e+00> : vector<12x128xf32>
    %212 = tpu.matmul %209, %211, %cst_95 {dimension_numbers = #tpu.dot_dimension_numbers<[1], [0], [0], [1], [0, 0, 1, 1], [], []>} : vector<12x128xbf16>, vector<128x128xbf16>, vector<12x128xf32> -> vector<12x128xf32>
    %213 = arith.addf %207, %212 : vector<12x128xf32>
    %c5 = arith.constant 5 : index
    %c0_96 = arith.constant 0 : index
    %c0_97 = arith.constant 0 : index
    %214 = vector.load %arg10[%c5, %c0_96, %c0_97] : memref<8x1x128xf32, #tpu.memory_space<vmem>>, vector<1x1x128xf32>
    %215 = vector.shape_cast %214 : vector<1x1x128xf32> to vector<1x128xf32>
    %216 = vector.broadcast %215 : vector<1x128xf32> to vector<12x128xf32>
    %217 = arith.addf %213, %216 : vector<12x128xf32>
    %cst_98 = arith.constant 0.000000e+00 : f32
    %218 = vector.broadcast %cst_98 : f32 to vector<12x128xf32>
    %219 = arith.maximumf %217, %218 : vector<12x128xf32>
    %220 = vector.extract_strided_slice %219 {offsets = [0, 0], sizes = [12, 64], strides = [1, 1]} : vector<12x128xf32> to vector<12x64xf32>
    %221 = vector.extract_strided_slice %219 {offsets = [0, 64], sizes = [12, 64], strides = [1, 1]} : vector<12x128xf32> to vector<12x64xf32>
    %222 = arith.maximumf %220, %221 : vector<12x64xf32>
    %223 = vector.shape_cast %222 : vector<12x64xf32> to vector<3x4x64xf32>
    %224 = vector.extract_strided_slice %223 {offsets = [0, 0, 0], sizes = [3, 1, 64], strides = [1, 1, 1]} : vector<3x4x64xf32> to vector<3x1x64xf32>
    %225 = vector.extract_strided_slice %223 {offsets = [0, 1, 0], sizes = [3, 1, 64], strides = [1, 1, 1]} : vector<3x4x64xf32> to vector<3x1x64xf32>
    %226 = arith.maximumf %224, %225 : vector<3x1x64xf32>
    %227 = vector.extract_strided_slice %223 {offsets = [0, 2, 0], sizes = [3, 1, 64], strides = [1, 1, 1]} : vector<3x4x64xf32> to vector<3x1x64xf32>
    %228 = vector.extract_strided_slice %223 {offsets = [0, 3, 0], sizes = [3, 1, 64], strides = [1, 1, 1]} : vector<3x4x64xf32> to vector<3x1x64xf32>
    %229 = arith.maximumf %227, %228 : vector<3x1x64xf32>
    %230 = tpu.concatenate %226, %229 in 1 : vector<3x1x64xf32>, vector<3x1x64xf32> -> vector<3x2x64xf32>
    %cst_99 = arith.constant 0.000000e+00 : f32
    %231 = vector.broadcast %cst_99 : f32 to vector<3x1x64xf32>
    %232 = vector.extract_strided_slice %230 {offsets = [0, 0, 0], sizes = [3, 1, 64], strides = [1, 1, 1]} : vector<3x2x64xf32> to vector<3x1x64xf32>
    %233 = tpu.concatenate %231, %232 in 1 : vector<3x1x64xf32>, vector<3x1x64xf32> -> vector<3x2x64xf32>
    %234 = vector.extract_strided_slice %230 {offsets = [0, 1, 0], sizes = [3, 1, 64], strides = [1, 1, 1]} : vector<3x2x64xf32> to vector<3x1x64xf32>
    %235 = tpu.concatenate %234, %231 in 1 : vector<3x1x64xf32>, vector<3x1x64xf32> -> vector<3x2x64xf32>
    %236 = vector.shape_cast %233 : vector<3x2x64xf32> to vector<6x64xf32>
    %237 = arith.truncf %236 : vector<6x64xf32> to vector<6x64xbf16>
    %c0_100 = arith.constant 0 : index
    %c0_101 = arith.constant 0 : index
    %c0_102 = arith.constant 0 : index
    %238 = vector.load %arg8[%c0_100, %c0_101, %c0_102] : memref<3x64x128xbf16, #tpu.memory_space<vmem>>, vector<1x64x128xbf16>
    %239 = vector.shape_cast %238 : vector<1x64x128xbf16> to vector<64x128xbf16>
    %cst_103 = arith.constant dense<0.000000e+00> : vector<6x128xf32>
    %240 = tpu.matmul %237, %239, %cst_103 {dimension_numbers = #tpu.dot_dimension_numbers<[1], [0], [0], [1], [0, 0, 1, 1], [], []>} : vector<6x64xbf16>, vector<64x128xbf16>, vector<6x128xf32> -> vector<6x128xf32>
    %241 = vector.shape_cast %230 : vector<3x2x64xf32> to vector<6x64xf32>
    %242 = arith.truncf %241 : vector<6x64xf32> to vector<6x64xbf16>
    %c1_104 = arith.constant 1 : index
    %c0_105 = arith.constant 0 : index
    %c0_106 = arith.constant 0 : index
    %243 = vector.load %arg8[%c1_104, %c0_105, %c0_106] : memref<3x64x128xbf16, #tpu.memory_space<vmem>>, vector<1x64x128xbf16>
    %244 = vector.shape_cast %243 : vector<1x64x128xbf16> to vector<64x128xbf16>
    %cst_107 = arith.constant dense<0.000000e+00> : vector<6x128xf32>
    %245 = tpu.matmul %242, %244, %cst_107 {dimension_numbers = #tpu.dot_dimension_numbers<[1], [0], [0], [1], [0, 0, 1, 1], [], []>} : vector<6x64xbf16>, vector<64x128xbf16>, vector<6x128xf32> -> vector<6x128xf32>
    %246 = arith.addf %240, %245 : vector<6x128xf32>
    %247 = vector.shape_cast %235 : vector<3x2x64xf32> to vector<6x64xf32>
    %248 = arith.truncf %247 : vector<6x64xf32> to vector<6x64xbf16>
    %c2_108 = arith.constant 2 : index
    %c0_109 = arith.constant 0 : index
    %c0_110 = arith.constant 0 : index
    %249 = vector.load %arg8[%c2_108, %c0_109, %c0_110] : memref<3x64x128xbf16, #tpu.memory_space<vmem>>, vector<1x64x128xbf16>
    %250 = vector.shape_cast %249 : vector<1x64x128xbf16> to vector<64x128xbf16>
    %cst_111 = arith.constant dense<0.000000e+00> : vector<6x128xf32>
    %251 = tpu.matmul %248, %250, %cst_111 {dimension_numbers = #tpu.dot_dimension_numbers<[1], [0], [0], [1], [0, 0, 1, 1], [], []>} : vector<6x64xbf16>, vector<64x128xbf16>, vector<6x128xf32> -> vector<6x128xf32>
    %252 = arith.addf %246, %251 : vector<6x128xf32>
    %c6 = arith.constant 6 : index
    %c0_112 = arith.constant 0 : index
    %c0_113 = arith.constant 0 : index
    %253 = vector.load %arg10[%c6, %c0_112, %c0_113] : memref<8x1x128xf32, #tpu.memory_space<vmem>>, vector<1x1x128xf32>
    %254 = vector.shape_cast %253 : vector<1x1x128xf32> to vector<1x128xf32>
    %255 = vector.broadcast %254 : vector<1x128xf32> to vector<6x128xf32>
    %256 = arith.addf %252, %255 : vector<6x128xf32>
    %cst_114 = arith.constant 0.000000e+00 : f32
    %257 = vector.broadcast %cst_114 : f32 to vector<6x128xf32>
    %258 = arith.maximumf %256, %257 : vector<6x128xf32>
    %259 = vector.shape_cast %258 : vector<6x128xf32> to vector<3x2x128xf32>
    %cst_115 = arith.constant 0.000000e+00 : f32
    %260 = vector.broadcast %cst_115 : f32 to vector<3x1x128xf32>
    %261 = vector.extract_strided_slice %259 {offsets = [0, 0, 0], sizes = [3, 1, 128], strides = [1, 1, 1]} : vector<3x2x128xf32> to vector<3x1x128xf32>
    %262 = tpu.concatenate %260, %261 in 1 : vector<3x1x128xf32>, vector<3x1x128xf32> -> vector<3x2x128xf32>
    %263 = vector.extract_strided_slice %259 {offsets = [0, 1, 0], sizes = [3, 1, 128], strides = [1, 1, 1]} : vector<3x2x128xf32> to vector<3x1x128xf32>
    %264 = tpu.concatenate %263, %260 in 1 : vector<3x1x128xf32>, vector<3x1x128xf32> -> vector<3x2x128xf32>
    %265 = vector.shape_cast %262 : vector<3x2x128xf32> to vector<6x128xf32>
    %266 = arith.truncf %265 : vector<6x128xf32> to vector<6x128xbf16>
    %c0_116 = arith.constant 0 : index
    %c0_117 = arith.constant 0 : index
    %c0_118 = arith.constant 0 : index
    %267 = vector.load %arg9[%c0_116, %c0_117, %c0_118] : memref<3x128x128xbf16, #tpu.memory_space<vmem>>, vector<1x128x128xbf16>
    %268 = vector.shape_cast %267 : vector<1x128x128xbf16> to vector<128x128xbf16>
    %cst_119 = arith.constant dense<0.000000e+00> : vector<6x128xf32>
    %269 = tpu.matmul %266, %268, %cst_119 {dimension_numbers = #tpu.dot_dimension_numbers<[1], [0], [0], [1], [0, 0, 1, 1], [], []>} : vector<6x128xbf16>, vector<128x128xbf16>, vector<6x128xf32> -> vector<6x128xf32>
    %270 = vector.shape_cast %259 : vector<3x2x128xf32> to vector<6x128xf32>
    %271 = arith.truncf %270 : vector<6x128xf32> to vector<6x128xbf16>
    %c1_120 = arith.constant 1 : index
    %c0_121 = arith.constant 0 : index
    %c0_122 = arith.constant 0 : index
    %272 = vector.load %arg9[%c1_120, %c0_121, %c0_122] : memref<3x128x128xbf16, #tpu.memory_space<vmem>>, vector<1x128x128xbf16>
    %273 = vector.shape_cast %272 : vector<1x128x128xbf16> to vector<128x128xbf16>
    %cst_123 = arith.constant dense<0.000000e+00> : vector<6x128xf32>
    %274 = tpu.matmul %271, %273, %cst_123 {dimension_numbers = #tpu.dot_dimension_numbers<[1], [0], [0], [1], [0, 0, 1, 1], [], []>} : vector<6x128xbf16>, vector<128x128xbf16>, vector<6x128xf32> -> vector<6x128xf32>
    %275 = arith.addf %269, %274 : vector<6x128xf32>
    %276 = vector.shape_cast %264 : vector<3x2x128xf32> to vector<6x128xf32>
    %277 = arith.truncf %276 : vector<6x128xf32> to vector<6x128xbf16>
    %c2_124 = arith.constant 2 : index
    %c0_125 = arith.constant 0 : index
    %c0_126 = arith.constant 0 : index
    %278 = vector.load %arg9[%c2_124, %c0_125, %c0_126] : memref<3x128x128xbf16, #tpu.memory_space<vmem>>, vector<1x128x128xbf16>
    %279 = vector.shape_cast %278 : vector<1x128x128xbf16> to vector<128x128xbf16>
    %cst_127 = arith.constant dense<0.000000e+00> : vector<6x128xf32>
    %280 = tpu.matmul %277, %279, %cst_127 {dimension_numbers = #tpu.dot_dimension_numbers<[1], [0], [0], [1], [0, 0, 1, 1], [], []>} : vector<6x128xbf16>, vector<128x128xbf16>, vector<6x128xf32> -> vector<6x128xf32>
    %281 = arith.addf %275, %280 : vector<6x128xf32>
    %c7 = arith.constant 7 : index
    %c0_128 = arith.constant 0 : index
    %c0_129 = arith.constant 0 : index
    %282 = vector.load %arg10[%c7, %c0_128, %c0_129] : memref<8x1x128xf32, #tpu.memory_space<vmem>>, vector<1x1x128xf32>
    %283 = vector.shape_cast %282 : vector<1x1x128xf32> to vector<1x128xf32>
    %284 = vector.broadcast %283 : vector<1x128xf32> to vector<6x128xf32>
    %285 = arith.addf %281, %284 : vector<6x128xf32>
    %cst_130 = arith.constant 0.000000e+00 : f32
    %286 = vector.broadcast %cst_130 : f32 to vector<6x128xf32>
    %287 = arith.maximumf %285, %286 : vector<6x128xf32>
    %288 = vector.extract_strided_slice %287 {offsets = [0, 0], sizes = [6, 64], strides = [1, 1]} : vector<6x128xf32> to vector<6x64xf32>
    %289 = vector.extract_strided_slice %287 {offsets = [0, 64], sizes = [6, 64], strides = [1, 1]} : vector<6x128xf32> to vector<6x64xf32>
    %290 = arith.maximumf %288, %289 : vector<6x64xf32>
    %291 = vector.shape_cast %290 : vector<6x64xf32> to vector<3x2x64xf32>
    %292 = vector.extract_strided_slice %291 {offsets = [0, 0, 0], sizes = [3, 1, 64], strides = [1, 1, 1]} : vector<3x2x64xf32> to vector<3x1x64xf32>
    %293 = vector.extract_strided_slice %291 {offsets = [0, 1, 0], sizes = [3, 1, 64], strides = [1, 1, 1]} : vector<3x2x64xf32> to vector<3x1x64xf32>
    %294 = arith.maximumf %292, %293 : vector<3x1x64xf32>
    %295 = vector.shape_cast %294 : vector<3x1x64xf32> to vector<3x64xf32>
    %296 = arith.truncf %295 : vector<3x64xf32> to vector<3x64xbf16>
    %c0_131 = arith.constant 0 : index
    %c0_132 = arith.constant 0 : index
    %297 = vector.load %arg11[%c0_131, %c0_132] : memref<64x128xbf16, #tpu.memory_space<vmem>>, vector<64x128xbf16>
    %cst_133 = arith.constant dense<0.000000e+00> : vector<3x128xf32>
    %298 = tpu.matmul %296, %297, %cst_133 {dimension_numbers = #tpu.dot_dimension_numbers<[1], [0], [0], [1], [0, 0, 1, 1], [], []>} : vector<3x64xbf16>, vector<64x128xbf16>, vector<3x128xf32> -> vector<3x128xf32>
    %c0_134 = arith.constant 0 : index
    %c0_135 = arith.constant 0 : index
    %299 = vector.load %arg12[%c0_134, %c0_135] : memref<1x128xf32, #tpu.memory_space<vmem>>, vector<1x128xf32>
    %300 = vector.broadcast %299 : vector<1x128xf32> to vector<3x128xf32>
    %301 = arith.addf %298, %300 : vector<3x128xf32>
    %cst_136 = arith.constant 0.000000e+00 : f32
    %302 = vector.broadcast %cst_136 : f32 to vector<3x128xf32>
    %303 = arith.maximumf %301, %302 : vector<3x128xf32>
    %304 = arith.truncf %303 : vector<3x128xf32> to vector<3x128xbf16>
    %c0_137 = arith.constant 0 : index
    %c0_138 = arith.constant 0 : index
    %305 = vector.load %arg13[%c0_137, %c0_138] : memref<128x128xbf16, #tpu.memory_space<vmem>>, vector<128x128xbf16>
    %cst_139 = arith.constant dense<0.000000e+00> : vector<3x128xf32>
    %306 = tpu.matmul %304, %305, %cst_139 {dimension_numbers = #tpu.dot_dimension_numbers<[1], [0], [0], [1], [0, 0, 1, 1], [], []>} : vector<3x128xbf16>, vector<128x128xbf16>, vector<3x128xf32> -> vector<3x128xf32>
    %c0_140 = arith.constant 0 : index
    %c0_141 = arith.constant 0 : index
    %307 = vector.load %arg14[%c0_140, %c0_141] : memref<1x128xf32, #tpu.memory_space<vmem>>, vector<1x128xf32>
    %308 = vector.broadcast %307 : vector<1x128xf32> to vector<3x128xf32>
    %309 = arith.addf %306, %308 : vector<3x128xf32>
    %cst_142 = arith.constant 0.000000e+00 : f32
    %310 = vector.broadcast %cst_142 : f32 to vector<3x128xf32>
    %311 = arith.maximumf %309, %310 : vector<3x128xf32>
    %c0_143 = arith.constant 0 : index
    %c0_144 = arith.constant 0 : index
    %c0_145 = arith.constant 0 : index
    %312 = vector.load %arg15[%c0_143, %c0_144, %c0_145] : memref<1x3x128xf32, #tpu.memory_space<vmem>>, vector<1x3x128xf32>
    %313 = vector.shape_cast %312 : vector<1x3x128xf32> to vector<3x128xf32>
    %314 = vector.shape_cast %311 : vector<3x128xf32> to vector<1x3x128xf32>
    tpu.vector_store %arg15[%c0_143, %c0_144, %c0_145], %314 {strides = array<i32>} : memref<1x3x128xf32, #tpu.memory_space<vmem>>, vector<1x3x128xf32>,
    %cst_146 = arith.constant dense<0xFF800000> : vector<128xf32>
    %315 = vector.multi_reduction <maximumf>, %311, %cst_146 [0] : vector<3x128xf32> to vector<128xf32>
    %316 = vector.shape_cast %315 : vector<128xf32> to vector<1x128xf32>
    %c0_147 = arith.constant 0 : index
    %c0_148 = arith.constant 0 : index
    %c0_149 = arith.constant 0 : index
    %317 = vector.load %arg16[%c0_147, %c0_148, %c0_149] : memref<1x1x128xf32, #tpu.memory_space<vmem>>, vector<1x1x128xf32>
    %318 = vector.shape_cast %317 : vector<1x1x128xf32> to vector<1x128xf32>
    %319 = vector.shape_cast %316 : vector<1x128xf32> to vector<1x1x128xf32>
    tpu.vector_store %arg16[%c0_147, %c0_148, %c0_149], %319 {strides = array<i32>} : memref<1x1x128xf32, #tpu.memory_space<vmem>>, vector<1x1x128xf32>,
    return
  }
  func.func @transform_0(%arg0: i32) -> (i32, i32, i32, i32) {
    %c0_i32 = arith.constant 0 : i32
    %c0_i32_0 = arith.constant 0 : i32
    %c0_i32_1 = arith.constant 0 : i32
    %c0_i32_2 = arith.constant 0 : i32
    return %arg0, %c0_i32, %c0_i32_0, %c0_i32_1 : i32, i32, i32, i32
  }
  func.func @transform_1(%arg0: i32) -> (i32, i32, i32) {
    %c0_i32 = arith.constant 0 : i32
    %c0_i32_0 = arith.constant 0 : i32
    %c0_i32_1 = arith.constant 0 : i32
    %c0_i32_2 = arith.constant 0 : i32
    return %c0_i32, %c0_i32_0, %c0_i32_1 : i32, i32, i32
  }
  func.func @transform_2(%arg0: i32) -> (i32, i32, i32) {
    %c0_i32 = arith.constant 0 : i32
    %c0_i32_0 = arith.constant 0 : i32
    %c0_i32_1 = arith.constant 0 : i32
    %c0_i32_2 = arith.constant 0 : i32
    return %c0_i32, %c0_i32_0, %c0_i32_1 : i32, i32, i32
  }
  func.func @transform_3(%arg0: i32) -> (i32, i32, i32) {
    %c0_i32 = arith.constant 0 : i32
    %c0_i32_0 = arith.constant 0 : i32
    %c0_i32_1 = arith.constant 0 : i32
    %c0_i32_2 = arith.constant 0 : i32
    return %c0_i32, %c0_i32_0, %c0_i32_1 : i32, i32, i32
  }
  func.func @transform_4(%arg0: i32) -> (i32, i32, i32) {
    %c0_i32 = arith.constant 0 : i32
    %c0_i32_0 = arith.constant 0 : i32
    %c0_i32_1 = arith.constant 0 : i32
    %c0_i32_2 = arith.constant 0 : i32
    return %c0_i32, %c0_i32_0, %c0_i32_1 : i32, i32, i32
  }
  func.func @transform_5(%arg0: i32) -> (i32, i32, i32) {
    %c0_i32 = arith.constant 0 : i32
    %c0_i32_0 = arith.constant 0 : i32
    %c0_i32_1 = arith.constant 0 : i32
    %c0_i32_2 = arith.constant 0 : i32
    return %c0_i32, %c0_i32_0, %c0_i32_1 : i32, i32, i32
  }
  func.func @transform_6(%arg0: i32) -> (i32, i32, i32) {
    %c0_i32 = arith.constant 0 : i32
    %c0_i32_0 = arith.constant 0 : i32
    %c0_i32_1 = arith.constant 0 : i32
    %c0_i32_2 = arith.constant 0 : i32
    return %c0_i32, %c0_i32_0, %c0_i32_1 : i32, i32, i32
  }
  func.func @transform_7(%arg0: i32) -> (i32, i32, i32) {
    %c0_i32 = arith.constant 0 : i32
    %c0_i32_0 = arith.constant 0 : i32
    %c0_i32_1 = arith.constant 0 : i32
    %c0_i32_2 = arith.constant 0 : i32
    return %c0_i32, %c0_i32_0, %c0_i32_1 : i32, i32, i32
  }
  func.func @transform_8(%arg0: i32) -> (i32, i32, i32) {
    %c0_i32 = arith.constant 0 : i32
    %c0_i32_0 = arith.constant 0 : i32
    %c0_i32_1 = arith.constant 0 : i32
    %c0_i32_2 = arith.constant 0 : i32
    return %c0_i32, %c0_i32_0, %c0_i32_1 : i32, i32, i32
  }
  func.func @transform_9(%arg0: i32) -> (i32, i32, i32) {
    %c0_i32 = arith.constant 0 : i32
    %c0_i32_0 = arith.constant 0 : i32
    %c0_i32_1 = arith.constant 0 : i32
    %c0_i32_2 = arith.constant 0 : i32
    return %c0_i32, %c0_i32_0, %c0_i32_1 : i32, i32, i32
  }
  func.func @transform_10(%arg0: i32) -> (i32, i32) {
    %c0_i32 = arith.constant 0 : i32
    %c0_i32_0 = arith.constant 0 : i32
    %c0_i32_1 = arith.constant 0 : i32
    return %c0_i32, %c0_i32_0 : i32, i32
  }
  func.func @transform_11(%arg0: i32) -> (i32, i32) {
    %c0_i32 = arith.constant 0 : i32
    %c0_i32_0 = arith.constant 0 : i32
    %c0_i32_1 = arith.constant 0 : i32
    return %c0_i32, %c0_i32_0 : i32, i32
  }
  func.func @transform_12(%arg0: i32) -> (i32, i32) {
    %c0_i32 = arith.constant 0 : i32
    %c0_i32_0 = arith.constant 0 : i32
    %c0_i32_1 = arith.constant 0 : i32
    return %c0_i32, %c0_i32_0 : i32, i32
  }
  func.func @transform_13(%arg0: i32) -> (i32, i32) {
    %c0_i32 = arith.constant 0 : i32
    %c0_i32_0 = arith.constant 0 : i32
    %c0_i32_1 = arith.constant 0 : i32
    return %c0_i32, %c0_i32_0 : i32, i32
  }
  func.func @transform_14(%arg0: i32) -> (i32, i32, i32) {
    %c0_i32 = arith.constant 0 : i32
    %c0_i32_0 = arith.constant 0 : i32
    %c0_i32_1 = arith.constant 0 : i32
    return %arg0, %c0_i32, %c0_i32_0 : i32, i32, i32
  }
  func.func @transform_15(%arg0: i32) -> (i32, i32, i32) {
    %c0_i32 = arith.constant 0 : i32
    %c0_i32_0 = arith.constant 0 : i32
    %c0_i32_1 = arith.constant 0 : i32
    return %arg0, %c0_i32, %c0_i32_0 : i32, i32, i32
  }
}

</mosaic_0001>

<bundles_post_ra>
// kernel: base_feature_net_forward.1
= control target key start
LH: loop header
LB: loop body
LE: loop exit
PB: predicated region body
PF: predicated region fallthrough
CT: control target
= control target key end

     0   :  { %21 = vsyncpa [#allocation3], 0  ;;  %s6670_s0 = inlined_call_operand.vmem [shape: bf16[2,3,16,128], index: 0, kind: input, shape index: {}]   ;;  %s6671_s1 = inlined_call_operand.vmem [shape: bf16[3,128,128], index: 1, kind: input, shape index: {}]   ;;  %s6672_s2 = inlined_call_operand.vmem [shape: bf16[3,128,128], index: 2, kind: input, shape index: {}]   ;;  %s6673_s3 = inlined_call_operand.vmem [shape: bf16[3,64,128], index: 3, kind: input, shape index: {}]   ;;  %s6674_s4 = inlined_call_operand.vmem [shape: bf16[3,128,128], index: 4, kind: input, shape index: {}]   ;;  %s6675_s5 = inlined_call_operand.vmem [shape: bf16[3,64,128], index: 5, kind: input, shape index: {}]   ;;  %s6676_s6 = inlined_call_operand.vmem [shape: bf16[3,128,128], index: 6, kind: input, shape index: {}]   ;;  %s6677_s7 = inlined_call_operand.vmem [shape: bf16[3,64,128], index: 7, kind: input, shape index: {}]   ;;  %s6678_s8 = inlined_call_operand.vmem [shape: bf16[3,128,128], index: 8, kind: input, shape index: {}]   ;;  %s6679_s9 = inlined_call_operand.vmem [shape: f32[8,1,128], index: 9, kind: input, shape index: {}]   ;;  %s6680_s10 = inlined_call_operand.vmem [shape: bf16[64,128], index: 10, kind: input, shape index: {}]   ;;  %s6681_s11 = inlined_call_operand.vmem [shape: f32[1,128], index: 11, kind: input, shape index: {}]   ;;  %s6682_s12 = inlined_call_operand.vmem [shape: bf16[128,128], index: 12, kind: input, shape index: {}]   ;;  %s6683_s13 = inlined_call_operand.vmem [shape: f32[1,128], index: 13, kind: input, shape index: {}]   ;;  %s6684_s14 = inlined_call_operand.vmem [shape: f32[2,3,128], index: 14, kind: output, shape index: {0}]   ;;  %s6685_s15 = inlined_call_operand.hbm [shape: f32[2,1,128], index: 15, kind: output, shape index: {1}]  }
   0x1   :  { %23 = vsyncpa [#allocation3 + $0x1], 0  ;;  %s5631_s18 = smov 0   ;;  %s5633_s19 = smov 0  }
   0x2   :  { %s5635_s20 = smov 0   ;;  %s5637_s21 = smov 0  }
   0x3 LB: > { %6691 = sst [smem:[#allocation5_spill]] %s5531_s18  ;;  %s5652_s22 = sadd.s32 4294967295, %s5543_s21   ;;  %s5543_s21 = sphi %s5637_s21, %s6708_s21   ;;  %s5539_s20 = sphi %s5635_s20, %s6710_s20   ;;  %s5535_s19 = sphi %s5633_s19, %s6712_s19   ;;  %s5531_s18 = sphi %s5631_s18, %s6711_s18  }
   0x4   : > { %6692 = sst [smem:[#allocation6_spill]] %s5539_s20  ;;  %s4058_s23 = sadd.s32 4294967294, %s5543_s21  }
   0x5   : > { %s5656_s24 = sadd.s32 1, %s5543_s21   ;;  %s361_s25 = sadd.s32 1, %s5539_s20 }
   0x6   : > { %6693 = sst [smem:[#allocation7_spill]] %s5656_s24  ;;  %s358_s26 = ssub.s32 %s5543_s21, %s5656_s24 }
   0x7   : > { %p371_p0 = scmp.ne.s32.totalorder %s5539_s20, %s5535_s19  ;;  %p359_p1 = scmp.eq.s32.totalorder %s358_s26, 0 }
   0x8   : > { %p372_p2 = scmp.eq.s32.totalorder %s5652_s22, 1  ;;  %p377_p3 = scmp.ne.s32.totalorder %s5535_s19, %s5531_s18 }
   0x9   : > { %p378_p4 = scmp.eq.s32.totalorder %s4058_s23, 1  ;;  %p4061_p7 = scmp.ge.s32.totalorder %s5543_s21, 1 }
   0xa   : > { %s5667_s27 = scalar_select %p359_p1, %s5539_s20, %s361_s25  }
   0xb   : > { %p5669_p5 = por %p372_p2, %p371_p0  ;;  %p5673_p6 = por %p378_p4, %p377_p3 }
   0xc   : > { %6694 = sst [smem:[#allocation8_spill]] %s5667_s27  ;;  %p443_p8 = scmp.lt.s32.totalorder %s5543_s21, 3 }
   0xd   : > { %s6696_s29 = scalar_select %p5673_p6, 1, 0 }
   0xe   : > { %p444_p9 = pnand %p4061_p7, %p443_p8 }
   0xf   : > { %6697 = sst [smem:[#allocation9_spill]] %s6696_s29  ;;  %v5307_v0 = vld [vmem:[%s6671_s1 + $0x40] sm:$0xff] (!%p444_p9)   ;;  %v5545_v1 = vmov (!%p444_p9), 0.0   ;;  %v5309_v3 = vld [vmem:[%s6671_s1 + $0x48] sm:$0xff] (!%p444_p9)   ;;  %vm5546_vm0 = vmmov (!%p444_p9), 0   ;;  %p494_p10 = scmp.lt.s32.totalorder (!%p444_p9), %s5652_s22, 1 }
  0x10   : > { %447 = sbr.rel (%p444_p9) target bundleno = 3038 (0xbde), region = 76  ;;  %4759 = vmatprep.subr.bf16.mxu0 (!%p444_p9), %v5545_v1  ;;  %4787 = vmatprep.subr.bf16.mxu1 (!%p444_p9), %v5545_v1  ;;  %v5308_v2 = vld [vmem:[%s6671_s1] sm:$0xff] (!%p444_p9)   ;;  %v5310_v4 = vld [vmem:[%s6671_s1 + $0x8] sm:$0xff] (!%p444_p9)   ;;  %v5311_v5 = vld [vmem:[%s6671_s1 + $0x50] sm:$0xff] (!%p444_p9)   ;;  %vm522_vm1 = vcmask (!%p444_p9), 1040384   ;;  %vm5547_vm3 = vmmov (!%p444_p9), 1  }
  0x11   : > { %4760 = vmatpush3.bf16.msra.mxu0 (!%p444_p9), %v5307_v0  ;;  %4775 = vmatprep.mubr.msk.bf16.mxu0 (!%p444_p9), %vm5546_vm0, %v5545_v1  ;;  %v5312_v6 = vld [vmem:[%s6671_s1 + $0x10] sm:$0xff] (!%p444_p9)   ;;  %v5313_v7 = vld [vmem:[%s6671_s1 + $0x58] sm:$0xff] (!%p444_p9)   ;;  %v5315_v9 = vld [vmem:[%s6671_s1 + $0x60] sm:$0xff] (!%p444_p9)   ;;  %vm541_vm5 = vcmask (!%p444_p9), 1046528   ;;  %vm1506_vm7 = vcmask (!%p444_p9), 1041408   ;;  %vm1510_vm8 = vcmask (!%p444_p9), 1042432  }
  0x12   : > { %4788 = vmatpush3.bf16.msra.mxu1 (!%p444_p9), %v5308_v2  ;;  %4761 = vmatprep.subr.bf16.mxu0 (!%p444_p9), %v5545_v1  ;;  %v5314_v8 = vld [vmem:[%s6671_s1 + $0x18] sm:$0xff] (!%p444_p9)   ;;  %v5316_v10 = vld [vmem:[%s6671_s1 + $0x20] sm:$0xff] (!%p444_p9)   ;;  %v5317_v12 = vld [vmem:[%s6671_s1 + $0x68] sm:$0xff] (!%p444_p9)   ;;  %vm1514_vm9 = vcmask (!%p444_p9), 1043456   ;;  %vm1518_vm10 = vcmask (!%p444_p9), 1044480   ;;  %vm1522_vm11 = vcmask (!%p444_p9), 1045504  }
  0x13   : > { %4789 = vmatprep.subr.bf16.mxu1 (!%p444_p9), %v5545_v1  ;;  %4803 = vmatprep.mubr.msk.bf16.mxu1 (!%p444_p9), %vm5546_vm0, %v5545_v1  ;;  %v5318_v13 = vld [vmem:[%s6671_s1 + $0x28] sm:$0xff] (!%p444_p9)   ;;  %v5319_v19 = vld [vmem:[%s6671_s1 + $0x70] sm:$0xff] (!%p444_p9)   ;;  %vm5751_vm2 = vmneg (!%p444_p9), %vm522_vm1  ;;  %vm1595_vm12 = vcmask (!%p444_p9), 523264   ;;  %s492_s27 = sand.u32 (!%p444_p9), 1, %s5535_s19  }
  0x14   : > { %v5320_v20 = vld [vmem:[%s6671_s1 + $0x30] sm:$0xff] (!%p444_p9)   ;;  %v5321_v27 = vld [vmem:[%s6671_s1 + $0x78] sm:$0xff] (!%p444_p9)   ;;  %vm5771_vm4 = vmpackc.low (!%p444_p9), %vm5547_vm3, %vm5751_vm2  ;;  %s493_s20 = scalar_lea.vmem (!%p444_p9), [#allocation2], %s492_s27 }
  0x15   : > { %4762 = vmatpush3.bf16.msra.mxu0 (!%p444_p9), %v5309_v3  ;;  %v5322_v30 = vld [vmem:[%s6671_s1 + $0x38] sm:$0xff] (!%p444_p9)   ;;  %v5324_v41 = vld [vmem:[%s6671_s1 + $0x80] sm:$0xff] (!%p444_p9)   ;;  %v5325_v43 = vld [vmem:[%s6671_s1 + $0x88] sm:$0xff] (!%p444_p9)   ;;  %s3979_s16 = sshll.u32 (!%p444_p9), %s493_s20, 4  ;;  %s6630_s16 = int_to_ptr.vmem [resolvable:$true] %s3979_s16 }
  0x16   : > { %4790 = vmatpush3.bf16.msra.mxu1 (!%p444_p9), %v5310_v4  ;;  %4763 = vmatprep.subr.bf16.mxu0 (!%p444_p9), %v5545_v1  ;;  %v5326_v45 = vld [vmem:[%s6671_s1 + $0x90] sm:$0xff] (!%p444_p9)   ;;  %v5328_v47 = vld [vmem:[%s6671_s1 + $0x98] sm:$0xff] (!%p444_p9)   ;;  %v5329_v49 = vld [vmem:[%s6671_s1 + $0xa0] sm:$0xff] (!%p444_p9)   ;;  %s5481_s24 = scalar_lea.vmem (!%p444_p9), %s6630_s16, 16 }
  0x17   : > { %s5701_s17 = scalar_select %p494_p10, %s5652_s22, 1  ;;  %4791 = vmatprep.subr.bf16.mxu1 %v5545_v1  ;;  %v5331_v51 = vld [vmem:[%s6671_s1 + $0xa8] sm:$0xff]   ;;  %v5332_v52 = vld [vmem:[%s6671_s1 + $0xb0] sm:$0xff]   ;;  %vm5826_vm6 = vmpackc.low %vm541_vm5, %vm5547_vm3 }
  0x18   : > { %v5333_v54 = vld [vmem:[%s6671_s1 + $0xb8] sm:$0xff]   ;;  %v5334_v61 = vld [vmem:[%s6672_s2 + $0x40] sm:$0xff]   ;;  %v5335_v62 = vld [vmem:[%s6672_s2 + $0x48] sm:$0xff]   ;;  %p5482_p11 = scmp.ne.s32.totalorder %s6630_s16, %s5481_s24 }
  0x19   : > { %s5247_s30 = smul.u32 24, %s5701_s17  ;;  %4764 = vmatpush3.bf16.msra.mxu0 %v5311_v5  ;;  %v5336_v63 = vld [vmem:[%s6672_s2] sm:$0xff]   ;;  %v5337_v0 = vld [vmem:[%s6672_s2 + $0x50] sm:$0xff]   ;;  %v5338_v2 = vld [vmem:[%s6672_s2 + $0x8] sm:$0xff]  }
  0x1a   : > { %4792 = vmatpush3.bf16.msra.mxu1 %v5312_v6  ;;  %4765 = vmatprep.subr.bf16.mxu0 %v5545_v1  ;;  %v5339_v3 = vld [vmem:[%s6672_s2 + $0x58] sm:$0xff]   ;;  %v5340_v4 = vld [vmem:[%s6672_s2 + $0x10] sm:$0xff]   ;;  %v5341_v5 = vld [vmem:[%s6672_s2 + $0x60] sm:$0xff]   ;;  %p5483_p12 = pnand %p5482_p11, %p5669_p5 }
  0x1b   : > { %4793 = vmatprep.subr.bf16.mxu1 %v5545_v1  ;;  %s498_s26 = scalar_lea.vmem %s6670_s0, %s5247_s30  ;;  %v5342_v6 = vld [vmem:[%s6672_s2 + $0x18] sm:$0xff]   ;;  %vm4294_vm13 = vmpackc.low %vm5751_vm2, %vm5751_vm2 }
  0x1c   : > { %v504_v11 = vld [vmem:[%s498_s26] sm:$0xff]   ;;  %v506_v16 = vld [vmem:[%s498_s26 + $0x8] sm:$0xff]   ;;  %v508_v26 = vld [vmem:[%s498_s26 + $0x10] sm:$0xff]   ;;  %s5548_s26 = smov 64   ;;  %p5484_p13 = pneg %p5483_p12 }
  0x1d   : > { %4766 = vmatpush3.bf16.msra.mxu0 %v5313_v7  ;;  %v510_v14 = vunpack.c.l.bf16 %v504_v11  ;;  %v511_v15 = vunpack.c.h.bf16 %v504_v11  ;;  %v512_v17 = vunpack.c.l.bf16 %v506_v16  ;;  %v513_v18 = vunpack.c.h.bf16 %v506_v16  ;;  %v5343_v7 = vld [vmem:[%s6672_s2 + $0x68] sm:$0xff]   ;;  %vm6131_vm14 = vmpackc.low %vm541_vm5, %vm541_vm5  ;;  %v5425_v25 = vld [vmem:[%s6676_s6 + $0x98] sm:$0xff]  }
  0x1e   : > { %4794 = vmatpush3.bf16.msra.mxu1 %v5314_v8  ;;  %4767 = vmatprep.subr.bf16.mxu0 %v5545_v1  ;;  %v514_v28 = vunpack.c.l.bf16 %v508_v26  ;;  %v515_v29 = vunpack.c.h.bf16 %v508_v26  ;;  %v5344_v8 = vld [vmem:[%s6672_s2 + $0x20] sm:$0xff]   ;;  %vm4400_vm15 = vmpackc.low %vm5751_vm2, %vm5547_vm3 }
  0x1f   : > { %4795 = vmatprep.subr.bf16.mxu1 %v5545_v1  ;;  %v523_v21 = vrot.slane %v510_v14, 7  ;;  %v524_v22 = vrot.slane %v511_v15, 7  ;;  %v5746_v23 = vrot.slane %v510_v14, 1  ;;  %v5748_v24 = vrot.slane %v511_v15, 1  ;;  %vm4427_vm2 = vmpackc.low %vm1510_vm8, %vm5547_vm3 }
  0x20   : > { %v526_v31 = vrot.slane %v512_v17, 7  ;;  %v527_v32 = vrot.slane %v513_v18, 7  ;;  %v5762_v33 = vrot.slane %v512_v17, 1  ;;  %v5764_v34 = vrot.slane %v513_v18, 1 }
  0x21   : > { %4768 = vmatpush3.bf16.msra.mxu0 %v5315_v9  ;;  %v529_v35 = vrot.slane %v514_v28, 7  ;;  %v530_v36 = vrot.slane %v515_v29, 7  ;;  %v525_v37 = vsel %vm522_vm1, %v523_v21, %v524_v22  ;;  %v548_v39 = vrot.slane %v514_v28, 1  ;;  %v5345_v9 = vld [vmem:[%s6672_s2 + $0x70] sm:$0xff]  }
  0x22   : > { %4796 = vmatpush3.bf16.msra.mxu1 %v5316_v10  ;;  %4769 = vmatprep.subr.bf16.mxu0 %v5545_v1  ;;  %v549_v40 = vrot.slane %v515_v29, 1  ;;  %v4101_v42 = vpack.c.bf16 %v525_v37, %v523_v21  ;;  %v528_v44 = vsel %vm522_vm1, %v526_v31, %v527_v32  ;;  %v544_v55 = vsel %vm541_vm5, %v5746_v23, %v5748_v24  ;;  %v5346_v10 = vld [vmem:[%s6672_s2 + $0x28] sm:$0xff]  }
  0x23   : > { %4797 = vmatprep.subr.bf16.mxu1 %v5545_v1  ;;  %v4105_v46 = vpack.c.bf16 %v528_v44, %v526_v31  ;;  %v531_v48 = vsel %vm522_vm1, %v529_v35, %v530_v36  ;;  %v4136_v56 = vpack.c.bf16 %v5748_v24, %v544_v55  ;;  %v547_v57 = vsel %vm541_vm5, %v5762_v33, %v5764_v34 }
  0x24   : > { %v4109_v50 = vpack.c.bf16 %v531_v48, %v529_v35  ;;  %v4139_v58 = vpack.c.bf16 %v5764_v34, %v547_v57  ;;  %v550_v59 = vsel %vm541_vm5, %v548_v39, %v549_v40  ;;  %vm3766_vm3 = vcmask 1042434  }
  0x25   : > { %4770 = vmatpush3.bf16.msra.mxu0 %v5317_v12  ;;  %v4142_v60 = vpack.c.bf16 %v549_v40, %v550_v59  ;;  %v5348_v12 = vld [vmem:[%s6672_s2 + $0x30] sm:$0xff]  }
  0x26   : > { %4798 = vmatpush3.bf16.msra.mxu1 %v5318_v13  ;;  %4771 = vmatprep.subr.bf16.mxu0 %v5545_v1  ;;  %v5349_v13 = vld [vmem:[%s6672_s2 + $0x38] sm:$0xff]  }
  0x27   : > { %4799 = vmatprep.subr.bf16.mxu1 %v5545_v1 }
  0x29   : > { %4772 = vmatpush3.bf16.msra.mxu0 %v5319_v19 }
  0x2a   : > { %4800 = vmatpush3.bf16.msra.mxu1 %v5320_v20  ;;  %4773 = vmatprep.subr.bf16.mxu0 %v5545_v1 }
  0x2b   : > { %4801 = vmatprep.subr.bf16.mxu1 %v5545_v1 }
  0x2d   : > { %4774 = vmatpush3.bf16.msra.mxu0 %v5321_v27 }
  0x2e   : > { %4802 = vmatpush3.bf16.msra.mxu1 %v5322_v30  ;;  %4815 = vmatprep.subr.bf16.mxu0 %v5545_v1 }
  0x2f   : > { %4843 = vmatprep.subr.bf16.mxu1 %v5545_v1 }
  0x30   : > { %4776 = vmatmul.mubr.bf16.vlgmr.msra.gmra.mrb[0].mxu0 %v504_v11  ;;  %v5347_v11 = vld [vmem:[%s6672_s2 + $0x78] sm:$0xff]  }
  0x31   : > { %4804 = vmatmul.mubr.msk.bf16.vlgmr.msra.gmra.mrb[0].mxu1 %vm5771_vm4, %v4101_v42  ;;  %4816 = vmatpush3.bf16.msra.mxu0 %v5324_v41 }
  0x32   : > { %4817 = vmatprep.subr.bf16.mxu0 %v5545_v1  ;;  %4779 = vmatprep.mubr.msk.bf16.mxu0 %vm5546_vm0, %v5545_v1 }
  0x33   : > { %4807 = vmatprep.mubr.msk.bf16.mxu1 %vm5546_vm0, %v5545_v1  ;;  %4844 = vmatpush3.bf16.msra.mxu1 %v5334_v61  ;;  %v5350_v61 = vld [vmem:[%s6672_s2 + $0x80] sm:$0xff]  }
  0x34   : > { %4845 = vmatprep.subr.bf16.mxu1 %v5545_v1 }
  0x35   : > { %4818 = vmatpush3.bf16.msra.mxu0 %v5325_v43 }
  0x36   : > { %4819 = vmatprep.subr.bf16.mxu0 %v5545_v1 }
  0x37   : > { %4846 = vmatpush3.bf16.msra.mxu1 %v5335_v62 }
  0x38   : > { %4780 = vmatmul.mubr.bf16.gmra.mrb[4].mxu0 %v506_v16  ;;  %4847 = vmatprep.subr.bf16.mxu1 %v5545_v1 }
  0x39   : > { %4820 = vmatpush3.bf16.msra.mxu0 %v5326_v45  ;;  %4808 = vmatmul.mubr.msk.bf16.gmra.mrb[4].mxu1 %vm5771_vm4, %v4105_v46 }
  0x3a   : > { %4821 = vmatprep.subr.bf16.mxu0 %v5545_v1  ;;  %4783 = vmatprep.mubr.msk.bf16.mxu0 %vm5546_vm0, %v5545_v1 }
  0x3b   : > { %4811 = vmatprep.mubr.msk.bf16.mxu1 %vm5546_vm0, %v5545_v1  ;;  %4848 = vmatpush3.bf16.msra.mxu1 %v5337_v0 }
  0x3c   : > { %4849 = vmatprep.subr.bf16.mxu1 %v5545_v1 }
  0x3d   : > { %4822 = vmatpush3.bf16.msra.mxu0 %v5328_v47  ;;  %v4144_v47 = vld [vmem:[%s6679_s9] ss:$0 sm:$0xff] }
  0x3e   : > { %4823 = vmatprep.subr.bf16.mxu0 %v5545_v1 }
  0x3f   : > { %4850 = vmatpush3.bf16.msra.mxu1 %v5339_v3 }
  0x40   : > { %4784 = vmatmul.mubr.bf16.gmra.mrb[8].mxu0 %v508_v26  ;;  %4851 = vmatprep.subr.bf16.mxu1 %v5545_v1 }
  0x41   : > { %4824 = vmatpush3.bf16.msra.mxu0 %v5329_v49  ;;  %4812 = vmatmul.mubr.msk.bf16.gmra.mrb[8].mxu1 %vm5771_vm4, %v4109_v50 }
  0x42   : > { %4825 = vmatprep.subr.bf16.mxu0 %v5545_v1  ;;  %4831 = vmatprep.mubr.msk.bf16.mxu0 %vm5546_vm0, %v5545_v1 }
  0x43   : > { %4859 = vmatprep.mubr.msk.bf16.mxu1 %vm5546_vm0, %v5545_v1  ;;  %4852 = vmatpush3.bf16.msra.mxu1 %v5341_v5 }
  0x44   : > { %4853 = vmatprep.subr.bf16.mxu1 %v5545_v1 }
  0x45   : > { %4826 = vmatpush3.bf16.msra.mxu0 %v5331_v51 }
  0x46   : > { %4827 = vmatprep.subr.bf16.mxu0 %v5545_v1 }
  0x47   : > { %4854 = vmatpush3.bf16.msra.mxu1 %v5343_v7 }
  0x48   : > { %4855 = vmatprep.subr.bf16.mxu1 %v5545_v1 }
  0x49   : > { %4828 = vmatpush3.bf16.msra.mxu0 %v5332_v52 }
  0x4a   : > { %4829 = vmatprep.subr.bf16.mxu0 %v5545_v1 }
  0x4b   : > { %4856 = vmatpush3.bf16.msra.mxu1 %v5345_v9 }
  0x4c   : > { %4857 = vmatprep.subr.bf16.mxu1 %v5545_v1 }
  0x4d   : > { %4830 = vmatpush3.bf16.msra.mxu0 %v5333_v54 }
  0x4e   : > { %4871 = vmatprep.subr.bf16.mxu0 %v5545_v1 }
  0x4f   : > { %4858 = vmatpush3.bf16.msra.mxu1 %v5347_v11 }
  0x50   : > { %4832 = vmatmul.mubr.msk.bf16.vlgmr.msra.gmra.mrb[12].mxu0 %vm5826_vm6, %v4136_v56  ;;  %4899 = vmatprep.subr.bf16.mxu1 %v5545_v1 }
  0x51   : > { %4835 = vmatprep.mubr.msk.bf16.mxu0 %vm5546_vm0, %v5545_v1  ;;  %4872 = vmatpush3.bf16.msra.mxu0 %v5336_v63 }
  0x52   : > { %4873 = vmatprep.subr.bf16.mxu0 %v5545_v1 }
  0x55   : > { %4874 = vmatpush3.bf16.msra.mxu0 %v5338_v2 }
  0x56   : > { %4875 = vmatprep.subr.bf16.mxu0 %v5545_v1 }
  0x58   : > { %4836 = vmatmul.mubr.msk.bf16.gmra.mrb[16].mxu0 %vm5826_vm6, %v4139_v58 }
  0x59   : > { %4839 = vmatprep.mubr.msk.bf16.mxu0 %vm5546_vm0, %v5545_v1  ;;  %4876 = vmatpush3.bf16.msra.mxu0 %v5340_v4 }
  0x5a   : > { %4877 = vmatprep.subr.bf16.mxu0 %v5545_v1 }
  0x5d   : > { %4878 = vmatpush3.bf16.msra.mxu0 %v5342_v6 }
  0x5e   : > { %4879 = vmatprep.subr.bf16.mxu0 %v5545_v1 }
  0x60   : > { %4840 = vmatmul.mubr.msk.bf16.gmra.mrb[20].mxu0 %vm5826_vm6, %v4142_v60 }
  0x61   : > { %4887 = vmatprep.mubr.msk.bf16.mxu0 %vm5546_vm0, %v5545_v1  ;;  %4880 = vmatpush3.bf16.msra.mxu0 %v5344_v8 }
  0x62   : > { %4881 = vmatprep.subr.bf16.mxu0 %v5545_v1 }
  0x65   : > { %4882 = vmatpush3.bf16.msra.mxu0 %v5346_v10 }
  0x66   : > { %4883 = vmatprep.subr.bf16.mxu0 %v5545_v1 }
  0x69   : > { %4884 = vmatpush3.bf16.msra.mxu0 %v5348_v12  ;;  %v5351_v12 = vld [vmem:[%s6672_s2 + $0x88] sm:$0xff]  }
  0x6a   : > { %4885 = vmatprep.subr.bf16.mxu0 %v5545_v1 }
  0x6d   : > { %4886 = vmatpush3.bf16.msra.mxu0 %v5349_v13 }
 0x103   : > { %v681_v14 = vpop.f32.mrb[0].mxu0 }
 0x104   : > { %v786_v15 = vpop.f32.mrb[0].mxu1  ;;  %v4777_v16 = vpop.f32.mrb[1].mxu0 }
 0x105   : > { %v787_v17 = vadd.f32 %v786_v15, %v681_v14  ;;  %v4805_v18 = vpop.f32.mrb[1].mxu1  ;;  %v684_v19 = vpop.f32.mrb[2].mxu0 }
 0x106   : > { %v789_v20 = vpop.f32.mrb[2].mxu1  ;;  %v4778_v21 = vpop.f32.mrb[3].mxu0 }
 0x107   : > { %v790_v22 = vadd.f32 %v789_v20, %v684_v19  ;;  %v4806_v23 = vpop.f32.mrb[3].mxu1  ;;  %v5352_v19 = vld [vmem:[%s6672_s2 + $0x90] sm:$0xff]  }
 0x10b   : > { %v689_v24 = vpop.f32.mrb[4].mxu0 }
 0x10c   : > { %v4781_v26 = vpop.f32.mrb[5].mxu0  ;;  %v794_v27 = vpop.f32.mrb[4].mxu1 }
 0x10d   : > { %v795_v28 = vadd.f32 %v794_v27, %v689_v24  ;;  %v692_v29 = vpop.f32.mrb[6].mxu0  ;;  %v4809_v30 = vpop.f32.mrb[5].mxu1 }
 0x10e   : > { %v4782_v31 = vpop.f32.mrb[7].mxu0  ;;  %v797_v32 = vpop.f32.mrb[6].mxu1 }
 0x10f   : > { %v798_v33 = vadd.f32 %v797_v32, %v692_v29  ;;  %v4810_v34 = vpop.f32.mrb[7].mxu1 }
 0x113   : > { %v697_v35 = vpop.f32.mrb[8].mxu0 }
 0x114   : > { %v4785_v36 = vpop.f32.mrb[9].mxu0  ;;  %v802_v37 = vpop.f32.mrb[8].mxu1 }
 0x115   : > { %v803_v39 = vadd.f32 %v802_v37, %v697_v35  ;;  %v700_v40 = vpop.f32.mrb[10].mxu0  ;;  %v4813_v41 = vpop.f32.mrb[9].mxu1 }
 0x116   : > { %v4786_v42 = vpop.f32.mrb[11].mxu0  ;;  %v805_v43 = vpop.f32.mrb[10].mxu1 }
 0x117   : > { %v806_v44 = vadd.f32 %v805_v43, %v700_v40  ;;  %v4814_v45 = vpop.f32.mrb[11].mxu1  ;;  %v5354_v40 = vld [vmem:[%s6672_s2 + $0xa0] sm:$0xff]  }
 0x123   : > { %v911_v46 = vpop.f32.mrb[12].mxu0 }
 0x124   : > { %v934_v48 = vadd.f32 %v911_v46, %v787_v17  ;;  %v4833_v49 = vpop.f32.mrb[13].mxu0 }
 0x125   : > { %v914_v50 = vpop.f32.mrb[14].mxu0 }
 0x126   : > { %v947_v51 = vadd.f32 %v4144_v47, %v934_v48  ;;  %v935_v52 = vadd.f32 %v914_v50, %v790_v22  ;;  %v4834_v54 = vpop.f32.mrb[15].mxu0  ;;  %v5355_v48 = vld [vmem:[%s6672_s2 + $0xa8] sm:$0xff]   ;;  %v5356_v50 = vld [vmem:[%s6672_s2 + $0xb0] sm:$0xff]  }
 0x128   : > { %v953_v55 = vmax.f32 %v947_v51, 0.0  ;;  %v948_v56 = vadd.f32 %v4144_v47, %v935_v52  ;;  %v5357_v51 = vld [vmem:[%s6672_s2 + $0xb8] sm:$0xff]  }
 0x12a   : > { %v954_v57 = vmax.f32 %v948_v56, 0.0  ;;  %v965_v58 = vrot.slane %v953_v55, 7  ;;  %v983_v59 = vrot.slane %v953_v55, 1 }
 0x12b   : > { %v919_v60 = vpop.f32.mrb[16].mxu0 }
 0x12c   : > { %v966_v62 = vrot.slane %v954_v57, 7  ;;  %v984_v63 = vrot.slane %v954_v57, 1  ;;  %v1020_v0 = vpack.c.bf16 %v954_v57, %v953_v55  ;;  %v936_v2 = vadd.f32 %v919_v60, %v795_v28  ;;  %v4837_v3 = vpop.f32.mrb[17].mxu0 }
 0x12d   : > { %v922_v4 = vpop.f32.mrb[18].mxu0 }
 0x12e   : > { %v967_v5 = vsel %vm522_vm1, %v965_v58, %v966_v62  ;;  %v985_v6 = vsel %vm541_vm5, %v983_v59, %v984_v63  ;;  %v949_v7 = vadd.f32 %v4144_v47, %v936_v2  ;;  %v937_v8 = vadd.f32 %v922_v4, %v798_v33  ;;  %4860 = vmatmul.mubr.bf16.vlgmr.msra.gmra.mrb[12].mxu1 %v1020_v0  ;;  %v4838_v9 = vpop.f32.mrb[19].mxu0  ;;  %v5353_v33 = vld [vmem:[%s6672_s2 + $0x98] sm:$0xff]  }
 0x12f   : > { %v4179_v10 = vpack.c.bf16 %v967_v5, %v965_v58  ;;  %v5928_v11 = vpack.c.bf16 %v984_v63, %v985_v6  ;;  %4900 = vmatpush3.bf16.msra.mxu1 %v5350_v61  ;;  %4863 = vmatprep.mubr.msk.bf16.mxu1 %vm5546_vm0, %v5545_v1 }
 0x130   : > { %v955_v13 = vmax.f32 %v949_v7, 0.0  ;;  %v950_v14 = vadd.f32 %v4144_v47, %v937_v8  ;;  %4901 = vmatprep.subr.bf16.mxu1 %v5545_v1 }
 0x131   : > { %4888 = vmatmul.mubr.msk.bf16.vlgmr.msra.gmra.mrb[24].mxu0 %vm5771_vm4, %v4179_v10 }
 0x132   : > { %v956_v15 = vmax.f32 %v950_v14, 0.0  ;;  %4891 = vmatprep.mubr.msk.bf16.mxu0 %vm5546_vm0, %v5545_v1  ;;  %v968_v16 = vrot.slane %v955_v13, 7  ;;  %v986_v17 = vrot.slane %v955_v13, 1 }
 0x133   : > { %4902 = vmatpush3.bf16.msra.mxu1 %v5351_v12  ;;  %v927_v18 = vpop.f32.mrb[20].mxu0 }
 0x134   : > { %v969_v20 = vrot.slane %v956_v15, 7  ;;  %v987_v21 = vrot.slane %v956_v15, 1  ;;  %v938_v22 = vadd.f32 %v927_v18, %v803_v39  ;;  %v4841_v23 = vpop.f32.mrb[21].mxu0  ;;  %4903 = vmatprep.subr.bf16.mxu1 %v5545_v1  ;;  %v1021_v24 = vpack.c.bf16 %v956_v15, %v955_v13 }
 0x135   : > { %v930_v26 = vpop.f32.mrb[22].mxu0 }
 0x136   : > { %v951_v27 = vadd.f32 %v4144_v47, %v938_v22  ;;  %v939_v28 = vadd.f32 %v930_v26, %v806_v44  ;;  %4864 = vmatmul.mubr.bf16.gmra.mrb[16].mxu1 %v1021_v24  ;;  %v970_v29 = vsel %vm522_vm1, %v968_v16, %v969_v20  ;;  %v4842_v30 = vpop.f32.mrb[23].mxu0  ;;  %v988_v31 = vsel %vm541_vm5, %v986_v17, %v987_v21  ;;  %v4223_v24 = vld [vmem:[%s6679_s9 + $0x1] ss:$0 sm:$0xff] }
 0x137   : > { %4904 = vmatpush3.bf16.msra.mxu1 %v5352_v19  ;;  %v4183_v32 = vpack.c.bf16 %v970_v29, %v968_v16  ;;  %4867 = vmatprep.mubr.msk.bf16.mxu1 %vm5546_vm0, %v5545_v1  ;;  %v4217_v34 = vpack.c.bf16 %v987_v21, %v988_v31 }
 0x138   : > { %v957_v35 = vmax.f32 %v951_v27, 0.0  ;;  %v952_v36 = vadd.f32 %v4144_v47, %v939_v28  ;;  %4905 = vmatprep.subr.bf16.mxu1 %v5545_v1 }
 0x139   : > { %4892 = vmatmul.mubr.msk.bf16.gmra.mrb[28].mxu0 %vm5771_vm4, %v4183_v32 }
 0x13a   : > { %v958_v37 = vmax.f32 %v952_v36, 0.0  ;;  %4895 = vmatprep.mubr.msk.bf16.mxu0 %vm5546_vm0, %v5545_v1  ;;  %v971_v39 = vrot.slane %v957_v35, 7  ;;  %v989_v41 = vrot.slane %v957_v35, 1  ;;  %v5358_v36 = vld [vmem:[%s6673_s3 + $0x20] sm:$0xff]  }
 0x13b   : > { %4906 = vmatpush3.bf16.msra.mxu1 %v5353_v33 }
 0x13c   : > { %v972_v42 = vrot.slane %v958_v37, 7  ;;  %v990_v43 = vrot.slane %v958_v37, 1  ;;  %4907 = vmatprep.subr.bf16.mxu1 %v5545_v1  ;;  %v1022_v44 = vpack.c.bf16 %v958_v37, %v957_v35 }
 0x13e   : > { %4868 = vmatmul.mubr.bf16.gmra.mrb[20].mxu1 %v1022_v44  ;;  %v973_v45 = vsel %vm522_vm1, %v971_v39, %v972_v42  ;;  %v991_v46 = vsel %vm541_vm5, %v989_v41, %v990_v43  ;;  %v5359_v44 = vld [vmem:[%s6673_s3 + $0x28] sm:$0xff]  }
 0x13f   : > { %4908 = vmatpush3.bf16.msra.mxu1 %v5354_v40  ;;  %v4187_v47 = vpack.c.bf16 %v973_v45, %v971_v39  ;;  %4915 = vmatprep.mubr.msk.bf16.mxu1 %vm5546_vm0, %v5545_v1  ;;  %v4220_v49 = vpack.c.bf16 %v990_v43, %v991_v46  ;;  %v5361_v45 = vld [vmem:[%s6673_s3 + $0x40] sm:$0xff]  }
 0x140   : > { %4909 = vmatprep.subr.bf16.mxu1 %v5545_v1  ;;  %4951 = vmatprep.subr.bf16.mxu0 %v5361_v45 }
 0x141   : > { %4896 = vmatmul.mubr.msk.bf16.gmra.mrb[32].mxu0 %vm5771_vm4, %v4187_v47 }
 0x142   : > { %4952 = vmatpush3.bf16.msra.mxu0 %v5361_v45 }
 0x143   : > { %4910 = vmatpush3.bf16.msra.mxu1 %v5355_v48 }
 0x144   : > { %4911 = vmatprep.subr.bf16.mxu1 %v5545_v1 }
 0x147   : > { %4912 = vmatpush3.bf16.msra.mxu1 %v5356_v50 }
 0x148   : > { %4913 = vmatprep.subr.bf16.mxu1 %v5545_v1 }
 0x14b   : > { %4914 = vmatpush3.bf16.msra.mxu1 %v5357_v51 }
 0x14c   : > { %4927 = vmatprep.subr.bf16.mxu1 %v5358_v36 }
 0x14e   : > { %4916 = vmatmul.mubr.msk.bf16.vlgmr.msra.gmra.mrb[24].mxu1 %vm5826_vm6, %v5928_v11 }
 0x14f   : > { %4919 = vmatprep.mubr.msk.bf16.mxu1 %vm5546_vm0, %v5545_v1  ;;  %4928 = vmatpush3.bf16.msra.mxu1 %v5358_v36 }
 0x150   : > { %4929 = vmatprep.subr.bf16.mxu1 %v5359_v44 }
 0x153   : > { %4930 = vmatpush3.bf16.msra.mxu1 %v5359_v44 }
 0x156   : > { %4920 = vmatmul.mubr.msk.bf16.gmra.mrb[28].mxu1 %vm5826_vm6, %v4217_v34 }
 0x157   : > { %4923 = vmatprep.mubr.msk.bf16.mxu1 %vm5546_vm0, %v5545_v1 }
 0x15e   : > { %4924 = vmatmul.mubr.msk.bf16.gmra.mrb[32].mxu1 %vm5826_vm6, %v4220_v49 }
 0x201   : > { %v1122_v38 = vpop.f32.mrb[12].mxu1 }
 0x202   : > { %v4861_v52 = vpop.f32.mrb[13].mxu1 }
 0x203   : > { %v1125_v54 = vpop.f32.mrb[14].mxu1  ;;  %v5360_v52 = vld [vmem:[%s6673_s3 + $0x30] sm:$0xff]  }
 0x204   : > { %v4862_v55 = vpop.f32.mrb[15].mxu1  ;;  %v1227_v56 = vpop.f32.mrb[24].mxu0  ;;  %4931 = vmatprep.subr.bf16.mxu1 %v5360_v52 }
 0x205   : > { %v1228_v57 = vadd.f32 %v1227_v56, %v1122_v38  ;;  %v4889_v58 = vpop.f32.mrb[25].mxu0  ;;  %4932 = vmatpush3.bf16.msra.mxu1 %v5360_v52 }
 0x206   : > { %v1230_v59 = vpop.f32.mrb[26].mxu0 }
 0x207   : > { %v1231_v60 = vadd.f32 %v1230_v59, %v1125_v54  ;;  %v4890_v61 = vpop.f32.mrb[27].mxu0  ;;  %v5362_v54 = vld [vmem:[%s6673_s3 + $0x48] sm:$0xff]   ;;  %v5363_v59 = vld [vmem:[%s6673_s3 + $0x38] sm:$0xff]  }
 0x208   : > { %4953 = vmatprep.subr.bf16.mxu0 %v5362_v54  ;;  %4933 = vmatprep.subr.bf16.mxu1 %v5363_v59  ;;  %v6022_v61 = vld [vmem:[%s6673_s3] sm:$0xff]  }
 0x209   : > { %v1130_v62 = vpop.f32.mrb[16].mxu1  ;;  %4954 = vmatpush3.bf16.msra.mxu0 %v5362_v54  ;;  %4934 = vmatpush3.bf16.msra.mxu1 %v5363_v59 }
 0x20a   : > { %v4865_v63 = vpop.f32.mrb[17].mxu1  ;;  %4939 = vmatprep.subr.bf16.mxu1 %v6022_v61 }
 0x20b   : > { %v1133_v0 = vpop.f32.mrb[18].mxu1 }
 0x20c   : > { %v4866_v2 = vpop.f32.mrb[19].mxu1  ;;  %v1235_v3 = vpop.f32.mrb[28].mxu0 }
 0x20d   : > { %v1236_v4 = vadd.f32 %v1235_v3, %v1130_v62  ;;  %v4893_v5 = vpop.f32.mrb[29].mxu0  ;;  %v5366_v62 = vld [vmem:[%s6673_s3 + $0x58] sm:$0xff]  }
 0x20e   : > { %v1238_v6 = vpop.f32.mrb[30].mxu0 }
 0x20f   : > { %v1239_v53 = vadd.f32 %v1238_v6, %v1133_v0  ;;  %v4894_v7 = vpop.f32.mrb[31].mxu0 }
 0x211   : > { %v1138_v8 = vpop.f32.mrb[20].mxu1 }
 0x212   : > { %v4869_v9 = vpop.f32.mrb[21].mxu1 }
 0x213   : > { %v1141_v10 = vpop.f32.mrb[22].mxu1 }
 0x214   : > { %v4870_v11 = vpop.f32.mrb[23].mxu1  ;;  %v1243_v12 = vpop.f32.mrb[32].mxu0 }
 0x215   : > { %v1244_v13 = vadd.f32 %v1243_v12, %v1138_v8  ;;  %v4897_v14 = vpop.f32.mrb[33].mxu0 }
 0x216   : > { %v1246_v15 = vpop.f32.mrb[34].mxu0 }
 0x217   : > { %v1247_v16 = vadd.f32 %v1246_v15, %v1141_v10  ;;  %v4898_v17 = vpop.f32.mrb[35].mxu0 }
 0x221   : > { %v1352_v18 = vpop.f32.mrb[24].mxu1 }
 0x222   : > { %v1375_v19 = vadd.f32 %v1352_v18, %v1228_v57  ;;  %v4917_v20 = vpop.f32.mrb[25].mxu1 }
 0x223   : > { %v1355_v21 = vpop.f32.mrb[26].mxu1 }
 0x224   : > { %v1376_v22 = vadd.f32 %v1355_v21, %v1231_v60  ;;  %v4918_v23 = vpop.f32.mrb[27].mxu1  ;;  %v1389_v27 = vadd.f32 %v4223_v24, %v1375_v19  ;;  %v5364_v60 = vld [vmem:[%s6673_s3 + $0x50] sm:$0xff]  }
 0x225   : > { %4955 = vmatprep.subr.bf16.mxu0 %v5364_v60 }
 0x226   : > { %v1395_v34 = vmax.f32 %v1389_v27, 0.0  ;;  %v5995_v40 = vadd.f32 %v4223_v24, %v1376_v22  ;;  %4956 = vmatpush3.bf16.msra.mxu0 %v5364_v60 }
 0x227   : > { %4957 = vmatprep.subr.bf16.mxu0 %v5366_v62 }
 0x228   : > { %v1396_v50 = vmax.f32 %v5995_v40, 0.0 }
 0x229   : > { %v1360_v26 = vpop.f32.mrb[28].mxu1 }
 0x22a   : > { %v1377_v28 = vadd.f32 %v1360_v26, %v1236_v4  ;;  %v4921_v29 = vpop.f32.mrb[29].mxu1  ;;  %4958 = vmatpush3.bf16.msra.mxu0 %v5366_v62 }
 0x22b   : > { %v1363_v30 = vpop.f32.mrb[30].mxu1 }
 0x22c   : > { %v1391_v31 = vadd.f32 %v4223_v24, %v1377_v28  ;;  %v1378_v32 = vadd.f32 %v1363_v30, %v1239_v53  ;;  %v4922_v33 = vpop.f32.mrb[31].mxu1 }
 0x22e   : > { %v1397_v35 = vmax.f32 %v1391_v31, 0.0  ;;  %v1392_v46 = vadd.f32 %v4223_v24, %v1378_v32 }
 0x230   : > { %v5292_v37 = vpack.i.bf16 %v1397_v35, %v1395_v34  ;;  %v1398_v55 = vmax.f32 %v1392_v46, 0.0 }
 0x231   : > { %v1368_v39 = vpop.f32.mrb[32].mxu1 }
 0x232   : > { %v1379_v41 = vadd.f32 %v1368_v39, %v1244_v13  ;;  %5293 = vrot.lane.b32.xlu0 %v5292_v37, %s5548_s26  ;;  %v4925_v42 = vpop.f32.mrb[33].mxu1 }
 0x233   : > { %v1371_v43 = vpop.f32.mrb[34].mxu1 }
 0x234   : > { %v1393_v47 = vadd.f32 %v4223_v24, %v1379_v41  ;;  %v1380_v48 = vadd.f32 %v1371_v43, %v1247_v16  ;;  %v4926_v49 = vpop.f32.mrb[35].mxu1 }
 0x236   : > { %v1399_v51 = vmax.f32 %v1393_v47, 0.0  ;;  %v1394_v38 = vadd.f32 %v4223_v24, %v1380_v48 }
 0x238   : > { %v1400_v56 = vmax.f32 %v1394_v38, 0.0  ;;  %v5297_v57 = vpack.i.bf16 %v1396_v50, %v1399_v51 }
 0x23a   : > { %5298 = vrot.lane.b32.xlu0 %v5297_v57, %s5548_s26  ;;  %v5302_v58 = vpack.i.bf16 %v1400_v56, %v1398_v55 }
 0x23c   : > { %5303 = vrot.lane.b32.xlu1 %v5302_v58, %s5548_s26 }
 0x2a4   : > { %v5294_v63 = vpop.permute.xlu0 %5293 }
 0x2a5   : > { %v5296_v0 = vunpack.i.h.bf16 %v5294_v63  ;;  %v5295_v2 = vunpack.i.l.bf16 %v5294_v63 }
 0x2a7   : > { %v1427_v3 = vmax.f32 %v1397_v35, %v5296_v0  ;;  %v1425_v4 = vmax.f32 %v1395_v34, %v5295_v2 }
 0x2a9   : > { %v1435_v5 = vrot.slane %v1427_v3, 1  ;;  %v1434_v6 = vrot.slane %v1425_v4, 1 }
 0x2ab   : > { %v1441_v53 = vmax.f32 %v1427_v3, %v1435_v5  ;;  %v1440_v7 = vmax.f32 %v1425_v4, %v1434_v6 }
 0x2ac   : > { %v5299_v8 = vpop.permute.xlu0 %5298 }
 0x2ad   : > { %v1459_v9 = vrot.slane %v1441_v53, 1  ;;  %v1458_v10 = vrot.slane %v1440_v7, 1  ;;  %v5301_v11 = vunpack.i.h.bf16 %v5299_v8  ;;  %v5300_v12 = vunpack.i.l.bf16 %v5299_v8 }
 0x2ae   : > { %v5304_v13 = vpop.permute.xlu1 %5303  ;;  %v1465_v14 = vrot.slane %v1441_v53, 2  ;;  %v1464_v18 = vrot.slane %v1440_v7, 2  ;;  %v1471_v30 = vrot.slane %v1441_v53, 3  ;;  %v1470_v34 = vrot.slane %v1440_v7, 3 }
 0x2af   : > { %v5306_v15 = vunpack.i.h.bf16 %v5304_v13  ;;  %v5305_v16 = vunpack.i.l.bf16 %v5304_v13  ;;  %v1504_v17 = vsel %vm522_vm1, %v1441_v53, %v1459_v9  ;;  %v1426_v19 = vmax.f32 %v1396_v50, %v5301_v11 }
 0x2b0   : > { %v1429_v20 = vmax.f32 %v1399_v51, %v5300_v12  ;;  %v1503_v21 = vsel %vm522_vm1, %v1440_v7, %v1458_v10  ;;  %v1508_v27 = vsel %vm1506_vm7, %v1504_v17, %v1465_v14 }
 0x2b1   : > { %v1430_v22 = vmax.f32 %v1400_v56, %v5306_v15  ;;  %v1428_v23 = vmax.f32 %v1398_v55, %v5305_v16  ;;  %v1446_v24 = vrot.slane %v1426_v19, 1  ;;  %v1507_v31 = vsel %vm1506_vm7, %v1503_v21, %v1464_v18  ;;  %v5367_v15 = vld [vmem:[%s6673_s3 + $0x8] sm:$0xff]  }
 0x2b2   : > { %v1436_v26 = vrot.slane %v1429_v20, 1  ;;  %v1512_v37 = vsel %vm1510_vm8, %v1508_v27, %v1471_v30  ;;  %v1511_v40 = vsel %vm1510_vm8, %v1507_v31, %v1470_v34  ;;  %v5372_v30 = vld [vmem:[%s6674_s4 + $0x48] sm:$0xff]   ;;  %v5376_v34 = vld [vmem:[%s6674_s4 + $0x58] sm:$0xff]  }
 0x2b3   : > { %v1448_v28 = vrot.slane %v1430_v22, 1  ;;  %v1447_v29 = vrot.slane %v1428_v23, 1  ;;  %v1452_v32 = vmax.f32 %v1426_v19, %v1446_v24  ;;  %v5369_v24 = vld [vmem:[%s6673_s3 + $0x18] sm:$0xff]   ;;  %v5373_v31 = vld [vmem:[%s6674_s4 + $0x8] sm:$0xff]  }
 0x2b4   : > { %v1442_v33 = vmax.f32 %v1429_v20, %v1436_v26 }
 0x2b5   : > { %v1454_v35 = vmax.f32 %v1430_v22, %v1448_v28  ;;  %v1453_v36 = vmax.f32 %v1428_v23, %v1447_v29  ;;  %v1479_v39 = vrot.slane %v1452_v32, 4  ;;  %v1485_v41 = vrot.slane %v1452_v32, 5  ;;  %v5368_v23 = vld [vmem:[%s6673_s3 + $0x10] sm:$0xff]   ;;  %v5371_v29 = vld [vmem:[%s6674_s4] sm:$0xff]  }
 0x2b6   : > { %v1460_v42 = vrot.slane %v1442_v33, 1  ;;  %v1466_v43 = vrot.slane %v1442_v33, 2  ;;  %v1491_v44 = vrot.slane %v1452_v32, 6  ;;  %v1497_v45 = vrot.slane %v1452_v32, 7  ;;  %4983 = vmatprep.subr.bf16.mxu0 %v5371_v29  ;;  %v5374_v32 = vld [vmem:[%s6674_s4 + $0x50] sm:$0xff]  }
 0x2b7   : > { %v1481_v46 = vrot.slane %v1454_v35, 4  ;;  %v1480_v47 = vrot.slane %v1453_v36, 4  ;;  %v1472_v48 = vrot.slane %v1442_v33, 3  ;;  %v1487_v50 = vrot.slane %v1454_v35, 5 }
 0x2b8   : > { %v1505_v49 = vsel %vm522_vm1, %v1442_v33, %v1460_v42  ;;  %v1486_v51 = vrot.slane %v1453_v36, 5  ;;  %v1492_v52 = vrot.slane %v1453_v36, 6  ;;  %v1515_v54 = vsel %vm1514_vm9, %v1511_v40, %v1479_v39  ;;  %v5375_v33 = vld [vmem:[%s6674_s4 + $0x10] sm:$0xff]   ;;  %v5380_v39 = vld [vmem:[%s6674_s4 + $0x68] sm:$0xff]  }
 0x2b9   : > { %v1509_v38 = vsel %vm1506_vm7, %v1505_v49, %v1466_v43  ;;  %v1516_v55 = vsel %vm1514_vm9, %v1512_v37, %v1480_v47  ;;  %v1498_v57 = vrot.slane %v1453_v36, 7  ;;  %v1519_v58 = vsel %vm1518_vm10, %v1515_v54, %v1485_v41  ;;  %v5378_v36 = vld [vmem:[%s6674_s4 + $0x60] sm:$0xff]   ;;  %v5381_v40 = vld [vmem:[%s6674_s4 + $0x28] sm:$0xff]   ;;  %v5382_v41 = vld [vmem:[%s6674_s4 + $0x70] sm:$0xff]  }
 0x2ba   : > { %v1513_v56 = vsel %vm1510_vm8, %v1509_v38, %v1472_v48  ;;  %v1520_v59 = vsel %vm1518_vm10, %v1516_v55, %v1486_v51  ;;  %v1493_v60 = vrot.slane %v1454_v35, 6  ;;  %v1523_v63 = vsel %vm1522_vm11, %v1519_v58, %v1491_v44  ;;  %v5379_v37 = vld [vmem:[%s6674_s4 + $0x20] sm:$0xff]   ;;  %v5383_v42 = vld [vmem:[%s6674_s4 + $0x30] sm:$0xff]   ;;  %v5384_v43 = vld [vmem:[%s6674_s4 + $0x78] sm:$0xff]  }
 0x2bb   : > { %v1517_v62 = vsel %vm1514_vm9, %v1513_v56, %v1481_v46  ;;  %v1524_v0 = vsel %vm1522_vm11, %v1520_v59, %v1492_v52  ;;  %v1499_v2 = vrot.slane %v1454_v35, 7  ;;  %v1526_v4 = vsel %vm541_vm5, %v1523_v63, %v1497_v45  ;;  %v5377_v35 = vld [vmem:[%s6674_s4 + $0x18] sm:$0xff]   ;;  %v5386_v45 = vld [vmem:[%s6674_s4 + $0x80] sm:$0xff]  }
 0x2bc   : > { %v1521_v3 = vsel %vm1518_vm10, %v1517_v62, %v1487_v50  ;;  %v1527_v5 = vsel %vm541_vm5, %v1524_v0, %v1498_v57  ;;  %v1532_v7 = vrot.slane %v1526_v4, 7  ;;  %v1541_v10 = vrot.slane %v1526_v4, 1  ;;  %v5385_v44 = vld [vmem:[%s6674_s4 + $0x38] sm:$0xff]   ;;  %v4259_v57 = vld [vmem:[%s6679_s9 + $0x2] ss:$0 sm:$0xff] }
 0x2bd   : > { %v1525_v6 = vsel %vm1522_vm11, %v1521_v3, %v1493_v60  ;;  %v1560_v53 = vpack.c.bf16 %v1527_v5, %v1526_v4  ;;  %v1533_v8 = vrot.slane %v1527_v5, 7  ;;  %v1542_v11 = vrot.slane %v1527_v5, 1 }
 0x2be   : > { %v1528_v9 = vsel %vm541_vm5, %v1525_v6, %v1499_v2  ;;  %v1538_v13 = vsel %vm522_vm1, 0.0, %v1532_v7  ;;  %v1547_v18 = vsel %vm541_vm5, %v1541_v10, 0.0 }
 0x2bf   : > { %4935 = vmatprep.mubr.msk.bf16.mxu1 %vm1595_vm12, %v1560_v53  ;;  %v1561_v12 = vpack.c.bf16 %v1528_v9, %v1528_v9  ;;  %v1539_v14 = vsel %vm522_vm1, 0.0, %v1533_v8  ;;  %v1543_v16 = vrot.slane %v1528_v9, 1  ;;  %v1548_v19 = vsel %vm541_vm5, %v1542_v11, 0.0 }
 0x2c0   : > { %v1550_v17 = vpack.c.bf16 %v1539_v14, %v1538_v13  ;;  %v1728_v20 = vpack.c.bf16 %v1548_v19, %v1547_v18  ;;  %v1534_v26 = vrot.slane %v1528_v9, 7  ;;  %v5387_v18 = vld [vmem:[%s6674_s4 + $0x88] sm:$0xff]  }
 0x2c1   : > { %4936 = vmatmul.mubr.msk.bf16.vlgmr.msra.gmra.mrb[36].mxu1 %vm1595_vm12, %v1561_v12  ;;  %v1549_v21 = vsel %vm541_vm5, %v1543_v16, 0.0 }
 0x2c2   : > { %4940 = vmatpush3.bf16.msra.mxu1 %v6022_v61  ;;  %4947 = vmatprep.mubr.msk.bf16.mxu1 %vm1595_vm12, %v1550_v17  ;;  %v1729_v22 = vpack.c.bf16 %v1549_v21, %v1549_v21  ;;  %v5370_v61 = vld [vmem:[%s6674_s4 + $0x40] sm:$0xff]   ;;  %v1540_v27 = vsel %vm522_vm1, 0.0, %v1534_v26  ;;  %v5389_v21 = vld [vmem:[%s6674_s4 + $0x98] sm:$0xff]  }
 0x2c3   : > { %4959 = vmatprep.mubr.msk.bf16.mxu0 %vm1595_vm12, %v1728_v20  ;;  %4941 = vmatprep.subr.bf16.mxu1 %v5367_v15  ;;  %v1551_v28 = vpack.c.bf16 %v1540_v27, %v1540_v27  ;;  %v5388_v20 = vld [vmem:[%s6674_s4 + $0x90] sm:$0xff]   ;;  %v5393_v26 = vld [vmem:[%s6674_s4 + $0xb8] sm:$0xff]  }
 0x2c4   : > { %4960 = vmatmul.mubr.msk.bf16.vlgmr.msra.gmra.mrb[36].mxu0 %vm1595_vm12, %v1729_v22  ;;  %v5390_v22 = vld [vmem:[%s6674_s4 + $0xa0] sm:$0xff]  }
 0x2c5   : > { %4984 = vmatpush3.bf16.msra.mxu0 %v5371_v29 }
 0x2c6   : > { %4942 = vmatpush3.bf16.msra.mxu1 %v5367_v15  ;;  %4985 = vmatprep.subr.bf16.mxu0 %v5373_v31 }
 0x2c7   : > { %4943 = vmatprep.subr.bf16.mxu1 %v5368_v23 }
 0x2c9   : > { %4986 = vmatpush3.bf16.msra.mxu0 %v5373_v31 }
 0x2ca   : > { %4944 = vmatpush3.bf16.msra.mxu1 %v5368_v23  ;;  %4987 = vmatprep.subr.bf16.mxu0 %v5375_v33  ;;  %v5391_v23 = vld [vmem:[%s6674_s4 + $0xa8] sm:$0xff]  }
 0x2cb   : > { %4945 = vmatprep.subr.bf16.mxu1 %v5369_v24 }
 0x2cd   : > { %4988 = vmatpush3.bf16.msra.mxu0 %v5375_v33 }
 0x2ce   : > { %4946 = vmatpush3.bf16.msra.mxu1 %v5369_v24  ;;  %4989 = vmatprep.subr.bf16.mxu0 %v5377_v35  ;;  %v5392_v24 = vld [vmem:[%s6674_s4 + $0xb0] sm:$0xff]  }
 0x2cf   : > { %4963 = vmatprep.subr.bf16.mxu1 %v5370_v61 }
 0x2d1   : > { %4948 = vmatmul.mubr.msk.bf16.vlgmr.msra.gmra.mrb[40].mxu1 %vm1595_vm12, %v1551_v28  ;;  %4990 = vmatpush3.bf16.msra.mxu0 %v5377_v35 }
 0x2d2   : > { %4964 = vmatpush3.bf16.msra.mxu1 %v5370_v61  ;;  %4991 = vmatprep.subr.bf16.mxu0 %v5379_v37 }
 0x2d3   : > { %4965 = vmatprep.subr.bf16.mxu1 %v5372_v30 }
 0x2d5   : > { %4992 = vmatpush3.bf16.msra.mxu0 %v5379_v37 }
 0x2d6   : > { %4966 = vmatpush3.bf16.msra.mxu1 %v5372_v30  ;;  %4993 = vmatprep.subr.bf16.mxu0 %v5381_v40 }
 0x2d7   : > { %4967 = vmatprep.subr.bf16.mxu1 %v5374_v32 }
 0x2d9   : > { %4994 = vmatpush3.bf16.msra.mxu0 %v5381_v40  ;;  %v5394_v40 = vld [vmem:[%s6675_s5 + $0x20] sm:$0xff]  }
 0x2da   : > { %4968 = vmatpush3.bf16.msra.mxu1 %v5374_v32  ;;  %4995 = vmatprep.subr.bf16.mxu0 %v5383_v42 }
 0x2db   : > { %4969 = vmatprep.subr.bf16.mxu1 %v5376_v34 }
 0x2dd   : > { %4996 = vmatpush3.bf16.msra.mxu0 %v5383_v42  ;;  %v5396_v42 = vld [vmem:[%s6675_s5 + $0x40] sm:$0xff]  }
 0x2de   : > { %4970 = vmatpush3.bf16.msra.mxu1 %v5376_v34  ;;  %4997 = vmatprep.subr.bf16.mxu0 %v5385_v44 }
 0x2df   : > { %4971 = vmatprep.subr.bf16.mxu1 %v5378_v36 }
 0x2e1   : > { %4998 = vmatpush3.bf16.msra.mxu0 %v5385_v44 }
 0x2e2   : > { %4972 = vmatpush3.bf16.msra.mxu1 %v5378_v36  ;;  %5023 = vmatprep.subr.bf16.mxu0 %v5545_v1 }
 0x2e3   : > { %4973 = vmatprep.subr.bf16.mxu1 %v5380_v39 }
 0x2e6   : > { %4974 = vmatpush3.bf16.msra.mxu1 %v5380_v39 }
 0x2e7   : > { %4975 = vmatprep.subr.bf16.mxu1 %v5382_v41 }
 0x2ea   : > { %4976 = vmatpush3.bf16.msra.mxu1 %v5382_v41  ;;  %v5395_v41 = vld [vmem:[%s6675_s5 + $0x28] sm:$0xff]  }
 0x2eb   : > { %4977 = vmatprep.subr.bf16.mxu1 %v5384_v43 }
 0x2ee   : > { %4978 = vmatpush3.bf16.msra.mxu1 %v5384_v43 }
 0x2ef   : > { %5003 = vmatprep.subr.bf16.mxu1 %v5386_v45 }
 0x394   : > { %v4937_v46 = vpop.f32.mrb[36].mxu1 }
 0x395   : > { %v1636_v47 = vpop.f32.mrb[37].mxu1 }
 0x396   : > { %v4938_v48 = vpop.f32.mrb[38].mxu1 }
 0x397   : > { %v1639_v49 = vpop.f32.mrb[39].mxu1  ;;  %v4961_v50 = vpop.f32.mrb[36].mxu0 }
 0x398   : > { %v1803_v51 = vpop.f32.mrb[37].mxu0 }
 0x399   : > { %v4962_v38 = vpop.f32.mrb[38].mxu0 }
 0x39a   : > { %v1806_v52 = vpop.f32.mrb[39].mxu0 }
 0x3a4   : > { %v4949_v54 = vpop.f32.mrb[40].mxu1 }
 0x3a5   : > { %v1723_v55 = vadd.f32 %v4949_v54, %v4937_v46  ;;  %v1714_v56 = vpop.f32.mrb[41].mxu1 }
 0x3a6   : > { %v1715_v58 = vadd.f32 %v1714_v56, %v1636_v47  ;;  %v4950_v59 = vpop.f32.mrb[42].mxu1 }
 0x3a7   : > { %v1819_v60 = vadd.f32 %v4961_v50, %v1723_v55  ;;  %v1717_v62 = vpop.f32.mrb[43].mxu1  ;;  %v5397_v50 = vld [vmem:[%s6675_s5 + $0x30] sm:$0xff]  }
 0x3a8   : > { %v1817_v63 = vadd.f32 %v1803_v51, %v1715_v58  ;;  %v1718_v0 = vadd.f32 %v1717_v62, %v1639_v49  ;;  %v5398_v51 = vld [vmem:[%s6675_s5 + $0x48] sm:$0xff]   ;;  %v5400_v58 = vld [vmem:[%s6675_s5 + $0x50] sm:$0xff]   ;;  %v5402_v62 = vld [vmem:[%s6675_s5 + $0x58] sm:$0xff]  }
 0x3a9   : > { %v1830_v2 = vadd.f32 %v4259_v57, %v1819_v60 }
 0x3aa   : > { %v1828_v3 = vadd.f32 %v4259_v57, %v1817_v63  ;;  %v1818_v4 = vadd.f32 %v1806_v52, %v1718_v0 }
 0x3ab   : > { %v1833_v5 = vmax.f32 %v1830_v2, 0.0 }
 0x3ac   : > { %v1831_v6 = vmax.f32 %v1828_v3, 0.0  ;;  %v1829_v53 = vadd.f32 %v4259_v57, %v1818_v4  ;;  %v5399_v57 = vld [vmem:[%s6675_s5 + $0x38] sm:$0xff]  }
 0x3ad   : > { %v1839_v8 = vrot.slane %v1833_v5, 7  ;;  %v1874_v14 = vpack.c.bf16 %v1833_v5, %v1833_v5  ;;  %v1848_v61 = vrot.slane %v1833_v5, 1 }
 0x3ae   : > { %v1832_v7 = vmax.f32 %v1829_v53, 0.0  ;;  %v1837_v9 = vrot.slane %v1831_v6, 7  ;;  %v1846_v12 = vrot.slane %v1831_v6, 1 }
 0x3af   : > { %v4300_v19 = vpack.c.bf16 %v1839_v8, %v1839_v8  ;;  %v4330_v27 = vpack.c.bf16 %v1848_v61, %v1848_v61 }
 0x3b0   : > { %v1873_v10 = vpack.c.bf16 %v1832_v7, %v1831_v6  ;;  %v1838_v11 = vrot.slane %v1832_v7, 7  ;;  %v1847_v13 = vrot.slane %v1832_v7, 1 }
 0x3b2   : > { %4979 = vmatprep.mubr.bf16.mxu1 %v1873_v10  ;;  %v4295_v15 = vpack.c.bf16 %v1838_v11, %v1837_v9  ;;  %v4327_v17 = vpack.c.bf16 %v1847_v13, %v1846_v12 }
 0x3b3   : > { %4980 = vmatmul.mubr.bf16.vlgmr.msra.gmra.mrb[44].mxu1 %v1874_v14 }
 0x3b4   : > { %5004 = vmatpush3.bf16.msra.mxu1 %v5386_v45  ;;  %4999 = vmatprep.mubr.msk.bf16.mxu0 %vm4294_vm13, %v4295_v15  ;;  %v4333_v45 = vld [vmem:[%s6679_s9 + $0x3] ss:$0 sm:$0xff] }
 0x3b5   : > { %5019 = vmatprep.mubr.msk.bf16.mxu1 %vm6131_vm14, %v4327_v17  ;;  %5000 = vmatmul.mubr.msk.bf16.vlgmr.msra.gmra.mrb[40].mxu0 %vm4294_vm13, %v4300_v19 }
 0x3b6   : > { %5005 = vmatprep.subr.bf16.mxu1 %v5387_v18  ;;  %5031 = vmatprep.mubr.msk.bf16.mxu0 %vm5546_vm0, %v5545_v1 }
 0x3b7   : > { %5024 = vmatpush3.bf16.msra.mxu0 %v5394_v40 }
 0x3b8   : > { %5006 = vmatpush3.bf16.msra.mxu1 %v5387_v18  ;;  %5025 = vmatprep.subr.bf16.mxu0 %v5545_v1 }
 0x3b9   : > { %5007 = vmatprep.subr.bf16.mxu1 %v5388_v20 }
 0x3bb   : > { %5026 = vmatpush3.bf16.msra.mxu0 %v5395_v41  ;;  %v5403_v41 = vld [vmem:[%s6675_s5 + $0x8] sm:$0xff]  }
 0x3bc   : > { %5008 = vmatpush3.bf16.msra.mxu1 %v5388_v20  ;;  %5027 = vmatprep.subr.bf16.mxu0 %v5545_v1 }
 0x3bd   : > { %5009 = vmatprep.subr.bf16.mxu1 %v5389_v21 }
 0x3bf   : > { %5028 = vmatpush3.bf16.msra.mxu0 %v5397_v50 }
 0x3c0   : > { %5010 = vmatpush3.bf16.msra.mxu1 %v5389_v21  ;;  %5029 = vmatprep.subr.bf16.mxu0 %v5545_v1 }
 0x3c1   : > { %5011 = vmatprep.subr.bf16.mxu1 %v5390_v22 }
 0x3c3   : > { %5030 = vmatpush3.bf16.msra.mxu0 %v5399_v57  ;;  %v5411_v57 = vld [vmem:[%s6676_s6 + $0x58] sm:$0xff]  }
 0x3c4   : > { %5012 = vmatpush3.bf16.msra.mxu1 %v5390_v22  ;;  %5035 = vmatprep.subr.bf16.mxu0 %v5545_v1 }
 0x3c5   : > { %5013 = vmatprep.subr.bf16.mxu1 %v5391_v23 }
 0x3c8   : > { %5014 = vmatpush3.bf16.msra.mxu1 %v5391_v23 }
 0x3c9   : > { %5015 = vmatprep.subr.bf16.mxu1 %v5392_v24 }
 0x3cc   : > { %5016 = vmatpush3.bf16.msra.mxu1 %v5392_v24 }
 0x3cd   : > { %5017 = vmatprep.subr.bf16.mxu1 %v5393_v26 }
 0x3d0   : > { %5018 = vmatpush3.bf16.msra.mxu1 %v5393_v26 }
 0x3d1   : > { %5047 = vmatprep.subr.bf16.mxu1 %v5545_v1 }
 0x3d3   : > { %5020 = vmatmul.mubr.msk.bf16.vlgmr.msra.gmra.mrb[48].mxu1 %vm6131_vm14, %v4330_v27 }
 0x3d4   : > { %5055 = vmatprep.mubr.msk.bf16.mxu1 %vm5546_vm0, %v5545_v1  ;;  %5048 = vmatpush3.bf16.msra.mxu1 %v5396_v42 }
 0x3d5   : > { %5049 = vmatprep.subr.bf16.mxu1 %v5545_v1 }
 0x3d8   : > { %5050 = vmatpush3.bf16.msra.mxu1 %v5398_v51  ;;  %v5406_v51 = vld [vmem:[%s6676_s6 + $0x40] sm:$0xff]  }
 0x3d9   : > { %5051 = vmatprep.subr.bf16.mxu1 %v5545_v1 }
 0x3dc   : > { %5052 = vmatpush3.bf16.msra.mxu1 %v5400_v58  ;;  %v5412_v58 = vld [vmem:[%s6676_s6 + $0x10] sm:$0xff]  }
 0x3dd   : > { %5053 = vmatprep.subr.bf16.mxu1 %v5545_v1 }
 0x3e0   : > { %5054 = vmatpush3.bf16.msra.mxu1 %v5402_v62  ;;  %v5415_v62 = vld [vmem:[%s6676_s6 + $0x68] sm:$0xff]  }
 0x3e1   : > { %5079 = vmatprep.subr.bf16.mxu1 %v5545_v1 }
 0x486   : > { %v4981_v28 = vpop.f32.mrb[44].mxu1 }
 0x487   : > { %v1974_v29 = vpop.f32.mrb[45].mxu1 }
 0x488   : > { %v4982_v30 = vpop.f32.mrb[46].mxu1  ;;  %v5001_v31 = vpop.f32.mrb[40].mxu0 }
 0x489   : > { %v2079_v32 = vadd.f32 %v5001_v31, %v4981_v28  ;;  %v1977_v33 = vpop.f32.mrb[47].mxu1  ;;  %v2070_v34 = vpop.f32.mrb[41].mxu0 }
 0x48a   : > { %v2071_v35 = vadd.f32 %v2070_v34, %v1974_v29  ;;  %v5002_v36 = vpop.f32.mrb[42].mxu0 }
 0x48b   : > { %v2073_v37 = vpop.f32.mrb[43].mxu0 }
 0x48c   : > { %v2074_v39 = vadd.f32 %v2073_v37, %v1977_v33 }
 0x4a6   : > { %v5021_v43 = vpop.f32.mrb[48].mxu1 }
 0x4a7   : > { %v2201_v44 = vadd.f32 %v5021_v43, %v2079_v32  ;;  %v2185_v46 = vpop.f32.mrb[49].mxu1  ;;  %v5401_v32 = vld [vmem:[%s6675_s5] sm:$0xff]   ;;  %v5404_v43 = vld [vmem:[%s6675_s5 + $0x10] sm:$0xff]  }
 0x4a8   : > { %v2199_v47 = vadd.f32 %v2185_v46, %v2071_v35  ;;  %v5022_v48 = vpop.f32.mrb[50].mxu1 }
 0x4a9   : > { %v2188_v49 = vpop.f32.mrb[51].mxu1  ;;  %v2212_v54 = vadd.f32 %v4333_v45, %v2201_v44 }
 0x4aa   : > { %v2210_v38 = vadd.f32 %v4333_v45, %v2199_v47  ;;  %v2200_v52 = vadd.f32 %v2188_v49, %v2074_v39  ;;  %v5405_v47 = vld [vmem:[%s6675_s5 + $0x18] sm:$0xff]  }
 0x4ab   : > { %v2215_v60 = vmax.f32 %v2212_v54, 0.0  ;;  %v5408_v54 = vld [vmem:[%s6676_s6] sm:$0xff]  }
 0x4ac   : > { %v2213_v55 = vmax.f32 %v2210_v38, 0.0  ;;  %v2211_v56 = vadd.f32 %v4333_v45, %v2200_v52  ;;  %v5407_v52 = vld [vmem:[%s6676_s6 + $0x48] sm:$0xff]  }
 0x4ae   : > { %v2214_v59 = vmax.f32 %v2211_v56, 0.0  ;;  %2219 = vrot.lane.b32.xlu1 %v2213_v55, %s5548_s26  ;;  %v5410_v56 = vld [vmem:[%s6676_s6 + $0x8] sm:$0xff]  }
 0x4b0   : > { %2221 = vrot.lane.b32.xlu0 %v2214_v59, %s5548_s26 }
 0x4b2   : > { %2223 = vrot.lane.b32.xlu1 %v2215_v60, %s5548_s26 }
 0x520   : > { %v2220_v63 = vpop.permute.xlu1 %2219 }
 0x521   : > { %v2228_v0 = vmax.f32 %v2213_v55, %v2220_v63  ;;  %v5409_v55 = vld [vmem:[%s6676_s6 + $0x50] sm:$0xff]   ;;  %v5416_v63 = vld [vmem:[%s6676_s6 + $0x20] sm:$0xff]  }
 0x522   : > { %v2222_v2 = vpop.permute.xlu0 %2221 }
 0x523   : > { %v2234_v3 = vrot.slane %v2228_v0, 1  ;;  %v2229_v4 = vmax.f32 %v2214_v59, %v2222_v2  ;;  %v5413_v59 = vld [vmem:[%s6676_s6 + $0x60] sm:$0xff]   ;;  %v5418_v2 = vld [vmem:[%s6676_s6 + $0x28] sm:$0xff]  }
 0x524   : > { %v2224_v5 = vpop.permute.xlu1 %2223 }
 0x525   : > { %v2240_v6 = vmax.f32 %v2228_v0, %v2234_v3  ;;  %v2235_v53 = vrot.slane %v2229_v4, 1  ;;  %v2230_v7 = vmax.f32 %v2215_v60, %v2224_v5  ;;  %v5414_v60 = vld [vmem:[%s6676_s6 + $0x18] sm:$0xff]   ;;  %v5417_v0 = vld [vmem:[%s6676_s6 + $0x70] sm:$0xff]  }
 0x526   : > { %v5419_v3 = vld [vmem:[%s6676_s6 + $0x78] sm:$0xff]  }
 0x527   : > { %v2246_v8 = vrot.slane %v2240_v6, 1  ;;  %v2252_v9 = vrot.slane %v2240_v6, 2  ;;  %v2241_v10 = vmax.f32 %v2229_v4, %v2235_v53  ;;  %v2236_v11 = vrot.slane %v2230_v7, 1  ;;  %v5420_v4 = vld [vmem:[%s6676_s6 + $0x30] sm:$0xff]   ;;  %v5422_v5 = vld [vmem:[%s6676_s6 + $0x38] sm:$0xff]  }
 0x528   : > { %v2258_v12 = vrot.slane %v2240_v6, 3 }
 0x529   : > { %v2264_v13 = vsel %vm522_vm1, %v2240_v6, %v2246_v8  ;;  %v2247_v14 = vrot.slane %v2241_v10, 1  ;;  %v2253_v15 = vrot.slane %v2241_v10, 2  ;;  %v2242_v17 = vmax.f32 %v2230_v7, %v2236_v11 }
 0x52a   : > { %v2267_v16 = vsel %vm1506_vm7, %v2264_v13, %v2252_v9  ;;  %v2259_v19 = vrot.slane %v2241_v10, 3 }
 0x52b   : > { %v2270_v18 = vsel %vm1510_vm8, %v2267_v16, %v2258_v12  ;;  %v2265_v20 = vsel %vm522_vm1, %v2241_v10, %v2247_v14  ;;  %v2248_v22 = vrot.slane %v2242_v17, 1  ;;  %v2254_v23 = vrot.slane %v2242_v17, 2  ;;  %v4366_v16 = vld [vmem:[%s6679_s9 + $0x4] ss:$0 sm:$0xff] }
 0x52c   : > { %v2268_v21 = vsel %vm1506_vm7, %v2265_v20, %v2253_v15  ;;  %v2285_v26 = vrot.slane %v2270_v18, 1  ;;  %v2260_v61 = vrot.slane %v2242_v17, 3  ;;  %v2276_v44 = vrot.slane %v2270_v18, 7 }
 0x52d   : > { %v2271_v24 = vsel %vm1510_vm8, %v2268_v21, %v2259_v19  ;;  %v2266_v27 = vsel %vm522_vm1, %v2242_v17, %v2248_v22 }
 0x52e   : > { %v2307_v28 = vcombine.low %v2270_v18, %v2271_v24  ;;  %v2286_v29 = vrot.slane %v2271_v24, 1  ;;  %v2269_v30 = vsel %vm1506_vm7, %v2266_v27, %v2254_v23  ;;  %v2291_v33 = vsel %vm1510_vm8, %v2285_v26, 0.0 }
 0x52f   : > { %v2272_v31 = vsel %vm1510_vm8, %v2269_v30, %v2260_v61  ;;  %v2277_v42 = vrot.slane %v2271_v24, 7  ;;  %v2282_v48 = vsel %vm522_vm1, 0.0, %v2276_v44 }
 0x530   : > { %v2292_v34 = vsel %vm1510_vm8, %v2286_v29, 0.0  ;;  %v2309_v35 = vpack.c.bf16 %v2272_v31, %v2307_v28  ;;  %v2287_v36 = vrot.slane %v2272_v31, 1  ;;  %v2278_v45 = vrot.slane %v2272_v31, 7  ;;  %v5421_v31 = vld [vmem:[%s6676_s6 + $0x80] sm:$0xff]  }
 0x531   : > { %v2457_v37 = vcombine.low %v2291_v33, %v2292_v34  ;;  %v2283_v46 = vsel %vm522_vm1, 0.0, %v2277_v42  ;;  %v5423_v42 = vld [vmem:[%s6676_s6 + $0x88] sm:$0xff]  }
 0x532   : > { %5032 = vmatmul.mubr.msk.bf16.vlgmr.msra.gmra.mrb[44].mxu0 %vm1595_vm12, %v2309_v35  ;;  %v2293_v39 = vsel %vm1510_vm8, %v2287_v36, 0.0  ;;  %v2296_v49 = vcombine.low %v2282_v48, %v2283_v46  ;;  %v2284_v50 = vsel %vm522_vm1, 0.0, %v2278_v45  ;;  %v5424_v45 = vld [vmem:[%s6676_s6 + $0x90] sm:$0xff]   ;;  %v5426_v46 = vld [vmem:[%s6676_s6 + $0xa0] sm:$0xff]  }
 0x533   : > { %5036 = vmatpush3.bf16.msra.mxu0 %v5401_v32  ;;  %v2459_v40 = vpack.c.bf16 %v2293_v39, %v2457_v37  ;;  %5043 = vmatprep.mubr.msk.bf16.mxu0 %vm5546_vm0, %v5545_v1  ;;  %v5428_v48 = vld [vmem:[%s6676_s6 + $0xb0] sm:$0xff]  }
 0x534   : > { %5037 = vmatprep.subr.bf16.mxu0 %v5545_v1  ;;  %v2298_v38 = vpack.c.bf16 %v2284_v50, %v2296_v49  ;;  %v5429_v49 = vld [vmem:[%s6676_s6 + $0xb8] sm:$0xff]  }
 0x535   : > { %5056 = vmatmul.mubr.msk.bf16.vlgmr.msra.gmra.mrb[52].mxu1 %vm1595_vm12, %v2459_v40 }
 0x536   : > { %5095 = vmatprep.mubr.msk.bf16.mxu1 %vm5546_vm0, %v5545_v1  ;;  %5080 = vmatpush3.bf16.msra.mxu1 %v5408_v54 }
 0x537   : > { %5038 = vmatpush3.bf16.msra.mxu0 %v5403_v41  ;;  %5081 = vmatprep.subr.bf16.mxu1 %v5545_v1 }
 0x538   : > { %5039 = vmatprep.subr.bf16.mxu0 %v5545_v1 }
 0x53a   : > { %5082 = vmatpush3.bf16.msra.mxu1 %v5410_v56 }
 0x53b   : > { %5040 = vmatpush3.bf16.msra.mxu0 %v5404_v43  ;;  %5083 = vmatprep.subr.bf16.mxu1 %v5545_v1 }
 0x53c   : > { %5041 = vmatprep.subr.bf16.mxu0 %v5545_v1 }
 0x53e   : > { %5084 = vmatpush3.bf16.msra.mxu1 %v5412_v58 }
 0x53f   : > { %5042 = vmatpush3.bf16.msra.mxu0 %v5405_v47  ;;  %5085 = vmatprep.subr.bf16.mxu1 %v5545_v1  ;;  %v5427_v47 = vld [vmem:[%s6676_s6 + $0xa8] sm:$0xff]  }
 0x540   : > { %5059 = vmatprep.subr.bf16.mxu0 %v5545_v1 }
 0x542   : > { %5044 = vmatmul.mubr.msk.bf16.vlgmr.msra.gmra.mrb[48].mxu0 %vm1595_vm12, %v2298_v38  ;;  %5086 = vmatpush3.bf16.msra.mxu1 %v5414_v60  ;;  %v5430_v60 = vld [vmem:[%s6677_s7 + $0x20] sm:$0xff]  }
 0x543   : > { %5060 = vmatpush3.bf16.msra.mxu0 %v5406_v51  ;;  %5075 = vmatprep.mubr.msk.bf16.mxu0 %vm5546_vm0, %v5545_v1 }
 0x544   : > { %5061 = vmatprep.subr.bf16.mxu0 %v5545_v1  ;;  %5087 = vmatprep.subr.bf16.mxu1 %v5545_v1 }
 0x546   : > { %5088 = vmatpush3.bf16.msra.mxu1 %v5416_v63  ;;  %v4431_v63 = vld [vmem:[%s6679_s9 + $0x5] ss:$0 sm:$0xff] }
 0x547   : > { %5062 = vmatpush3.bf16.msra.mxu0 %v5407_v52  ;;  %5089 = vmatprep.subr.bf16.mxu1 %v5545_v1 }
 0x548   : > { %5063 = vmatprep.subr.bf16.mxu0 %v5545_v1 }
 0x54a   : > { %5090 = vmatpush3.bf16.msra.mxu1 %v5418_v2 }
 0x54b   : > { %5064 = vmatpush3.bf16.msra.mxu0 %v5409_v55  ;;  %5091 = vmatprep.subr.bf16.mxu1 %v5545_v1 }
 0x54c   : > { %5065 = vmatprep.subr.bf16.mxu0 %v5545_v1 }
 0x54e   : > { %5092 = vmatpush3.bf16.msra.mxu1 %v5420_v4  ;;  %v5432_v4 = vld [vmem:[%s6677_s7 + $0x40] sm:$0xff]  }
 0x54f   : > { %5066 = vmatpush3.bf16.msra.mxu0 %v5411_v57  ;;  %5093 = vmatprep.subr.bf16.mxu1 %v5545_v1 }
 0x550   : > { %5067 = vmatprep.subr.bf16.mxu0 %v5545_v1 }
 0x552   : > { %5094 = vmatpush3.bf16.msra.mxu1 %v5422_v5 }
 0x553   : > { %5068 = vmatpush3.bf16.msra.mxu0 %v5413_v59  ;;  %5119 = vmatprep.subr.bf16.mxu1 %v5545_v1 }
 0x554   : > { %5069 = vmatprep.subr.bf16.mxu0 %v5545_v1 }
 0x557   : > { %5070 = vmatpush3.bf16.msra.mxu0 %v5415_v62 }
 0x558   : > { %5071 = vmatprep.subr.bf16.mxu0 %v5545_v1 }
 0x55b   : > { %5072 = vmatpush3.bf16.msra.mxu0 %v5417_v0 }
 0x55c   : > { %5073 = vmatprep.subr.bf16.mxu0 %v5545_v1 }
 0x55f   : > { %5074 = vmatpush3.bf16.msra.mxu0 %v5419_v3  ;;  %v5431_v3 = vld [vmem:[%s6677_s7 + $0x28] sm:$0xff]  }
 0x560   : > { %5099 = vmatprep.subr.bf16.mxu0 %v5545_v1 }
 0x605   : > { %v2380_v6 = vpop.f32.mrb[44].mxu0 }
 0x606   : > { %v5033_v53 = vpop.f32.mrb[45].mxu0 }
 0x607   : > { %v2383_v7 = vpop.f32.mrb[46].mxu0 }
 0x608   : > { %v5034_v8 = vpop.f32.mrb[47].mxu0  ;;  %v2530_v9 = vpop.f32.mrb[52].mxu1 }
 0x609   : > { %v5057_v10 = vpop.f32.mrb[53].mxu1 }
 0x60a   : > { %v2533_v11 = vpop.f32.mrb[54].mxu1  ;;  %v5433_v10 = vld [vmem:[%s6677_s7 + $0x30] sm:$0xff]  }
 0x60b   : > { %v5058_v12 = vpop.f32.mrb[55].mxu1 }
 0x615   : > { %v2448_v13 = vpop.f32.mrb[48].mxu0 }
 0x616   : > { %v2449_v14 = vadd.f32 %v2448_v13, %v2380_v6  ;;  %v5045_v15 = vpop.f32.mrb[49].mxu0  ;;  %v5435_v13 = vld [vmem:[%s6677_s7 + $0x38] sm:$0xff]  }
 0x617   : > { %v2451_v17 = vpop.f32.mrb[50].mxu0  ;;  %v5438_v15 = vld [vmem:[%s6677_s7 + $0x58] sm:$0xff]  }
 0x618   : > { %v2537_v18 = vadd.f32 %v2530_v9, %v2449_v14  ;;  %v2452_v19 = vadd.f32 %v2451_v17, %v2383_v7  ;;  %v5046_v20 = vpop.f32.mrb[51].mxu0  ;;  %v5436_v14 = vld [vmem:[%s6677_s7 + $0x50] sm:$0xff]  }
 0x619   : > { %v5549_v20 = vmov 1983009808  }
 0x61a   : > { %v2547_v21 = vadd.f32 %v4366_v16, %v2537_v18  ;;  %v2538_v22 = vadd.f32 %v2533_v11, %v2452_v19  ;;  %v5434_v11 = vld [vmem:[%s6677_s7 + $0x48] sm:$0xff]  }
 0x61c   : > { %v2549_v23 = vmax.f32 %v2547_v21, 0.0  ;;  %v2548_v24 = vadd.f32 %v4366_v16, %v2538_v22  ;;  %v2943_v16 = vlaneseq  ;;  %v2987_v21 = vunpack.c.l.s4 %v5549_v20  ;;  %v5453_v20 = vld [vmem:[%s6678_s8 + $0x78] sm:$0xff]  }
 0x61e   : > { %v2553_v26 = vcombine.high %v2549_v23, %v2549_v23  ;;  %v2554_v61 = vrot.slane %v2549_v23, 7  ;;  %v2563_v27 = vrot.slane %v2549_v23, 1  ;;  %v2550_v28 = vmax.f32 %v2548_v24, 0.0 }
 0x61f   : > { %v6394_v17 = vshrl.u32 %v2943_v16, 7  ;;  %v5450_v16 = vld [vmem:[%s6678_s8 + $0x10] sm:$0xff]  }
 0x620   : > { %v2555_v29 = vrot.slane %v2553_v26, 7  ;;  %v2564_v30 = vrot.slane %v2553_v26, 1  ;;  %v2593_v32 = vpack.c.bf16 %v2550_v28, %v2549_v23  ;;  %v2560_v33 = vsel %vm522_vm1, 0.0, %v2554_v61 }
 0x621   : > { %v2569_v35 = vsel %vm1510_vm8, %v2563_v27, 0.0  ;;  %v2556_v37 = vrot.slane %v2550_v28, 7  ;;  %v2565_v39 = vrot.slane %v2550_v28, 1  ;;  %v2945_v23 = vsub.s32 2, %v6394_v17 }
 0x622   : > { %v2561_v34 = vsel %vm522_vm1, 0.0, %v2555_v29  ;;  %v2570_v36 = vsel %vm1510_vm8, %v2564_v30, 0.0  ;;  %5076 = vmatmul.mubr.bf16.vlgmr.msra.gmra.mrb[52].mxu0 %v2593_v32  ;;  %v2988_v30 = vunpack.c.0.s8 %v2987_v21  ;;  %v5454_v21 = vld [vmem:[%s6678_s8 + $0x20] sm:$0xff]  }
 0x623   : > { %v2574_v40 = vcombine.low %v2560_v33, %v2561_v34  ;;  %v2791_v41 = vcombine.low %v2569_v35, %v2570_v36  ;;  %5100 = vmatpush3.bf16.msra.mxu0 %v5421_v31  ;;  %5115 = vmatprep.mubr.msk.bf16.mxu0 %vm5546_vm0, %v5545_v1 }
 0x624   : > { %5101 = vmatprep.subr.bf16.mxu0 %v5545_v1 }
 0x625   : > { %v4401_v43 = vpack.c.bf16 %v2556_v37, %v2574_v40  ;;  %v4428_v44 = vpack.c.bf16 %v2565_v39, %v2791_v41  ;;  %v6399_v39 = vsub.s32 %v2988_v30, %v6394_v17 }
 0x627   : > { %5096 = vmatmul.mubr.msk.bf16.vlgmr.msra.gmra.mrb[56].mxu1 %vm4400_vm15, %v4401_v43  ;;  %5102 = vmatpush3.bf16.msra.mxu0 %v5423_v42 }
 0x628   : > { %5127 = vmatprep.mubr.msk.bf16.mxu1 %vm5546_vm0, %v5545_v1  ;;  %5103 = vmatprep.subr.bf16.mxu0 %v5545_v1 }
 0x629   : > { %5120 = vmatpush3.bf16.msra.mxu1 %v5430_v60 }
 0x62a   : > { %5121 = vmatprep.subr.bf16.mxu1 %v5545_v1 }
 0x62b   : > { %5104 = vmatpush3.bf16.msra.mxu0 %v5424_v45 }
 0x62c   : > { %5105 = vmatprep.subr.bf16.mxu0 %v5545_v1 }
 0x62d   : > { %5122 = vmatpush3.bf16.msra.mxu1 %v5431_v3  ;;  %v5440_v3 = vld [vmem:[%s6677_s7 + $0x10] sm:$0xff]  }
 0x62e   : > { %5123 = vmatprep.subr.bf16.mxu1 %v5545_v1 }
 0x62f   : > { %5106 = vmatpush3.bf16.msra.mxu0 %v5425_v25 }
 0x630   : > { %5107 = vmatprep.subr.bf16.mxu0 %v5545_v1 }
 0x631   : > { %5124 = vmatpush3.bf16.msra.mxu1 %v5433_v10  ;;  %v5444_v10 = vld [vmem:[%s6678_s8 + $0x50] sm:$0xff]  }
 0x632   : > { %5125 = vmatprep.subr.bf16.mxu1 %v5545_v1 }
 0x633   : > { %5108 = vmatpush3.bf16.msra.mxu0 %v5426_v46 }
 0x634   : > { %5109 = vmatprep.subr.bf16.mxu0 %v5545_v1 }
 0x635   : > { %5126 = vmatpush3.bf16.msra.mxu1 %v5435_v13  ;;  %v5447_v13 = vld [vmem:[%s6678_s8 + $0x60] sm:$0xff]  }
 0x636   : > { %5131 = vmatprep.subr.bf16.mxu1 %v5545_v1 }
 0x637   : > { %5110 = vmatpush3.bf16.msra.mxu0 %v5427_v47 }
 0x638   : > { %5111 = vmatprep.subr.bf16.mxu0 %v5545_v1 }
 0x63b   : > { %5112 = vmatpush3.bf16.msra.mxu0 %v5428_v48 }
 0x63c   : > { %5113 = vmatprep.subr.bf16.mxu0 %v5545_v1 }
 0x63f   : > { %5114 = vmatpush3.bf16.msra.mxu0 %v5429_v49 }
 0x640   : > { %5143 = vmatprep.subr.bf16.mxu0 %v5545_v1 }
 0x642   : > { %5116 = vmatmul.mubr.msk.bf16.vlgmr.msra.gmra.mrb[56].mxu0 %vm4427_vm2, %v4428_v44 }
 0x643   : > { %5151 = vmatprep.mubr.msk.bf16.mxu0 %vm5546_vm0, %v5545_v1  ;;  %5144 = vmatpush3.bf16.msra.mxu0 %v5432_v4 }
 0x644   : > { %5145 = vmatprep.subr.bf16.mxu0 %v5545_v1 }
 0x647   : > { %5146 = vmatpush3.bf16.msra.mxu0 %v5434_v11  ;;  %v5445_v11 = vld [vmem:[%s6678_s8 + $0x58] sm:$0xff]  }
 0x648   : > { %5147 = vmatprep.subr.bf16.mxu0 %v5545_v1 }
 0x64b   : > { %5148 = vmatpush3.bf16.msra.mxu0 %v5436_v14  ;;  %v5448_v14 = vld [vmem:[%s6678_s8 + $0x8] sm:$0xff]  }
 0x64c   : > { %5149 = vmatprep.subr.bf16.mxu0 %v5545_v1 }
 0x64f   : > { %5150 = vmatpush3.bf16.msra.mxu0 %v5438_v15  ;;  %v5449_v15 = vld [vmem:[%s6678_s8 + $0x68] sm:$0xff]  }
 0x650   : > { %5175 = vmatprep.subr.bf16.mxu0 %v5545_v1 }
 0x6f5   : > { %v2693_v50 = vpop.f32.mrb[52].mxu0 }
 0x6f6   : > { %v5077_v51 = vpop.f32.mrb[53].mxu0 }
 0x6f7   : > { %v2696_v38 = vpop.f32.mrb[54].mxu0 }
 0x6f8   : > { %v5078_v52 = vpop.f32.mrb[55].mxu0 }
 0x6fa   : > { %v2782_v54 = vpop.f32.mrb[56].mxu1 }
 0x6fb   : > { %v2783_v55 = vadd.f32 %v2782_v54, %v2693_v50  ;;  %v5097_v56 = vpop.f32.mrb[57].mxu1 }
 0x6fc   : > { %v2785_v57 = vpop.f32.mrb[58].mxu1 }
 0x6fd   : > { %v2786_v58 = vadd.f32 %v2785_v57, %v2696_v38  ;;  %v5098_v59 = vpop.f32.mrb[59].mxu1 }
 0x715   : > { %v2893_v62 = vpop.f32.mrb[56].mxu0 }
 0x716   : > { %v2900_v0 = vadd.f32 %v2893_v62, %v2783_v55  ;;  %v5117_v2 = vpop.f32.mrb[57].mxu0  ;;  %v5437_v55 = vld [vmem:[%s6677_s7] sm:$0xff]  }
 0x717   : > { %v2896_v5 = vpop.f32.mrb[58].mxu0 }
 0x718   : > { %v2910_v6 = vadd.f32 %v4431_v63, %v2900_v0  ;;  %v2901_v53 = vadd.f32 %v2896_v5, %v2786_v58  ;;  %v5118_v7 = vpop.f32.mrb[59].mxu0 }
 0x719   : > { %v5442_v7 = vld [vmem:[%s6678_s8 + $0x40] sm:$0xff]  }
 0x71a   : > { %v2912_v8 = vmax.f32 %v2910_v6, 0.0  ;;  %v2911_v9 = vadd.f32 %v4431_v63, %v2901_v53  ;;  %v5439_v63 = vld [vmem:[%s6677_s7 + $0x8] sm:$0xff]   ;;  %v5441_v6 = vld [vmem:[%s6677_s7 + $0x18] sm:$0xff]  }
 0x71c   : > { %v2913_v12 = vmax.f32 %v2911_v9, 0.0  ;;  %2916 = vrot.lane.b32.xlu0 %v2912_v8, %s5548_s26  ;;  %v5443_v9 = vld [vmem:[%s6678_s8 + $0x48] sm:$0xff]  }
 0x71e   : > { %2918 = vrot.lane.b32.xlu1 %v2913_v12, %s5548_s26 }
 0x78e   : > { %v2917_v18 = vpop.permute.xlu0 %2916 }
 0x78f   : > { %v2922_v19 = vmax.f32 %v2912_v8, %v2917_v18  ;;  %v5451_v18 = vld [vmem:[%s6678_s8 + $0x70] sm:$0xff]  }
 0x790   : > { %v2919_v22 = vpop.permute.xlu1 %2918 }
 0x791   : > { %v2926_v24 = vcombine.high %v2922_v19, %v2922_v19  ;;  %v4432_v26 = vrot.slane %v2922_v19, 9  ;;  %v2923_v61 = vmax.f32 %v2913_v12, %v2919_v22  ;;  %v5446_v12 = vld [vmem:[%s6678_s8] sm:$0xff]   ;;  %v5456_v22 = vld [vmem:[%s6678_s8 + $0x28] sm:$0xff]  }
 0x793   : > { %v4433_v27 = vrot.slane %v2926_v24, 9  ;;  %v2937_v28 = vmax.f32 %v2922_v19, %v4432_v26  ;;  %v4434_v29 = vrot.slane %v2923_v61, 9  ;;  %v5452_v19 = vld [vmem:[%s6678_s8 + $0x18] sm:$0xff]  }
 0x795   : > { %v2938_v31 = vmax.f32 %v2926_v24, %v4433_v27  ;;  %v2946_v32 = vrot.slane %v2937_v28, %v2945_v23  ;;  %v2939_v33 = vmax.f32 %v2923_v61, %v4434_v29  ;;  %v5460_v24 = vld [vmem:[%s6678_s8 + $0x38] sm:$0xff]  }
 0x797   : > { %v2950_v34 = vrot.slane %v2938_v31, %v2945_v23  ;;  %v2958_v35 = vsel %vm522_vm1, %v2937_v28, %v2946_v32  ;;  %v2954_v36 = vrot.slane %v2939_v33, %v2945_v23  ;;  %v5458_v23 = vld [vmem:[%s6678_s8 + $0x30] sm:$0xff]  }
 0x798   : > { %v2973_v37 = vrot.slane %v2958_v35, 1  ;;  %v2964_v54 = vrot.slane %v2958_v35, 7 }
 0x799   : > { %v2959_v40 = vsel %vm522_vm1, %v2938_v31, %v2950_v34  ;;  %v2960_v41 = vsel %vm522_vm1, %v2939_v33, %v2954_v36  ;;  %v4467_v36 = vld [vmem:[%s6679_s9 + $0x6] ss:$0 sm:$0xff] }
 0x79a   : > { %v2974_v42 = vrot.slane %v2959_v40, 1  ;;  %v3011_v43 = vcombine.low %v2958_v35, %v2959_v40  ;;  %v2975_v44 = vrot.slane %v2960_v41, 1  ;;  %v2979_v45 = vsel %vm522_vm1, %v2973_v37, 0.0 }
 0x79b   : > { %v3025_v48 = vrot.slane %v2960_v41, %v6399_v39  ;;  %v2965_v49 = vrot.slane %v2959_v40, 7  ;;  %v2970_v60 = vsel %vm522_vm1, 0.0, %v2964_v54  ;;  %v2966_v62 = vrot.slane %v2960_v41, 7 }
 0x79c   : > { %v2980_v25 = vsel %vm522_vm1, %v2974_v42, 0.0  ;;  %v3018_v47 = vrot.slane %v3011_v43, %v6399_v39  ;;  %v2981_v50 = vsel %vm522_vm1, %v2975_v44, 0.0  ;;  %v3299_v44 = vsub.s32 0, %v6394_v17 }
 0x79d   : > { %v3175_v46 = vcombine.low %v2979_v45, %v2980_v25  ;;  %v3189_v38 = vrot.slane %v2981_v50, %v6399_v39  ;;  %v2971_v58 = vsel %vm522_vm1, 0.0, %v2965_v49  ;;  %v2972_v2 = vsel %vm522_vm1, 0.0, %v2966_v62  ;;  %v5455_v45 = vld [vmem:[%s6678_s8 + $0x80] sm:$0xff]  }
 0x79e   : > { %v3026_v51 = vcombine.low %v3018_v47, %v3025_v48  ;;  %v2985_v0 = vcombine.low %v2970_v60, %v2971_v58  ;;  %v2999_v5 = vrot.slane %v2972_v2, %v6399_v39  ;;  %v3317_v62 = vsub.s32 1, %v6394_v17 }
 0x79f   : > { %v3182_v52 = vrot.slane %v3175_v46, %v6399_v39 }
 0x7a0   : > { %v3028_v56 = vpack.c.bf16 %v3026_v51, %v3026_v51  ;;  %v2992_v4 = vrot.slane %v2985_v0, %v6399_v39  ;;  %v5457_v51 = vld [vmem:[%s6678_s8 + $0x88] sm:$0xff]  }
 0x7a1   : > { %v3190_v57 = vcombine.low %v3182_v52, %v3189_v38 }
 0x7a2   : > { %5128 = vmatmul.mubr.msk.bf16.vlgmr.msra.gmra.mrb[60].mxu1 %vm1595_vm12, %v3028_v56  ;;  %v3000_v53 = vcombine.low %v2992_v4, %v2999_v5  ;;  %v5462_v5 = vld [vmem:[%s6678_s8 + $0xa0] sm:$0xff]  }
 0x7a3   : > { %v3192_v59 = vpack.c.bf16 %v3190_v57, %v3190_v57  ;;  %5132 = vmatpush3.bf16.msra.mxu1 %v5437_v55  ;;  %5139 = vmatprep.mubr.msk.bf16.mxu1 %vm5546_vm0, %v5545_v1  ;;  %v5459_v57 = vld [vmem:[%s6678_s8 + $0x90] sm:$0xff]  }
 0x7a4   : > { %5133 = vmatprep.subr.bf16.mxu1 %v5545_v1  ;;  %v3002_v8 = vpack.c.bf16 %v3000_v53, %v3000_v53 }
 0x7a5   : > { %5152 = vmatmul.mubr.msk.bf16.vlgmr.msra.gmra.mrb[60].mxu0 %vm1595_vm12, %v3192_v59 }
 0x7a6   : > { %5191 = vmatprep.mubr.msk.bf16.mxu0 %vm5546_vm0, %v5545_v1  ;;  %5176 = vmatpush3.bf16.msra.mxu0 %v5446_v12 }
 0x7a7   : > { %5134 = vmatpush3.bf16.msra.mxu1 %v5439_v63  ;;  %5177 = vmatprep.subr.bf16.mxu0 %v5545_v1  ;;  %v5461_v63 = vld [vmem:[%s6678_s8 + $0x98] sm:$0xff]  }
 0x7a8   : > { %5135 = vmatprep.subr.bf16.mxu1 %v5545_v1 }
 0x7aa   : > { %5178 = vmatpush3.bf16.msra.mxu0 %v5448_v14 }
 0x7ab   : > { %5136 = vmatpush3.bf16.msra.mxu1 %v5440_v3  ;;  %5179 = vmatprep.subr.bf16.mxu0 %v5545_v1 }
 0x7ac   : > { %5137 = vmatprep.subr.bf16.mxu1 %v5545_v1 }
 0x7ae   : > { %5180 = vmatpush3.bf16.msra.mxu0 %v5450_v16 }
 0x7af   : > { %5138 = vmatpush3.bf16.msra.mxu1 %v5441_v6  ;;  %5181 = vmatprep.subr.bf16.mxu0 %v5545_v1  ;;  %v5463_v6 = vld [vmem:[%s6678_s8 + $0xa8] sm:$0xff]  }
 0x7b0   : > { %5155 = vmatprep.subr.bf16.mxu1 %v5545_v1 }
 0x7b2   : > { %5140 = vmatmul.mubr.msk.bf16.vlgmr.msra.gmra.mrb[64].mxu1 %vm1595_vm12, %v3002_v8  ;;  %5182 = vmatpush3.bf16.msra.mxu0 %v5452_v19 }
 0x7b3   : > { %5156 = vmatpush3.bf16.msra.mxu1 %v5442_v7  ;;  %5171 = vmatprep.mubr.msk.bf16.mxu1 %vm5546_vm0, %v5545_v1 }
 0x7b4   : > { %5157 = vmatprep.subr.bf16.mxu1 %v5545_v1  ;;  %5183 = vmatprep.subr.bf16.mxu0 %v5545_v1 }
 0x7b6   : > { %5184 = vmatpush3.bf16.msra.mxu0 %v5454_v21 }
 0x7b7   : > { %5158 = vmatpush3.bf16.msra.mxu1 %v5443_v9  ;;  %5185 = vmatprep.subr.bf16.mxu0 %v5545_v1  ;;  %v5464_v9 = vld [vmem:[%s6678_s8 + $0xb0] sm:$0xff]  }
 0x7b8   : > { %5159 = vmatprep.subr.bf16.mxu1 %v5545_v1 }
 0x7ba   : > { %5186 = vmatpush3.bf16.msra.mxu0 %v5456_v22 }
 0x7bb   : > { %5160 = vmatpush3.bf16.msra.mxu1 %v5444_v10  ;;  %5187 = vmatprep.subr.bf16.mxu0 %v5545_v1 }
 0x7bc   : > { %5161 = vmatprep.subr.bf16.mxu1 %v5545_v1 }
 0x7be   : > { %5188 = vmatpush3.bf16.msra.mxu0 %v5458_v23 }
 0x7bf   : > { %5162 = vmatpush3.bf16.msra.mxu1 %v5445_v11  ;;  %5189 = vmatprep.subr.bf16.mxu0 %v5545_v1 }
 0x7c0   : > { %5163 = vmatprep.subr.bf16.mxu1 %v5545_v1 }
 0x7c2   : > { %5190 = vmatpush3.bf16.msra.mxu0 %v5460_v24 }
 0x7c3   : > { %5164 = vmatpush3.bf16.msra.mxu1 %v5447_v13  ;;  %5215 = vmatprep.subr.bf16.mxu0 %v5545_v1  ;;  %v5465_v13 = vld [vmem:[%s6678_s8 + $0xb8] sm:$0xff]  }
 0x7c4   : > { %5165 = vmatprep.subr.bf16.mxu1 %v5545_v1 }
 0x7c7   : > { %5166 = vmatpush3.bf16.msra.mxu1 %v5449_v15 }
 0x7c8   : > { %5167 = vmatprep.subr.bf16.mxu1 %v5545_v1 }
 0x7cb   : > { %5168 = vmatpush3.bf16.msra.mxu1 %v5451_v18 }
 0x7cc   : > { %5169 = vmatprep.subr.bf16.mxu1 %v5545_v1 }
 0x7cf   : > { %5170 = vmatpush3.bf16.msra.mxu1 %v5453_v20 }
 0x7d0   : > { %5195 = vmatprep.subr.bf16.mxu1 %v5545_v1 }
 0x875   : > { %v3099_v26 = vpop.f32.mrb[60].mxu1 }
 0x876   : > { %v5129_v61 = vpop.f32.mrb[61].mxu1 }
 0x877   : > { %v3102_v27 = vpop.f32.mrb[62].mxu1  ;;  %v5466_v61 = vld [vmem:[%s6680_s10] sm:$0xff]  }
 0x878   : > { %v3263_v28 = vpop.f32.mrb[60].mxu0  ;;  %v5130_v29 = vpop.f32.mrb[63].mxu1 }
 0x879   : > { %v5153_v30 = vpop.f32.mrb[61].mxu0 }
 0x87a   : > { %v3266_v31 = vpop.f32.mrb[62].mxu0 }
 0x87b   : > { %v5154_v32 = vpop.f32.mrb[63].mxu0  ;;  %v5467_v31 = vld [vmem:[%s6680_s10 + $0x8] sm:$0xff]  }
 0x885   : > { %v3166_v33 = vpop.f32.mrb[64].mxu1 }
 0x886   : > { %v3167_v34 = vadd.f32 %v3166_v33, %v3099_v26  ;;  %v5141_v35 = vpop.f32.mrb[65].mxu1 }
 0x887   : > { %v3169_v37 = vpop.f32.mrb[66].mxu1 }
 0x888   : > { %v3269_v40 = vadd.f32 %v3263_v28, %v3167_v34  ;;  %v5142_v41 = vpop.f32.mrb[67].mxu1  ;;  %v4525_v28 = vld [vmem:[%s6679_s9 + $0x7] ss:$0 sm:$0xff]  ;;  %v5469_v37 = vld [vmem:[%s6680_s10 + $0x18] sm:$0xff]  }
 0x88a   : > { %v3278_v42 = vadd.f32 %v4467_v36, %v3269_v40  ;;  %v5468_v36 = vld [vmem:[%s6680_s10 + $0x10] sm:$0xff]  }
 0x88c   : > { %v3279_v43 = vmax.f32 %v3278_v42, 0.0 }
 0x88e   : > { %v3281_v25 = vcombine.high %v3279_v43, %v3279_v43  ;;  %v3288_v46 = vrot.slane %v3279_v43, %v6399_v39  ;;  %v3370_v47 = vpack.c.bf16 %v3279_v43, %v3279_v43 }
 0x890   : > { %v3295_v48 = vrot.slane %v3281_v25, %v6399_v39  ;;  %v3296_v49 = vcombine.high %v3288_v46, %v3288_v46  ;;  %v3300_v50 = vrot.slane %v3288_v46, %v3299_v44  ;;  %5172 = vmatmul.mubr.bf16.vlgmr.msra.gmra.mrb[68].mxu1 %v3370_v47  ;;  %v3318_v4 = vrot.slane %v3288_v46, %v3317_v62 }
 0x891   : > { %5196 = vmatpush3.bf16.msra.mxu1 %v5455_v45  ;;  %5211 = vmatprep.mubr.msk.bf16.mxu1 %vm5546_vm0, %v5545_v1 }
 0x892   : > { %5197 = vmatprep.subr.bf16.mxu1 %v5545_v1  ;;  %v3304_v38 = vrot.slane %v3296_v49, %v3299_v44  ;;  %v3308_v52 = vrot.slane %v3295_v48, %v3299_v44  ;;  %v3312_v54 = vsel %vm522_vm1, 0.0, %v3300_v50  ;;  %v3322_v3 = vrot.slane %v3296_v49, %v3317_v62 }
 0x893   : > { %v3326_v53 = vrot.slane %v3295_v48, %v3317_v62  ;;  %v3330_v7 = vsel %vm522_vm1, %v3318_v4, 0.0  ;;  %v5475_v4 = vld [vmem:[%s6682_s12 + $0x28] sm:$0xff]  }
 0x894   : > { %v3313_v55 = vsel %vm522_vm1, 0.0, %v3304_v38  ;;  %v3314_v56 = vsel %vm522_vm1, 0.0, %v3308_v52  ;;  %v3331_v17 = vsel %vm522_vm1, %v3322_v3, 0.0  ;;  %v5474_v3 = vld [vmem:[%s6682_s12 + $0x20] sm:$0xff]  }
 0x895   : > { %5198 = vmatpush3.bf16.msra.mxu1 %v5457_v51  ;;  %v3336_v58 = vcombine.low %v3312_v54, %v3313_v55  ;;  %v3350_v60 = vrot.slane %v3314_v56, %v6399_v39  ;;  %v3567_v8 = vcombine.low %v3330_v7, %v3331_v17  ;;  %v3332_v10 = vsel %vm522_vm1, %v3326_v53, 0.0  ;;  %v5477_v17 = vld [vmem:[%s6682_s12 + $0x38] sm:$0xff]  }
 0x896   : > { %5199 = vmatprep.subr.bf16.mxu1 %v5545_v1  ;;  %v3581_v12 = vrot.slane %v3332_v10, %v6399_v39  ;;  %vm3763_vm1 = vcmask 1041409  }
 0x897   : > { %v3343_v59 = vrot.slane %v3336_v58, %v6399_v39  ;;  %v3574_v11 = vrot.slane %v3567_v8, %v6399_v39 }
 0x899   : > { %5200 = vmatpush3.bf16.msra.mxu1 %v5459_v57  ;;  %v3351_v0 = vcombine.low %v3343_v59, %v3350_v60  ;;  %v3582_v14 = vcombine.low %v3574_v11, %v3581_v12 }
 0x89a   : > { %5201 = vmatprep.subr.bf16.mxu1 %v5545_v1 }
 0x89b   : > { %v3353_v2 = vpack.c.bf16 %v3351_v0, %v3351_v0  ;;  %v3584_v15 = vpack.c.bf16 %v3582_v14, %v3582_v14  ;;  %v5472_v0 = vld [vmem:[%s6682_s12 + $0x10] sm:$0xff]  }
 0x89d   : > { %5202 = vmatpush3.bf16.msra.mxu1 %v5461_v63  ;;  %5192 = vmatmul.mubr.bf16.vlgmr.msra.gmra.mrb[64].mxu0 %v3353_v2  ;;  %v5471_v63 = vld [vmem:[%s6682_s12 + $0x8] sm:$0xff]   ;;  %v5473_v2 = vld [vmem:[%s6682_s12 + $0x18] sm:$0xff]  }
 0x89e   : > { %5203 = vmatprep.subr.bf16.mxu1 %v5545_v1  ;;  %5223 = vmatprep.mubr.msk.bf16.mxu0 %vm5546_vm0, %v5545_v1 }
 0x89f   : > { %5216 = vmatpush3.bf16.msra.mxu0 %v5466_v61 }
 0x8a0   : > { %5217 = vmatprep.subr.bf16.mxu0 %v5545_v1 }
 0x8a1   : > { %5204 = vmatpush3.bf16.msra.mxu1 %v5462_v5  ;;  %v5476_v5 = vld [vmem:[%s6682_s12 + $0x30] sm:$0xff]  }
 0x8a2   : > { %5205 = vmatprep.subr.bf16.mxu1 %v5545_v1 }
 0x8a3   : > { %5218 = vmatpush3.bf16.msra.mxu0 %v5467_v31 }
 0x8a4   : > { %5219 = vmatprep.subr.bf16.mxu0 %v5545_v1 }
 0x8a5   : > { %5206 = vmatpush3.bf16.msra.mxu1 %v5463_v6  ;;  %v4529_v6 = vld [vmem:[%s6681_s11] ss:$0 sm:$0xff] }
 0x8a6   : > { %5207 = vmatprep.subr.bf16.mxu1 %v5545_v1 }
 0x8a7   : > { %5220 = vmatpush3.bf16.msra.mxu0 %v5468_v36 }
 0x8a8   : > { %5221 = vmatprep.subr.bf16.mxu0 %v5545_v1 }
 0x8a9   : > { %5208 = vmatpush3.bf16.msra.mxu1 %v5464_v9 }
 0x8aa   : > { %5209 = vmatprep.subr.bf16.mxu1 %v5545_v1 }
 0x8ab   : > { %5222 = vmatpush3.bf16.msra.mxu0 %v5469_v37 }
 0x8ac   : > { %5227 = vmatprep.subr.bf16.mxu0 %v5545_v1 }
 0x8ad   : > { %5210 = vmatpush3.bf16.msra.mxu1 %v5465_v13 }
 0x8b0   : > { %5212 = vmatmul.mubr.bf16.vlgmr.msra.gmra.mrb[72].mxu1 %v3584_v15 }
 0x963   : > { %v3470_v16 = vpop.f32.mrb[68].mxu1 }
 0x964   : > { %v5173_v18 = vpop.f32.mrb[69].mxu1 }
 0x965   : > { %v3473_v19 = vpop.f32.mrb[70].mxu1 }
 0x966   : > { %v5174_v20 = vpop.f32.mrb[71].mxu1 }
 0x970   : > { %v3558_v21 = vpop.f32.mrb[64].mxu0 }
 0x971   : > { %v3559_v22 = vadd.f32 %v3558_v21, %v3470_v16  ;;  %v5193_v23 = vpop.f32.mrb[65].mxu0 }
 0x972   : > { %v3561_v24 = vpop.f32.mrb[66].mxu0 }
 0x973   : > { %v5194_v26 = vpop.f32.mrb[67].mxu0 }
 0x983   : > { %v3684_v27 = vpop.f32.mrb[72].mxu1 }
 0x984   : > { %v3690_v29 = vadd.f32 %v3684_v27, %v3559_v22  ;;  %v5213_v30 = vpop.f32.mrb[73].mxu1 }
 0x985   : > { %v3687_v32 = vpop.f32.mrb[74].mxu1 }
 0x986   : > { %v3699_v33 = vadd.f32 %v4525_v28, %v3690_v29  ;;  %v5214_v34 = vpop.f32.mrb[75].mxu1 }
 0x988   : > { %v3700_v35 = vmax.f32 %v3699_v33, 0.0 }
 0x98a   : > { %3702 = vrot.lane.b32.xlu0 %v3700_v35, %s5548_s26  ;;  %s4063_s26 = sshll.u32 %s5701_s17, 2  ;;  %s4544_s17 = sshll.u32 %s5652_s22, 4 }
 0x98b   : > { %s502_s30 = scalar_lea.vmem %s6684_s14, %s4063_s26  ;;  %s6628_s18 = scalar_lea.hbm %s6685_s15, %s4544_s17 }
 0x98c   : > { %s3964_s26 = scalar_lea.sflag [#allocation3], %s492_s27  ;;  %s5550_s22 = smov [#allocation2]  }
 0x98d   : > { %s5485_s29 = sshll.u32 %s5550_s22, 4  ;;  %s5486_s29 = int_to_ptr.vmem [resolvable:$false] %s5485_s29 }
 0x98e   : > { %p5488_p0 = scmp.lt.s32.totalorder %s6630_s16, %s5486_s29 }
 0x9fc   : > { %v3703_v40 = vpop.permute.xlu0 %3702 }
 0x9fd   : > { %v3705_v41 = vmax.f32 %v3700_v35, %v3703_v40 }
 0x9ff   : > { %v3707_v42 = vcombine.high %v3705_v41, %v3705_v41  ;;  %v3714_v43 = vrot.slane %v3705_v41, %v6399_v39 }
 0xa01   : > { %v3721_v44 = vrot.slane %v3707_v42, %v6399_v39  ;;  %v3722_v45 = vcombine.high %v3714_v43, %v3714_v43  ;;  %v4526_v25 = vrot.slane %v3714_v43, 9  ;;  %v5470_v39 = vld [vmem:[%s6682_s12] sm:$0xff]  }
 0xa03   : > { %v4527_v46 = vrot.slane %v3722_v45, 9  ;;  %v4528_v47 = vrot.slane %v3721_v44, 9  ;;  %v3735_v48 = vmax.f32 %v3714_v43, %v4526_v25 }
 0xa05   : > { %v3736_v49 = vmax.f32 %v3722_v45, %v4527_v46  ;;  %v3737_v50 = vmax.f32 %v3721_v44, %v4528_v47  ;;  %v3738_v51 = vpack.c.bf16 %v3735_v48, %v3735_v48 }
 0xa07   : > { %v3739_v38 = vpack.c.bf16 %v3736_v49, %v3736_v49  ;;  %v3740_v52 = vpack.c.bf16 %v3737_v50, %v3737_v50  ;;  %v3759_v56 = vunpack.c.l.b16 %v3738_v51 }
 0xa09   : > { %v3760_v54 = vunpack.c.l.b16 %v3739_v38  ;;  %v3761_v55 = vunpack.c.l.b16 %v3740_v52 }
 0xa0b   : > { %v3762_v57 = vrot.slane %v3760_v54, 7  ;;  %v3765_v58 = vrot.slane %v3761_v55, 6 }
 0xa0d   : > { %v3764_v59 = vsel %vm3763_vm1, %v3762_v57, %v3759_v56 }
 0xa0e   : > { %v3767_v60 = vsel %vm3766_vm3, %v3765_v58, %v3764_v59 }
 0xa0f   : > { %v3768_v62 = vpack.c.b16 %v3767_v60, %v3767_v60 }
 0xa11   : > { %5224 = vmatmul.mubr.msk.bf16.vlgmr.msra.gmra.mrb[68].mxu0 %vm1595_vm12, %v3768_v62 }
 0xa12   : > { %5228 = vmatpush3.bf16.msra.mxu0 %v5470_v39  ;;  %5243 = vmatprep.mubr.msk.bf16.mxu0 %vm5546_vm0, %v5545_v1 }
 0xa13   : > { %5229 = vmatprep.subr.bf16.mxu0 %v5545_v1 }
 0xa16   : > { %5230 = vmatpush3.bf16.msra.mxu0 %v5471_v63 }
 0xa17   : > { %5231 = vmatprep.subr.bf16.mxu0 %v5545_v1 }
 0xa1a   : > { %5232 = vmatpush3.bf16.msra.mxu0 %v5472_v0 }
 0xa1b   : > { %5233 = vmatprep.subr.bf16.mxu0 %v5545_v1 }
 0xa1e   : > { %5234 = vmatpush3.bf16.msra.mxu0 %v5473_v2 }
 0xa1f   : > { %5235 = vmatprep.subr.bf16.mxu0 %v5545_v1 }
 0xa22   : > { %5236 = vmatpush3.bf16.msra.mxu0 %v5474_v3 }
 0xa23   : > { %5237 = vmatprep.subr.bf16.mxu0 %v5545_v1 }
 0xa26   : > { %5238 = vmatpush3.bf16.msra.mxu0 %v5475_v4 }
 0xa27   : > { %5239 = vmatprep.subr.bf16.mxu0 %v5545_v1 }
 0xa2a   : > { %5240 = vmatpush3.bf16.msra.mxu0 %v5476_v5 }
 0xa2b   : > { %5241 = vmatprep.subr.bf16.mxu0 %v5545_v1  ;;  %v4535_v1 = vld [vmem:[%s6683_s13] ss:$0 sm:$0xff] }
 0xa2e   : > { %5242 = vmatpush3.bf16.msra.mxu0 %v5477_v17 }
 0xae4   : > { %v3830_v53 = vpop.f32.mrb[68].mxu0 }
 0xae5   : > { %v3831_v7 = vadd.f32 %v4529_v6, %v3830_v53  ;;  %v5225_v8 = vpop.f32.mrb[69].mxu0 }
 0xae6   : > { %v3833_v9 = vpop.f32.mrb[70].mxu0 }
 0xae7   : > { %v3836_v10 = vmax.f32 %v3831_v7, 0.0  ;;  %v5226_v11 = vpop.f32.mrb[71].mxu0 }
 0xae9   : > { %v3837_v12 = vpack.c.bf16 %v3836_v10, %v3836_v10 }
 0xaeb   : > { %5244 = vmatmul.mubr.bf16.vlgmr.msra.gmra.mrb[72].mxu0 %v3837_v12 }
 0xbbe   : > { %v3943_v13 = vpop.f32.mrb[72].mxu0 }
 0xbbf   : > { %v3944_v14 = vadd.f32 %v4535_v1, %v3943_v13  ;;  %v5245_v15 = vpop.f32.mrb[73].mxu0 }
 0xbc0   : > { %v3946_v16 = vpop.f32.mrb[74].mxu0 }
 0xbc1   : > { %v3949_v18 = vmax.f32 %v3944_v14, 0.0  ;;  %v5246_v19 = vpop.f32.mrb[75].mxu0 }
 0xbc3   : > { %3950 = vst [vmem:[%s502_s30] sm:$0x7] %v3949_v18  ;;  %v3951_v20 = vsel %vm1510_vm8, %v3949_v18, -inf  ;;  %s5487_s30 = scalar_lea.vmem %s5486_s29, 32 }
 0xbc4   : > { %v3952_v21 = vrot.slane %v3951_v20, 4  ;;  %p5489_p1 = scmp.lt.s32.totalorder %s5487_s30, %s5481_s24 }
 0xbc6   : > { %v3953_v22 = vmax.f32 %v3951_v20, %v3952_v21  ;;  %p5490_p2 = por %p5489_p1, %p5488_p0 }
 0xbc8   : > { %v3954_v23 = vrot.slane %v3953_v22, 2  ;;  %p5491_p3 = pnand %p5490_p2, %p5484_p13 }
 0xbca   : > { %v3955_v24 = vmax.f32 %v3953_v22, %v3954_v23 }
 0xbcc   : > { %v3956_v26 = vrot.slane %v3955_v24, 1 }
 0xbce   : > { %v3957_v61 = vmax.f32 %v3955_v24, %v3956_v26 }
 0xbd0   : > { %3958 = vst [vmem:[%s493_s20] sm:$0x1] %v3957_v61 }
 0xbd1   : > { %5494 = shalt.err (!%p5491_p3)
}
 0xbd2   : > { %s5495_s27 = scalar_lea.hbm %s6628_s18, 16  ;;  %s5499_s23 = scalar_lea.hbm %s6685_s15, 32 }
 0xbd3   : > { %p5496_p4 = scmp.ne.s32.totalorder %s6628_s18, %s5495_s27  ;;  %p5500_p9 = scmp.lt.u32.totalorder %s6628_s18, %s6685_s15 }
 0xbd4   : > { %p5501_p10 = scmp.lt.u32.totalorder %s5499_s23, %s5495_s27  ;;  %p5503_p12 = scmp.lt.u32.totalorder %s5495_s27, %s6628_s18 }
 0xbd5   : > { %p5497_p7 = pnand %p5496_p4, %p5669_p5 }
 0xbd6   : > { %p5502_p11 = por %p5501_p10, %p5500_p9 }
 0xbd7   : > { %p5498_p8 = pneg %p5497_p7 }
 0xbd8   : > { %p5504_p13 = por %p5503_p12, %p5502_p11 }
 0xbda   : > { %p5505_p0 = pnand %p5504_p13, %p5498_p8 }
 0xbdc   : > { %5508 = shalt.err (!%p5505_p0)
}
 0xbdd   : > { %5248 = dma.vmem_to_hbm [thread:$0]  (%p5669_p5), %s6630_s16, 16, %s6628_s18, %s3964_s26  }
 0xbde PF: > { %s6706_s24 = sld [smem:[#allocation5_spill]]  ;;  %p5254_p1 = scmp.ge.s32.totalorder %s5543_s21, 2 }
 0xbe0   : > { %p5251_p2 = pnand %p5254_p1, %p5673_p6 }
 0xbe4   : > { %s3998_s30 = sand.u32 1, %s6706_s24  }
 0xbe5   : > { %s3999_s17 = scalar_lea.sflag [#allocation3], %s3998_s30 }
 0xbe6   : > { %5526 = dma.done.wait (!%p5251_p2), %s3999_s17, 16  }
 0xbe7   : > { %5528 = vsyncadd (!%p5251_p2), %s3999_s17, 4294967280  ;;  %s6708_s21 = sld [smem:[#allocation7_spill]]  ;;  %s6709_s27 = sld [smem:[#allocation6_spill]] }
 0xbe8   : > { %s6710_s20 = sld [smem:[#allocation8_spill]]  ;;  %s6711_s18 = smov %s5535_s19 }
 0xbed   : > { %p26_p3 = scmp.ge.s32.totalorder %s6708_s21, 4   ;;  %s6712_s19 = smov %s6709_s27 }
 0xbef   :  { %28 = sbr.rel (!%p26_p3) target bundleno = 3 (0x3), region = 146 }
 0xbf6   :  { %4003 = vsyncpa [#allocation3], 1 }
 0xbf7   :  { %4005 = vsyncpa [#allocation3 + $0x1], 1 }

</bundles_post_ra>
